<compile_context>
chip_gen: v7x
topology: tpu7x:2x2x1
jax: 0.10.0
libtpu: 0.0.40
codegen_flags: <defaults>
</compile_context>

<pallas_src>
import jax
import jax.numpy as jnp
from jax import lax
from jax.experimental import pallas as pl
from jax.experimental.pallas import tpu as pltpu

# ---- sizes (small, consistent with the forward) ----
B = 2        # batch
S = 16       # sequence length
H = 128      # LM hidden size (CLS embedding dim)
V = 100      # vocab size
N = 1206     # graph nodes (hard-coded in the PyTorch forward)
F = 128      # node feature dim
D = 128      # HGCN output dim (hard-coded in the PyTorch forward)

TM = 512     # HGCN adjacency row tile (multiple of 8/32; 3 tiles per graph)
NEG_INF = -1e9


def _fused_kernel(tok_ref, mask_ref, wq_ref, wk_ref, wv_ref, wo_ref,
                  feat_ref, adj_ref, w_ref, b_ref,
                  code_out_ref, desc_out_ref,
                  h_ref, cls_ref, carry_ref):
    i = pl.program_id(1)                     # row-tile index within the graph
    tm = adj_ref.shape[1]
    _, two, s, hh = tok_ref.shape            # (1, 2, S, H)

    # ---------------- per-batch work: LM CLS + h = X @ W (tile 0 only) -------
    @pl.when(i == 0)
    def _():
        # LM stand-in: one masked self-attention block, CLS (position 0) only.
        x = tok_ref[0].reshape(two * s, hh)                      # (2S, H) bf16
        k = jnp.dot(x, wk_ref[...], preferred_element_type=jnp.float32)
        v = jnp.dot(x, wv_ref[...], preferred_element_type=jnp.float32)
        x_cls = jnp.concatenate([x[0:1, :], x[s:s + 1, :]], axis=0)   # (2, H)
        q_cls = jnp.dot(x_cls, wq_ref[...], preferred_element_type=jnp.float32)
        scale = 1.0 / (hh ** 0.5)
        qb = (q_cls * scale).astype(jnp.bfloat16)
        kb = k.astype(jnp.bfloat16)
        vb = v.astype(jnp.bfloat16)
        m = mask_ref[0]                                          # (2, S) f32

        def cls_attend(q_row, k_rows, v_rows, m_row):
            # (1,H) query vs (S,H) keys; only KEY positions are masked.
            sc = lax.dot_general(q_row, k_rows, (((1,), (1,)), ((), ())),
                                 preferred_element_type=jnp.float32)   # (1, S)
            sc = jnp.where(m_row > 0.5, sc, NEG_INF)
            sc = sc - jnp.max(sc, axis=-1, keepdims=True)
            p = jnp.exp(sc)
            # approx reciprocal (EUP): ~2^-12 relative error vs exact softmax.
            p = p * pl.reciprocal(jnp.sum(p, axis=-1, keepdims=True), approx=True)
            return jnp.dot(p.astype(jnp.bfloat16), v_rows,
                           preferred_element_type=jnp.float32)          # (1, H)

        ctx_c = cls_attend(qb[0:1, :], kb[0:s, :], vb[0:s, :], m[0:1, :])
        ctx_d = cls_attend(qb[1:2, :], kb[s:2 * s, :], vb[s:2 * s, :], m[1:2, :])
        cls_ref[0] = (jnp.dot(ctx_c.astype(jnp.bfloat16), wo_ref[...],
                              preferred_element_type=jnp.float32)
                      + x_cls[0:1, :].astype(jnp.float32))
        cls_ref[1] = (jnp.dot(ctx_d.astype(jnp.bfloat16), wo_ref[...],
                              preferred_element_type=jnp.float32)
                      + x_cls[1:2, :].astype(jnp.float32))

        # HGCN: h = X W once per graph (bf16 MXU, f32 accumulate, stored bf16;
        # bf16 h slightly rounds the subsequent A@h sum vs an f32 reference).
        h_ref[...] = jnp.dot(feat_ref[0].astype(jnp.bfloat16), w_ref[...],
                             preferred_element_type=jnp.float32).astype(jnp.bfloat16)

    # ---------------- graph row tile: tanh(A_tile @ h + b) -------------------
    # Adjacency is 0/1 stored as int8 in HBM; in-kernel upcast to bf16 is exact.
    adj = adj_ref[0].astype(jnp.bfloat16)                        # (TM, N)
    agg = jnp.dot(adj, h_ref[...], preferred_element_type=jnp.float32)
    res = jnp.tanh(agg + b_ref[...])                             # (TM, D) f32

    # Shift graph rows down by one slab row (slab row 0 is the CLS):
    #   out_block[0]  = previous tile's last graph row (carry)
    #   out_block[r]  = res[r-1]                         for r >= 1
    # The last (partial) block's extra rows are masked by Pallas on writeback.
    shifted = jnp.concatenate([carry_ref[...], res[:tm - 1, :]], axis=0)
    code_out_ref[0] = shifted
    desc_out_ref[0] = shifted

    @pl.when(i == 0)
    def _():
        # First slab row of the graph is the CLS embedding (code / desc).
        code_out_ref[0, 0:1, :] = cls_ref[0]
        desc_out_ref[0, 0:1, :] = cls_ref[1]

    carry_ref[...] = res[tm - 1:tm, :]      # garbage on the last tile: unused


# --------------------------------------------------------------------------
# HyperCode.forward equivalent
# --------------------------------------------------------------------------
def hypercode_forward(code_ids, desc_ids, code_attention_mask,
                      desc_attention_mask, adj_list, feature_list, params):
    bsz, seq = code_ids.shape
    n = adj_list.shape[1]
    f = feature_list.shape[2]
    d = params["w_gcn"].shape[1]
    h = params["wq"].shape[0]
    tm = TM
    t = pl.cdiv(n, tm)

    # Token embeddings for code/desc, stacked per batch: (B, 2, S, H) bf16.
    emb = params["embedding"].astype(jnp.bfloat16)
    tok = jnp.stack([emb[code_ids], emb[desc_ids]], axis=1)
    mask = jnp.stack([code_attention_mask, desc_attention_mask],
                     axis=1).astype(jnp.float32)                     # (B, 2, S)

    # Binary adjacency stored as int8 (exact for 0/1); upstream should already
    # materialize it as int8 so this cast is a no-op.
    adj_i8 = adj_list if adj_list.dtype == jnp.int8 else adj_list.astype(jnp.int8)

    wq = params["wq"].astype(jnp.bfloat16)
    wk = params["wk"].astype(jnp.bfloat16)
    wv = params["wv"].astype(jnp.bfloat16)
    wo = params["wo"].astype(jnp.bfloat16)
    w_gcn = params["w_gcn"].astype(jnp.bfloat16)
    b_gcn = params["b_gcn"].astype(jnp.float32)

    cost = pl.CostEstimate(
        flops=2 * bsz * n * n * d + 2 * bsz * n * f * d + 8 * bsz * seq * h * h,
        transcendentals=bsz * n * d + 4 * bsz * seq,
        bytes_accessed=(adj_i8.size + feature_list.size * 4
                        + 2 * bsz * (n + 1) * d * 4 + tok.size * 2
                        + 5 * h * h * 2))

    grid_spec = pltpu.PrefetchScalarGridSpec(
        num_scalar_prefetch=0,
        grid=(bsz, t),
        in_specs=[
            pl.BlockSpec((1, 2, seq, h), lambda b, i: (b, 0, 0, 0)),  # tok (per batch)
            pl.BlockSpec((1, 2, seq), lambda b, i: (b, 0, 0)),        # masks
            pl.BlockSpec((h, h), lambda b, i: (0, 0)),                # wq
            pl.BlockSpec((h, h), lambda b, i: (0, 0)),                # wk
            pl.BlockSpec((h, h), lambda b, i: (0, 0)),                # wv
            pl.BlockSpec((h, h), lambda b, i: (0, 0)),                # wo
            pl.BlockSpec((1, n, f), lambda b, i: (b, 0, 0)),          # feat (per batch)
            pl.BlockSpec((1, tm, n), lambda b, i: (b, i, 0)),         # adj row tile (int8)
            pl.BlockSpec((f, d), lambda b, i: (0, 0)),                # w_gcn
            pl.BlockSpec((1, d), lambda b, i: (0, 0)),                # b_gcn
        ],
        out_specs=[
            pl.BlockSpec((1, tm, d), lambda b, i: (b, i, 0)),         # code slab rows
            pl.BlockSpec((1, tm, d), lambda b, i: (b, i, 0)),         # desc slab rows
        ],
        scratch_shapes=[
            pltpu.VMEM((n, d), jnp.bfloat16),      # h = X W, per graph
            pltpu.VMEM((2, 1, h), jnp.float32),    # CLS (code, desc), per batch
            pltpu.VMEM((1, d), jnp.float32),       # carry: last graph row of prev tile
        ],
    )

    code_slab, desc_slab = pl.pallas_call(
        _fused_kernel,
        out_shape=(jax.ShapeDtypeStruct((bsz, n + 1, d), jnp.float32),
                   jax.ShapeDtypeStruct((bsz, n + 1, d), jnp.float32)),
        grid_spec=grid_spec,
        cost_estimate=cost,
        compiler_params=pltpu.CompilerParams(
            dimension_semantics=("parallel", "arbitrary")),
    )(tok, mask, wq, wk, wv, wo, feature_list, adj_i8, w_gcn, b_gcn)

    # (B, N+1, D) -> (B, H + N*D) is a free contiguous view (H == D == 128):
    # columns [0:128) = CLS embedding, [128:) = flattened graph embedding,
    # i.e. exactly torch.cat((cls, graph_embedding.flatten(1)), 1).
    return code_slab.reshape(bsz, -1), desc_slab.reshape(bsz, -1)


if __name__ == "__main__":
    key = jax.random.PRNGKey(0)
    (k_code, k_desc, k_adj, k_feat, k_emb,
     kq, kk, kv, ko, kw) = jax.random.split(key, 10)

    # inputs
    code_ids = jax.random.randint(k_code, (B, S), 0, V, dtype=jnp.int32)
    desc_ids = jax.random.randint(k_desc, (B, S), 0, V, dtype=jnp.int32)
    code_attention_mask = jnp.ones((B, S), dtype=jnp.int32).at[:, S - 3:].set(0)
    desc_attention_mask = jnp.ones((B, S), dtype=jnp.int32).at[:, S - 5:].set(0)
    # Binary adjacency materialized directly as int8 (exact for 0/1 values).
    adj_list = jax.random.bernoulli(k_adj, 0.01, (B, N, N)).astype(jnp.int8)
    feature_list = jax.random.normal(k_feat, (B, N, F), dtype=jnp.float32)

    # deterministic parameters
    params = {
        "embedding": 0.02 * jax.random.normal(k_emb, (V, H), dtype=jnp.float32),
        "wq": jax.random.normal(kq, (H, H), dtype=jnp.float32) / (H ** 0.5),
        "wk": jax.random.normal(kk, (H, H), dtype=jnp.float32) / (H ** 0.5),
        "wv": jax.random.normal(kv, (H, H), dtype=jnp.float32) / (H ** 0.5),
        "wo": jax.random.normal(ko, (H, H), dtype=jnp.float32) / (H ** 0.5),
        "w_gcn": jax.random.normal(kw, (F, D), dtype=jnp.float32) / (F ** 0.5),
        "b_gcn": jnp.zeros((1, D), dtype=jnp.float32),
    }

    code_embeds, desc_embeds = jax.jit(hypercode_forward)(
        code_ids, desc_ids, code_attention_mask, desc_attention_mask,
        adj_list, feature_list, params)
    jax.block_until_ready((code_embeds, desc_embeds))

    assert code_embeds.shape == (B, H + N * D), code_embeds.shape
    assert desc_embeds.shape == (B, H + N * D), desc_embeds.shape
    print("KERNEL_OK")
</pallas_src>

<mosaic_0001>
module attributes {stable_mosaic.version = 11 : i64} {
  func.func @_fused_kernel(%arg0: i32, %arg1: i32, %arg2: memref<1x2x16x128xbf16, #tpu.memory_space<vmem>>, %arg3: memref<1x2x16xf32, #tpu.memory_space<vmem>>, %arg4: memref<128x128xbf16, #tpu.memory_space<vmem>>, %arg5: memref<128x128xbf16, #tpu.memory_space<vmem>>, %arg6: memref<128x128xbf16, #tpu.memory_space<vmem>>, %arg7: memref<128x128xbf16, #tpu.memory_space<vmem>>, %arg8: memref<1x1206x128xf32, #tpu.memory_space<vmem>>, %arg9: memref<1x512x1206xi8, #tpu.memory_space<vmem>>, %arg10: memref<128x128xbf16, #tpu.memory_space<vmem>>, %arg11: memref<1x128xf32, #tpu.memory_space<vmem>>, %arg12: memref<1x512x128xf32, #tpu.memory_space<vmem>>, %arg13: memref<1x512x128xf32, #tpu.memory_space<vmem>>, %arg14: memref<1206x128xbf16, #tpu.memory_space<vmem>>, %arg15: memref<2x1x128xf32, #tpu.memory_space<vmem>>, %arg16: memref<1x128xf32, #tpu.memory_space<vmem>>) attributes {dimension_semantics = [#tpu.dimension_semantics<parallel>, #tpu.dimension_semantics<arbitrary>], iteration_bounds = array<i64: 2, 3>, scalar_prefetch = 0 : i64, scratch_operands = 3 : i64, tpu.core_type = #tpu.core_type<tc>, window_params = [{transform_indices = @transform_0, window_bounds = array<i64: 1, 2, 16, 128>}, {transform_indices = @transform_1, window_bounds = array<i64: 1, 2, 16>}, {pipeline_mode = #tpu.pipeline_mode<synchronous>, transform_indices = @transform_2, window_bounds = array<i64: 128, 128>}, {pipeline_mode = #tpu.pipeline_mode<synchronous>, transform_indices = @transform_3, window_bounds = array<i64: 128, 128>}, {pipeline_mode = #tpu.pipeline_mode<synchronous>, transform_indices = @transform_4, window_bounds = array<i64: 128, 128>}, {pipeline_mode = #tpu.pipeline_mode<synchronous>, transform_indices = @transform_5, window_bounds = array<i64: 128, 128>}, {transform_indices = @transform_6, window_bounds = array<i64: 1, 1206, 128>}, {transform_indices = @transform_7, window_bounds = array<i64: 1, 512, 1206>}, {pipeline_mode = #tpu.pipeline_mode<synchronous>, transform_indices = @transform_8, window_bounds = array<i64: 128, 128>}, {pipeline_mode = #tpu.pipeline_mode<synchronous>, transform_indices = @transform_9, window_bounds = array<i64: 1, 128>}, {transform_indices = @transform_10, window_bounds = array<i64: 1, 512, 128>}, {transform_indices = @transform_11, window_bounds = array<i64: 1, 512, 128>}]} {
    %c0_i32 = arith.constant 0 : i32
    %0 = arith.cmpi eq, %arg1, %c0_i32 : i32
    %1 = arith.extui %0 : i1 to i32
    %c0_i32_0 = arith.constant 0 : i32
    %2 = arith.cmpi ne, %1, %c0_i32_0 : i32
    scf.if %2 {
      %c0_19 = arith.constant 0 : index
      %c0_20 = arith.constant 0 : index
      %c0_21 = arith.constant 0 : index
      %c0_22 = arith.constant 0 : index
      %26 = vector.load %arg2[%c0_19, %c0_20, %c0_21, %c0_22] : memref<1x2x16x128xbf16, #tpu.memory_space<vmem>>, vector<1x2x16x128xbf16>
      %27 = vector.shape_cast %26 : vector<1x2x16x128xbf16> to vector<2x16x128xbf16>
      %28 = vector.shape_cast %27 : vector<2x16x128xbf16> to vector<32x128xbf16>
      %c0_23 = arith.constant 0 : index
      %c0_24 = arith.constant 0 : index
      %29 = vector.load %arg5[%c0_23, %c0_24] : memref<128x128xbf16, #tpu.memory_space<vmem>>, vector<128x128xbf16>
      %cst_25 = arith.constant dense<0.000000e+00> : vector<32x128xf32>
      %30 = tpu.matmul %28, %29, %cst_25 {dimension_numbers = #tpu.dot_dimension_numbers<[1], [0], [0], [1], [0, 0, 1, 1], [], []>} : vector<32x128xbf16>, vector<128x128xbf16>, vector<32x128xf32> -> vector<32x128xf32>
      %c0_26 = arith.constant 0 : index
      %c0_27 = arith.constant 0 : index
      %31 = vector.load %arg6[%c0_26, %c0_27] : memref<128x128xbf16, #tpu.memory_space<vmem>>, vector<128x128xbf16>
      %cst_28 = arith.constant dense<0.000000e+00> : vector<32x128xf32>
      %32 = tpu.matmul %28, %31, %cst_28 {dimension_numbers = #tpu.dot_dimension_numbers<[1], [0], [0], [1], [0, 0, 1, 1], [], []>} : vector<32x128xbf16>, vector<128x128xbf16>, vector<32x128xf32> -> vector<32x128xf32>
      %33 = vector.extract_strided_slice %28 {offsets = [0, 0], sizes = [1, 128], strides = [1, 1]} : vector<32x128xbf16> to vector<1x128xbf16>
      %34 = vector.extract_strided_slice %28 {offsets = [16, 0], sizes = [1, 128], strides = [1, 1]} : vector<32x128xbf16> to vector<1x128xbf16>
      %35 = tpu.concatenate %33, %34 in 0 : vector<1x128xbf16>, vector<1x128xbf16> -> vector<2x128xbf16>
      %c0_29 = arith.constant 0 : index
      %c0_30 = arith.constant 0 : index
      %36 = vector.load %arg4[%c0_29, %c0_30] : memref<128x128xbf16, #tpu.memory_space<vmem>>, vector<128x128xbf16>
      %cst_31 = arith.constant dense<0.000000e+00> : vector<2x128xf32>
      %37 = tpu.matmul %35, %36, %cst_31 {dimension_numbers = #tpu.dot_dimension_numbers<[1], [0], [0], [1], [0, 0, 1, 1], [], []>} : vector<2x128xbf16>, vector<128x128xbf16>, vector<2x128xf32> -> vector<2x128xf32>
      %cst_32 = arith.constant 0.0883883461 : f32
      %38 = vector.broadcast %cst_32 : f32 to vector<2x128xf32>
      %39 = arith.mulf %37, %38 : vector<2x128xf32>
      %40 = arith.truncf %39 : vector<2x128xf32> to vector<2x128xbf16>
      %41 = arith.truncf %30 : vector<32x128xf32> to vector<32x128xbf16>
      %42 = arith.truncf %32 : vector<32x128xf32> to vector<32x128xbf16>
      %c0_33 = arith.constant 0 : index
      %c0_34 = arith.constant 0 : index
      %c0_35 = arith.constant 0 : index
      %43 = vector.load %arg3[%c0_33, %c0_34, %c0_35] : memref<1x2x16xf32, #tpu.memory_space<vmem>>, vector<1x2x16xf32>
      %44 = vector.shape_cast %43 : vector<1x2x16xf32> to vector<2x16xf32>
      %45 = vector.extract_strided_slice %40 {offsets = [0, 0], sizes = [1, 128], strides = [1, 1]} : vector<2x128xbf16> to vector<1x128xbf16>
      %46 = vector.extract_strided_slice %41 {offsets = [0, 0], sizes = [16, 128], strides = [1, 1]} : vector<32x128xbf16> to vector<16x128xbf16>
      %47 = vector.extract_strided_slice %42 {offsets = [0, 0], sizes = [16, 128], strides = [1, 1]} : vector<32x128xbf16> to vector<16x128xbf16>
      %48 = vector.extract_strided_slice %44 {offsets = [0, 0], sizes = [1, 16], strides = [1, 1]} : vector<2x16xf32> to vector<1x16xf32>
      %cst_36 = arith.constant dense<0.000000e+00> : vector<1x16xf32>
      %49 = tpu.matmul %45, %46, %cst_36 {dimension_numbers = #tpu.dot_dimension_numbers<[1], [1], [0], [0], [0, 0, 1, 0], [], []>} : vector<1x128xbf16>, vector<16x128xbf16>, vector<1x16xf32> -> vector<1x16xf32>
      %cst_37 = arith.constant 5.000000e-01 : f32
      %50 = vector.broadcast %cst_37 : f32 to vector<1x16xf32>
      %51 = arith.cmpf ogt, %48, %50 : vector<1x16xf32>
      %cst_38 = arith.constant -1.000000e+09 : f32
      %52 = vector.broadcast %cst_38 : f32 to vector<1x16xf32>
      %53 = arith.select %51, %49, %52 : vector<1x16xi1>, vector<1x16xf32>
      %cst_39 = arith.constant dense<0xFF800000> : vector<1xf32>
      %54 = vector.multi_reduction <maximumf>, %53, %cst_39 [1] : vector<1x16xf32> to vector<1xf32>
      %55 = vector.shape_cast %54 : vector<1xf32> to vector<1x1xf32>
      %56 = vector.broadcast %55 : vector<1x1xf32> to vector<1x16xf32>
      %57 = arith.subf %53, %56 : vector<1x16xf32>
      %58 = math.exp %57 : vector<1x16xf32>
      %cst_40 = arith.constant dense<0.000000e+00> : vector<1xf32>
      %59 = vector.multi_reduction <add>, %58, %cst_40 [1] : vector<1x16xf32> to vector<1xf32>
      %60 = vector.shape_cast %59 : vector<1xf32> to vector<1x1xf32>
      %61 = tpu.reciprocal %60 {approx = true} : vector<1x1xf32> -> vector<1x1xf32>
      %62 = vector.broadcast %61 : vector<1x1xf32> to vector<1x16xf32>
      %63 = arith.mulf %58, %62 : vector<1x16xf32>
      %64 = arith.truncf %63 : vector<1x16xf32> to vector<1x16xbf16>
      %cst_41 = arith.constant dense<0.000000e+00> : vector<1x128xf32>
      %65 = tpu.matmul %64, %47, %cst_41 {dimension_numbers = #tpu.dot_dimension_numbers<[1], [0], [0], [1], [0, 0, 1, 1], [], []>} : vector<1x16xbf16>, vector<16x128xbf16>, vector<1x128xf32> -> vector<1x128xf32>
      %66 = vector.extract_strided_slice %40 {offsets = [1, 0], sizes = [1, 128], strides = [1, 1]} : vector<2x128xbf16> to vector<1x128xbf16>
      %67 = vector.extract_strided_slice %41 {offsets = [16, 0], sizes = [16, 128], strides = [1, 1]} : vector<32x128xbf16> to vector<16x128xbf16>
      %68 = vector.extract_strided_slice %42 {offsets = [16, 0], sizes = [16, 128], strides = [1, 1]} : vector<32x128xbf16> to vector<16x128xbf16>
      %69 = vector.extract_strided_slice %44 {offsets = [1, 0], sizes = [1, 16], strides = [1, 1]} : vector<2x16xf32> to vector<1x16xf32>
      %cst_42 = arith.constant dense<0.000000e+00> : vector<1x16xf32>
      %70 = tpu.matmul %66, %67, %cst_42 {dimension_numbers = #tpu.dot_dimension_numbers<[1], [1], [0], [0], [0, 0, 1, 0], [], []>} : vector<1x128xbf16>, vector<16x128xbf16>, vector<1x16xf32> -> vector<1x16xf32>
      %cst_43 = arith.constant 5.000000e-01 : f32
      %71 = vector.broadcast %cst_43 : f32 to vector<1x16xf32>
      %72 = arith.cmpf ogt, %69, %71 : vector<1x16xf32>
      %cst_44 = arith.constant -1.000000e+09 : f32
      %73 = vector.broadcast %cst_44 : f32 to vector<1x16xf32>
      %74 = arith.select %72, %70, %73 : vector<1x16xi1>, vector<1x16xf32>
      %cst_45 = arith.constant dense<0xFF800000> : vector<1xf32>
      %75 = vector.multi_reduction <maximumf>, %74, %cst_45 [1] : vector<1x16xf32> to vector<1xf32>
      %76 = vector.shape_cast %75 : vector<1xf32> to vector<1x1xf32>
      %77 = vector.broadcast %76 : vector<1x1xf32> to vector<1x16xf32>
      %78 = arith.subf %74, %77 : vector<1x16xf32>
      %79 = math.exp %78 : vector<1x16xf32>
      %cst_46 = arith.constant dense<0.000000e+00> : vector<1xf32>
      %80 = vector.multi_reduction <add>, %79, %cst_46 [1] : vector<1x16xf32> to vector<1xf32>
      %81 = vector.shape_cast %80 : vector<1xf32> to vector<1x1xf32>
      %82 = tpu.reciprocal %81 {approx = true} : vector<1x1xf32> -> vector<1x1xf32>
      %83 = vector.broadcast %82 : vector<1x1xf32> to vector<1x16xf32>
      %84 = arith.mulf %79, %83 : vector<1x16xf32>
      %85 = arith.truncf %84 : vector<1x16xf32> to vector<1x16xbf16>
      %cst_47 = arith.constant dense<0.000000e+00> : vector<1x128xf32>
      %86 = tpu.matmul %85, %68, %cst_47 {dimension_numbers = #tpu.dot_dimension_numbers<[1], [0], [0], [1], [0, 0, 1, 1], [], []>} : vector<1x16xbf16>, vector<16x128xbf16>, vector<1x128xf32> -> vector<1x128xf32>
      %87 = arith.truncf %65 : vector<1x128xf32> to vector<1x128xbf16>
      %c0_48 = arith.constant 0 : index
      %c0_49 = arith.constant 0 : index
      %88 = vector.load %arg7[%c0_48, %c0_49] : memref<128x128xbf16, #tpu.memory_space<vmem>>, vector<128x128xbf16>
      %cst_50 = arith.constant dense<0.000000e+00> : vector<1x128xf32>
      %89 = tpu.matmul %87, %88, %cst_50 {dimension_numbers = #tpu.dot_dimension_numbers<[1], [0], [0], [1], [0, 0, 1, 1], [], []>} : vector<1x128xbf16>, vector<128x128xbf16>, vector<1x128xf32> -> vector<1x128xf32>
      %90 = vector.extract_strided_slice %35 {offsets = [0, 0], sizes = [1, 128], strides = [1, 1]} : vector<2x128xbf16> to vector<1x128xbf16>
      %91 = arith.extf %90 : vector<1x128xbf16> to vector<1x128xf32>
      %92 = arith.addf %89, %91 : vector<1x128xf32>
      %c0_51 = arith.constant 0 : index
      %c0_52 = arith.constant 0 : index
      %c0_53 = arith.constant 0 : index
      %93 = vector.load %arg15[%c0_51, %c0_52, %c0_53] : memref<2x1x128xf32, #tpu.memory_space<vmem>>, vector<1x1x128xf32>
      %94 = vector.shape_cast %93 : vector<1x1x128xf32> to vector<1x128xf32>
      %95 = vector.shape_cast %92 : vector<1x128xf32> to vector<1x1x128xf32>
      tpu.vector_store %arg15[%c0_51, %c0_52, %c0_53], %95 {strides = array<i32>} : memref<2x1x128xf32, #tpu.memory_space<vmem>>, vector<1x1x128xf32>,
      %96 = arith.truncf %86 : vector<1x128xf32> to vector<1x128xbf16>
      %c0_54 = arith.constant 0 : index
      %c0_55 = arith.constant 0 : index
      %97 = vector.load %arg7[%c0_54, %c0_55] : memref<128x128xbf16, #tpu.memory_space<vmem>>, vector<128x128xbf16>
      %cst_56 = arith.constant dense<0.000000e+00> : vector<1x128xf32>
      %98 = tpu.matmul %96, %97, %cst_56 {dimension_numbers = #tpu.dot_dimension_numbers<[1], [0], [0], [1], [0, 0, 1, 1], [], []>} : vector<1x128xbf16>, vector<128x128xbf16>, vector<1x128xf32> -> vector<1x128xf32>
      %99 = vector.extract_strided_slice %35 {offsets = [1, 0], sizes = [1, 128], strides = [1, 1]} : vector<2x128xbf16> to vector<1x128xbf16>
      %100 = arith.extf %99 : vector<1x128xbf16> to vector<1x128xf32>
      %101 = arith.addf %98, %100 : vector<1x128xf32>
      %c1 = arith.constant 1 : index
      %c0_57 = arith.constant 0 : index
      %c0_58 = arith.constant 0 : index
      %102 = vector.load %arg15[%c1, %c0_57, %c0_58] : memref<2x1x128xf32, #tpu.memory_space<vmem>>, vector<1x1x128xf32>
      %103 = vector.shape_cast %102 : vector<1x1x128xf32> to vector<1x128xf32>
      %104 = vector.shape_cast %101 : vector<1x128xf32> to vector<1x1x128xf32>
      tpu.vector_store %arg15[%c1, %c0_57, %c0_58], %104 {strides = array<i32>} : memref<2x1x128xf32, #tpu.memory_space<vmem>>, vector<1x1x128xf32>,
      %c0_59 = arith.constant 0 : index
      %c0_60 = arith.constant 0 : index
      %c0_61 = arith.constant 0 : index
      %105 = vector.load %arg8[%c0_59, %c0_60, %c0_61] : memref<1x1206x128xf32, #tpu.memory_space<vmem>>, vector<1x1206x128xf32>
      %106 = vector.shape_cast %105 : vector<1x1206x128xf32> to vector<1206x128xf32>
      %107 = arith.truncf %106 : vector<1206x128xf32> to vector<1206x128xbf16>
      %c0_62 = arith.constant 0 : index
      %c0_63 = arith.constant 0 : index
      %108 = vector.load %arg10[%c0_62, %c0_63] : memref<128x128xbf16, #tpu.memory_space<vmem>>, vector<128x128xbf16>
      %cst_64 = arith.constant dense<0.000000e+00> : vector<1206x128xf32>
      %109 = tpu.matmul %107, %108, %cst_64 {dimension_numbers = #tpu.dot_dimension_numbers<[1], [0], [0], [1], [0, 0, 1, 1], [], []>} : vector<1206x128xbf16>, vector<128x128xbf16>, vector<1206x128xf32> -> vector<1206x128xf32>
      %110 = arith.truncf %109 : vector<1206x128xf32> to vector<1206x128xbf16>
      %c0_65 = arith.constant 0 : index
      %c0_66 = arith.constant 0 : index
      %111 = vector.load %arg14[%c0_65, %c0_66] : memref<1206x128xbf16, #tpu.memory_space<vmem>>, vector<1206x128xbf16>
      tpu.vector_store %arg14[%c0_65, %c0_66], %110 {strides = array<i32>} : memref<1206x128xbf16, #tpu.memory_space<vmem>>, vector<1206x128xbf16>,
    } else {
    }
    %c0 = arith.constant 0 : index
    %c0_1 = arith.constant 0 : index
    %c0_2 = arith.constant 0 : index
    %3 = vector.load %arg9[%c0, %c0_1, %c0_2] : memref<1x512x1206xi8, #tpu.memory_space<vmem>>, vector<1x512x1206xi8>
    %4 = vector.shape_cast %3 : vector<1x512x1206xi8> to vector<512x1206xi8>
    %5 = arith.sitofp %4 : vector<512x1206xi8> to vector<512x1206xbf16>
    %c0_3 = arith.constant 0 : index
    %c0_4 = arith.constant 0 : index
    %6 = vector.load %arg14[%c0_3, %c0_4] : memref<1206x128xbf16, #tpu.memory_space<vmem>>, vector<1206x128xbf16>
    %cst = arith.constant dense<0.000000e+00> : vector<512x128xf32>
    %7 = tpu.matmul %5, %6, %cst {dimension_numbers = #tpu.dot_dimension_numbers<[1], [0], [0], [1], [0, 0, 1, 1], [], []>} : vector<512x1206xbf16>, vector<1206x128xbf16>, vector<512x128xf32> -> vector<512x128xf32>
    %c0_5 = arith.constant 0 : index
    %c0_6 = arith.constant 0 : index
    %8 = vector.load %arg11[%c0_5, %c0_6] : memref<1x128xf32, #tpu.memory_space<vmem>>, vector<1x128xf32>
    %9 = vector.broadcast %8 : vector<1x128xf32> to vector<512x128xf32>
    %10 = arith.addf %7, %9 : vector<512x128xf32>
    %11 = math.tanh %10 : vector<512x128xf32>
    %c0_7 = arith.constant 0 : index
    %c0_8 = arith.constant 0 : index
    %12 = vector.load %arg16[%c0_7, %c0_8] : memref<1x128xf32, #tpu.memory_space<vmem>>, vector<1x128xf32>
    %13 = vector.extract_strided_slice %11 {offsets = [0, 0], sizes = [511, 128], strides = [1, 1]} : vector<512x128xf32> to vector<511x128xf32>
    %14 = tpu.concatenate %12, %13 in 0 : vector<1x128xf32>, vector<511x128xf32> -> vector<512x128xf32>
    %c0_9 = arith.constant 0 : index
    %c0_10 = arith.constant 0 : index
    %c0_11 = arith.constant 0 : index
    %15 = vector.load %arg12[%c0_9, %c0_10, %c0_11] : memref<1x512x128xf32, #tpu.memory_space<vmem>>, vector<1x512x128xf32>
    %16 = vector.shape_cast %15 : vector<1x512x128xf32> to vector<512x128xf32>
    %17 = vector.shape_cast %14 : vector<512x128xf32> to vector<1x512x128xf32>
    tpu.vector_store %arg12[%c0_9, %c0_10, %c0_11], %17 {strides = array<i32>} : memref<1x512x128xf32, #tpu.memory_space<vmem>>, vector<1x512x128xf32>,
    %c0_12 = arith.constant 0 : index
    %c0_13 = arith.constant 0 : index
    %c0_14 = arith.constant 0 : index
    %18 = vector.load %arg13[%c0_12, %c0_13, %c0_14] : memref<1x512x128xf32, #tpu.memory_space<vmem>>, vector<1x512x128xf32>
    %19 = vector.shape_cast %18 : vector<1x512x128xf32> to vector<512x128xf32>
    %20 = vector.shape_cast %14 : vector<512x128xf32> to vector<1x512x128xf32>
    tpu.vector_store %arg13[%c0_12, %c0_13, %c0_14], %20 {strides = array<i32>} : memref<1x512x128xf32, #tpu.memory_space<vmem>>, vector<1x512x128xf32>,
    %c0_i32_15 = arith.constant 0 : i32
    %21 = arith.cmpi eq, %arg1, %c0_i32_15 : i32
    %22 = arith.extui %21 : i1 to i32
    %c0_i32_16 = arith.constant 0 : i32
    %23 = arith.cmpi ne, %22, %c0_i32_16 : i32
    scf.if %23 {
      %c0_19 = arith.constant 0 : index
      %c0_20 = arith.constant 0 : index
      %c0_21 = arith.constant 0 : index
      %26 = vector.load %arg15[%c0_19, %c0_20, %c0_21] : memref<2x1x128xf32, #tpu.memory_space<vmem>>, vector<1x1x128xf32>
      %27 = vector.shape_cast %26 : vector<1x1x128xf32> to vector<1x128xf32>
      %c0_22 = arith.constant 0 : index
      %c0_23 = arith.constant 0 : index
      %c0_24 = arith.constant 0 : index
      %28 = vector.load %arg12[%c0_22, %c0_23, %c0_24] : memref<1x512x128xf32, #tpu.memory_space<vmem>>, vector<1x1x128xf32>
      %29 = vector.shape_cast %28 : vector<1x1x128xf32> to vector<1x128xf32>
      %30 = vector.shape_cast %27 : vector<1x128xf32> to vector<1x1x128xf32>
      tpu.vector_store %arg12[%c0_22, %c0_23, %c0_24], %30 {strides = array<i32>} : memref<1x512x128xf32, #tpu.memory_space<vmem>>, vector<1x1x128xf32>,
      %c1 = arith.constant 1 : index
      %c0_25 = arith.constant 0 : index
      %c0_26 = arith.constant 0 : index
      %31 = vector.load %arg15[%c1, %c0_25, %c0_26] : memref<2x1x128xf32, #tpu.memory_space<vmem>>, vector<1x1x128xf32>
      %32 = vector.shape_cast %31 : vector<1x1x128xf32> to vector<1x128xf32>
      %c0_27 = arith.constant 0 : index
      %c0_28 = arith.constant 0 : index
      %c0_29 = arith.constant 0 : index
      %33 = vector.load %arg13[%c0_27, %c0_28, %c0_29] : memref<1x512x128xf32, #tpu.memory_space<vmem>>, vector<1x1x128xf32>
      %34 = vector.shape_cast %33 : vector<1x1x128xf32> to vector<1x128xf32>
      %35 = vector.shape_cast %32 : vector<1x128xf32> to vector<1x1x128xf32>
      tpu.vector_store %arg13[%c0_27, %c0_28, %c0_29], %35 {strides = array<i32>} : memref<1x512x128xf32, #tpu.memory_space<vmem>>, vector<1x1x128xf32>,
    } else {
    }
    %24 = vector.extract_strided_slice %11 {offsets = [511, 0], sizes = [1, 128], strides = [1, 1]} : vector<512x128xf32> to vector<1x128xf32>
    %c0_17 = arith.constant 0 : index
    %c0_18 = arith.constant 0 : index
    %25 = vector.load %arg16[%c0_17, %c0_18] : memref<1x128xf32, #tpu.memory_space<vmem>>, vector<1x128xf32>
    tpu.vector_store %arg16[%c0_17, %c0_18], %24 {strides = array<i32>} : memref<1x128xf32, #tpu.memory_space<vmem>>, vector<1x128xf32>,
    return
  }
  func.func @transform_0(%arg0: i32, %arg1: i32) -> (i32, i32, i32, i32) {
    %c0_i32 = arith.constant 0 : i32
    %c0_i32_0 = arith.constant 0 : i32
    %c0_i32_1 = arith.constant 0 : i32
    %c0_i32_2 = arith.constant 0 : i32
    return %arg0, %c0_i32, %c0_i32_0, %c0_i32_1 : i32, i32, i32, i32
  }
  func.func @transform_1(%arg0: i32, %arg1: i32) -> (i32, i32, i32) {
    %c0_i32 = arith.constant 0 : i32
    %c0_i32_0 = arith.constant 0 : i32
    %c0_i32_1 = arith.constant 0 : i32
    return %arg0, %c0_i32, %c0_i32_0 : i32, i32, i32
  }
  func.func @transform_2(%arg0: i32, %arg1: i32) -> (i32, i32) {
    %c0_i32 = arith.constant 0 : i32
    %c0_i32_0 = arith.constant 0 : i32
    %c0_i32_1 = arith.constant 0 : i32
    return %c0_i32, %c0_i32_0 : i32, i32
  }
  func.func @transform_3(%arg0: i32, %arg1: i32) -> (i32, i32) {
    %c0_i32 = arith.constant 0 : i32
    %c0_i32_0 = arith.constant 0 : i32
    %c0_i32_1 = arith.constant 0 : i32
    return %c0_i32, %c0_i32_0 : i32, i32
  }
  func.func @transform_4(%arg0: i32, %arg1: i32) -> (i32, i32) {
    %c0_i32 = arith.constant 0 : i32
    %c0_i32_0 = arith.constant 0 : i32
    %c0_i32_1 = arith.constant 0 : i32
    return %c0_i32, %c0_i32_0 : i32, i32
  }
  func.func @transform_5(%arg0: i32, %arg1: i32) -> (i32, i32) {
    %c0_i32 = arith.constant 0 : i32
    %c0_i32_0 = arith.constant 0 : i32
    %c0_i32_1 = arith.constant 0 : i32
    return %c0_i32, %c0_i32_0 : i32, i32
  }
  func.func @transform_6(%arg0: i32, %arg1: i32) -> (i32, i32, i32) {
    %c0_i32 = arith.constant 0 : i32
    %c0_i32_0 = arith.constant 0 : i32
    %c0_i32_1 = arith.constant 0 : i32
    return %arg0, %c0_i32, %c0_i32_0 : i32, i32, i32
  }
  func.func @transform_7(%arg0: i32, %arg1: i32) -> (i32, i32, i32) {
    %c0_i32 = arith.constant 0 : i32
    %c0_i32_0 = arith.constant 0 : i32
    return %arg0, %arg1, %c0_i32 : i32, i32, i32
  }
  func.func @transform_8(%arg0: i32, %arg1: i32) -> (i32, i32) {
    %c0_i32 = arith.constant 0 : i32
    %c0_i32_0 = arith.constant 0 : i32
    %c0_i32_1 = arith.constant 0 : i32
    return %c0_i32, %c0_i32_0 : i32, i32
  }
  func.func @transform_9(%arg0: i32, %arg1: i32) -> (i32, i32) {
    %c0_i32 = arith.constant 0 : i32
    %c0_i32_0 = arith.constant 0 : i32
    %c0_i32_1 = arith.constant 0 : i32
    return %c0_i32, %c0_i32_0 : i32, i32
  }
  func.func @transform_10(%arg0: i32, %arg1: i32) -> (i32, i32, i32) {
    %c0_i32 = arith.constant 0 : i32
    %c0_i32_0 = arith.constant 0 : i32
    return %arg0, %arg1, %c0_i32 : i32, i32, i32
  }
  func.func @transform_11(%arg0: i32, %arg1: i32) -> (i32, i32, i32) {
    %c0_i32 = arith.constant 0 : i32
    %c0_i32_0 = arith.constant 0 : i32
    return %arg0, %arg1, %c0_i32 : i32, i32, i32
  }
}

</mosaic_0001>

<bundles_post_ra>
// kernel: hypercode_forward.1
= control target key start
LH: loop header
LB: loop body
LE: loop exit
PB: predicated region body
PF: predicated region fallthrough
CT: control target
= control target key end

     0   :  { %s13784_s0 = inlined_call_operand.vmem [shape: bf16[2,2,16,128], index: 0, kind: input, shape index: {}]   ;;  %s13785_s1 = inlined_call_operand.vmem [shape: f32[2,2,16], index: 1, kind: input, shape index: {}]   ;;  %s13786_s2 = inlined_call_operand.vmem [shape: bf16[128,128], index: 2, kind: input, shape index: {}]   ;;  %s13787_s3 = inlined_call_operand.vmem [shape: bf16[128,128], index: 3, kind: input, shape index: {}]   ;;  %s13788_s4 = inlined_call_operand.vmem [shape: bf16[128,128], index: 4, kind: input, shape index: {}]   ;;  %s13789_s5 = inlined_call_operand.vmem [shape: bf16[128,128], index: 5, kind: input, shape index: {}]   ;;  %s13790_s6 = inlined_call_operand.vmem [shape: f32[2,1206,128], index: 6, kind: input, shape index: {}]   ;;  %s13791_s7 = inlined_call_operand.vmem [shape: s8[2,1206,1206], index: 7, kind: input, shape index: {}]   ;;  %s13792_s8 = inlined_call_operand.vmem [shape: bf16[128,128], index: 8, kind: input, shape index: {}]   ;;  %s13793_s9 = inlined_call_operand.vmem [shape: f32[1,128], index: 9, kind: input, shape index: {}]   ;;  %s13794_s10 = inlined_call_operand.vmem [shape: f32[2,1207,128], index: 10, kind: output, shape index: {0}]   ;;  %s13795_s11 = inlined_call_operand.vmem [shape: f32[2,1207,128], index: 11, kind: output, shape index: {1}]  }
   0x1   :  { %13830 = sst [smem:[#allocation37_spill]] %s13793_s9 }
   0x2   :  { %13831 = sst [smem:[#allocation38_spill]] %s13794_s10 }
   0x3   :  { %13832 = sst [smem:[#allocation39_spill]] %s13795_s11 }
   0x4   :  { %s11682_s17 = smov 0   ;;  %s11684_s18 = smov 0  }
   0x5   :  { %s11686_s19 = smov 0   ;;  %s11688_s20 = smov 0  }
   0x6   :  { %s11690_s21 = smov 0   ;;  %s11692_s22 = smov 0  }
   0x7   :  { %s11694_s23 = smov 0  }
   0x8 LB: > { %13833 = sst [smem:[#allocation7_spill]] %s11533_s18  ;;  %s31_s24 = sadd.s32 1, %s11545_s21  ;;  %s11553_s23 = sphi %s11694_s23, %s22_s23   ;;  %s11549_s22 = sphi %s11692_s22, %s13911_s22   ;;  %s11545_s21 = sphi %s11690_s21, %s13910_s21   ;;  %s11541_s20 = sphi %s11688_s20, %s13909_s20   ;;  %s11537_s19 = sphi %s11686_s19, %s13908_s19   ;;  %s11533_s18 = sphi %s11684_s18, %s13907_s18   ;;  %s11529_s17 = sphi %s11682_s17, %s13906_s17  }
   0x9   : > { %13834 = sst [smem:[#allocation8_spill]] %s11541_s20  ;;  %p32_p0 = scmp.ge.s32.totalorder %s31_s24, 3 }
   0xa   : > { %13835 = sst [smem:[#allocation9_spill]] %s11545_s21  ;;  %s34_s25 = sadd.s32 1, %s11549_s22 }
   0xb   : > { %13836 = sst [smem:[#allocation10_spill]] %s11549_s22  ;;  %s8665_s26 = sadd.s32 4294967295, %s11553_s23  }
   0xc   : > { %13837 = sst [smem:[#allocation11_spill]] %s11553_s23  ;;  %p285_p1 = scmp.ne.s32.totalorder %s11533_s18, %s11529_s17 }
   0xd   : > { %s13913_s24 = smov (%p32_p0, %s31_s24), 0  ;;  %s13915_s25 = smov (!%p32_p0, %s34_s25), %s11549_s22 }
   0xe   : > { %13838 = sst [smem:[#allocation12_spill]] %s13913_s24  ;;  %s271_s27 = ssub.s32 %s11545_s21, %s13913_s24 }
   0xf   : > { %p286_p2 = scmp.eq.s32.totalorder %s8665_s26, 5  ;;  %p36_p3 = scmp.ge.s32.totalorder %s13915_s25, 2 }
  0x10   : > { %p8669_p4 = scmp.ge.s32.totalorder %s11553_s23, 1  ;;  %p403_p6 = scmp.lt.s32.totalorder %s11553_s23, 7 }
  0x11   : > { %p11728_p5 = por %p286_p2, %p285_p1  ;;  %s13917_s25 = smov (%p36_p3, %s13915_s25), 0 }
  0x12   : > { %13841 = sst [smem:[#allocation14_spill]] %s13917_s25  ;;  %p404_p7 = pnand %p8669_p4, %p403_p6 }
  0x13   : > { %s13839_s28 = scalar_select %p11728_p5, 1, 0 }
  0x14   : > { %s270_s29 = ssub.s32 %s11549_s22, %s13917_s25  ;;  %s275_s12 = sadd.s32 1, %s11533_s18 }
  0x15   : > { %13840 = sst [smem:[#allocation13_spill]] %s13839_s28  ;;  %s272_s30 = sor.u32 %s271_s27, %s270_s29 }
  0x16   : > { %p273_p8 = scmp.eq.s32.totalorder %s272_s30, 0  ;;  %407 = sbr.rel (%p404_p7) target bundleno = 3086 (0xc0e), region = 60 }
  0x18   : > { %s11739_s13 = scalar_select %p273_p8, %s11533_s18, %s275_s12  }
  0x1a   : > { %13842 = sst [smem:[#allocation15_spill]] %s11739_s13 }
  0x1d   : > { %s461_s14 = sand.u32 1, %s11529_s17   ;;  %p470_p9 = scmp.lt.s32.totalorder %s11541_s20, 1 }
  0x1e   : > { %s8670_s15 = sshll.u32 %s461_s14, 9  ;;  %s11744_s16 = sshll.u32 %s11537_s19, 6 }
  0x1f   : > { %s471_s26 = scalar_select %p470_p9, %s11541_s20, 1 }
  0x20   : > { %p492_p10 = scmp.lt.s32.totalorder %s11744_s16, 150  ;;  %s11769_s30 = scalar_lea.vmem [#allocation5], %s8670_s15  }
  0x21   : > { %s9345_s25 = sshll.u32 %s471_s26, 4  ;;  %s8674_s27 = sshll.u32 %s471_s26, 1 }
  0x22   : > { %s11751_s12 = scalar_lea.vmem %s13784_s0, %s9345_s25  ;;  %s11756_s21 = scalar_lea.vmem %s13785_s1, %s8674_s27 }
  0x23   : > { %s10941_s17 = smul.u32 1208, %s471_s26  ;;  %s11771_s22 = scalar_lea.vmem [#allocation6], %s8670_s15  }
  0x24   : > { %s493_s14 = scalar_select %p492_p10, %s11744_s16, 150 }
  0x25   : > { %s11762_s23 = scalar_lea.vmem %s13790_s6, %s10941_s17  ;;  %s10943_s11 = smul.u32 1510, %s471_s26 }
  0x26   : > { %s10942_s10 = smul.u32 10, %s493_s14  ;;  %p8678_p11 = scmp.ne.s32.totalorder %s11537_s19, 0 }
  0x27   : > { %v11133_v0 = vld [vmem:[%s13787_s3] sm:$0xff] (!%p8678_p11)   ;;  %v11134_v1 = vld [vmem:[%s13787_s3 + $0x8] sm:$0xff] (!%p8678_p11)   ;;  %v11135_v2 = vld [vmem:[%s13787_s3 + $0x10] sm:$0xff] (!%p8678_p11)   ;;  %v11619_v21 = vmov (!%p8678_p11), 0.0   ;;  %vm11620_vm0 = vmmov (!%p8678_p11), 0   ;;  %vm767_vm1 = vcmask (!%p8678_p11), 1040384  }
  0x28   : > { %s496_s20 = sadd.s32 %s10943_s11, %s10942_s10  ;;  %519 = sbr.rel (%p8678_p11) target bundleno = 1998 (0x7ce), region = 64  ;;  %10089 = vmatprep.subr.bf16.mxu0 (!%p8678_p11), %v11133_v0  ;;  %v11136_v3 = vld [vmem:[%s13787_s3 + $0x18] sm:$0xff] (!%p8678_p11)   ;;  %v11789_v4 = vld [vmem:[%s11751_s12] sm:$0xf] (!%p8678_p11)  ;;  %v521_v5 = vld [vmem:[%s11751_s12 + $0x4] sm:$0xf] (!%p8678_p11) }
  0x29   : > { %s8677_s28 = sshll.u32 %s496_s20, 1  ;;  %10090 = vmatpush3.bf16.msra.mxu0 (!%p8678_p11), %v11133_v0  ;;  %v8679_v6 = vcombine.low (!%p8678_p11), %v11789_v4, %v521_v5  ;;  %v11137_v7 = vld [vmem:[%s13787_s3 + $0x20] sm:$0xff] (!%p8678_p11)   ;;  %v11138_v8 = vld [vmem:[%s13787_s3 + $0x28] sm:$0xff] (!%p8678_p11)   ;;  %v11139_v11 = vld [vmem:[%s13787_s3 + $0x30] sm:$0xff] (!%p8678_p11)   ;;  %vm768_vm2 = vsmask.f32 (!%p8678_p11), 256 }
  0x2a   : > { %s11767_s25 = scalar_lea.vmem %s13791_s7, %s8677_s28  ;;  %10091 = vmatprep.subr.bf16.mxu0 (!%p8678_p11), %v11134_v1  ;;  %v11152_v9 = vld [vmem:[%s13788_s4] sm:$0xff] (!%p8678_p11)   ;;  %v11153_v10 = vld [vmem:[%s13788_s4 + $0x8] sm:$0xff] (!%p8678_p11)   ;;  %v11154_v12 = vld [vmem:[%s13788_s4 + $0x10] sm:$0xff] (!%p8678_p11)   ;;  %vm924_vm5 = vcmask (!%p8678_p11), 122880   ;;  %vm937_vm6 = vcmask (!%p8678_p11), 130048   ;;  %vm1029_vm7 = vcmask (!%p8678_p11), 123905  }
  0x2b   : > { %10105 = vmatprep.mubr.bf16.mxu0 (!%p8678_p11), %v8679_v6  ;;  %10125 = vmatprep.mubr.bf16.mxu1 (!%p8678_p11), %v8679_v6  ;;  %v11140_v13 = vld [vmem:[%s13787_s3 + $0x38] sm:$0xff] (!%p8678_p11)   ;;  %v522_v14 = vld [vmem:[%s11751_s12 + $0x8] sm:$0xf] (!%p8678_p11)  ;;  %v523_v15 = vld [vmem:[%s11751_s12 + $0xc] sm:$0xf] (!%p8678_p11) }
  0x2c   : > { %10109 = vmatprep.subr.bf16.mxu1 (!%p8678_p11), %v11152_v9  ;;  %v11155_v16 = vld [vmem:[%s13788_s4 + $0x18] sm:$0xff] (!%p8678_p11)   ;;  %v11156_v17 = vld [vmem:[%s13788_s4 + $0x20] sm:$0xff] (!%p8678_p11)   ;;  %v8680_v19 = vcombine.low (!%p8678_p11), %v522_v14, %v523_v15  ;;  %v11157_v20 = vld [vmem:[%s13788_s4 + $0x28] sm:$0xff] (!%p8678_p11)   ;;  %v8697_v29 = vcombine.low (!%p8678_p11), %v522_v14, %v522_v14 }
  0x2d   : > { %10092 = vmatpush3.bf16.msra.mxu0 (!%p8678_p11), %v11134_v1  ;;  %10110 = vmatpush3.bf16.msra.mxu1 (!%p8678_p11), %v11152_v9  ;;  %v11144_v18 = vld [vmem:[%s13786_s2] sm:$0xff] (!%p8678_p11)   ;;  %v11145_v22 = vld [vmem:[%s13786_s2 + $0x8] sm:$0xff] (!%p8678_p11)   ;;  %v11158_v23 = vld [vmem:[%s13788_s4 + $0x30] sm:$0xff] (!%p8678_p11)  }
  0x2e   : > { %10093 = vmatprep.subr.bf16.mxu0 (!%p8678_p11), %v11135_v2  ;;  %10111 = vmatprep.subr.bf16.mxu1 (!%p8678_p11), %v11153_v10  ;;  %v11146_v24 = vld [vmem:[%s13786_s2 + $0x10] sm:$0xff] (!%p8678_p11)   ;;  %v11159_v25 = vld [vmem:[%s13788_s4 + $0x38] sm:$0xff] (!%p8678_p11)   ;;  %v11148_v27 = vld [vmem:[%s13786_s2 + $0x20] sm:$0xff] (!%p8678_p11)   ;;  %v764_v31 = vshll.u32 (!%p8678_p11), %v8697_v29, 16 }
  0x2f   : > { %v11147_v26 = vld [vmem:[%s13786_s2 + $0x18] sm:$0xff]   ;;  %v11149_v28 = vld [vmem:[%s13786_s2 + $0x28] sm:$0xff]   ;;  %v11150_v30 = vld [vmem:[%s13786_s2 + $0x30] sm:$0xff]  }
  0x30   : > { %v11151_v32 = vld [vmem:[%s13786_s2 + $0x38] sm:$0xff]   ;;  %vm769_vm3 = vmand %vm767_vm1, %vm768_vm2  ;;  %v11892_v52 = vld [vmem:[%s11756_s21] sm:$0x3] }
  0x31   : > { %10094 = vmatpush3.bf16.msra.mxu0 %v11135_v2  ;;  %10112 = vmatpush3.bf16.msra.mxu1 %v11153_v10  ;;  %v11869_v33 = vsel %vm769_vm3, %v11789_v4, %v764_v31  ;;  %vm922_vm4 = vcmp.gt.f32.partialorder %v11892_v52, 0.5  ;;  %v11160_v0 = vld [vmem:[%s13789_s5] sm:$0xff]   ;;  %v11161_v1 = vld [vmem:[%s13789_s5 + $0x8] sm:$0xff]   ;;  %v11162_v2 = vld [vmem:[%s13789_s5 + $0x10] sm:$0xff]  }
  0x32   : > { %10095 = vmatprep.subr.bf16.mxu0 %v11136_v3  ;;  %10113 = vmatprep.subr.bf16.mxu1 %v11154_v12  ;;  %v11164_v4 = vld [vmem:[%s13789_s5 + $0x20] sm:$0xff]   ;;  %v11165_v5 = vld [vmem:[%s13789_s5 + $0x28] sm:$0xff]   ;;  %v11166_v6 = vld [vmem:[%s13789_s5 + $0x30] sm:$0xff]   ;;  %v1105_v31 = vunpack.c.l.bf16 %v11869_v33 }
  0x33   : > { %v11988_v52 = vld [vmem:[%s13792_s8 + $0x8] sm:$0xff]  }
  0x35   : > { %10096 = vmatpush3.bf16.msra.mxu0 %v11136_v3  ;;  %10114 = vmatpush3.bf16.msra.mxu1 %v11154_v12  ;;  %v11163_v3 = vld [vmem:[%s13789_s5 + $0x18] sm:$0xff]  }
  0x36   : > { %10097 = vmatprep.subr.bf16.mxu0 %v11137_v7  ;;  %10115 = vmatprep.subr.bf16.mxu1 %v11155_v16  ;;  %v11167_v12 = vld [vmem:[%s13789_s5 + $0x38] sm:$0xff]  }
  0x39   : > { %10098 = vmatpush3.bf16.msra.mxu0 %v11137_v7  ;;  %10116 = vmatpush3.bf16.msra.mxu1 %v11155_v16 }
  0x3a   : > { %10099 = vmatprep.subr.bf16.mxu0 %v11138_v8  ;;  %10117 = vmatprep.subr.bf16.mxu1 %v11156_v17 }
  0x3d   : > { %10100 = vmatpush3.bf16.msra.mxu0 %v11138_v8  ;;  %10118 = vmatpush3.bf16.msra.mxu1 %v11156_v17 }
  0x3e   : > { %10101 = vmatprep.subr.bf16.mxu0 %v11139_v11  ;;  %10119 = vmatprep.subr.bf16.mxu1 %v11157_v20 }
  0x41   : > { %10102 = vmatpush3.bf16.msra.mxu0 %v11139_v11  ;;  %10120 = vmatpush3.bf16.msra.mxu1 %v11157_v20 }
  0x42   : > { %10103 = vmatprep.subr.bf16.mxu0 %v11140_v13  ;;  %10121 = vmatprep.subr.bf16.mxu1 %v11158_v23 }
  0x45   : > { %10104 = vmatpush3.bf16.msra.mxu0 %v11140_v13  ;;  %10122 = vmatpush3.bf16.msra.mxu1 %v11158_v23 }
  0x46   : > { %10129 = vmatprep.subr.bf16.mxu0 %v11619_v21  ;;  %10123 = vmatprep.subr.bf16.mxu1 %v11159_v25 }
  0x48   : > { %10106 = vmatmul.mubr.bf16.vlgmr.msra.gmra.mrb[0].mxu0 %v8680_v19 }
  0x49   : > { %10130 = vmatpush3.bf16.msra.mxu0 %v11144_v18  ;;  %10145 = vmatprep.mubr.msk.bf16.mxu0 %vm11620_vm0, %v11619_v21 }
  0x4a   : > { %10131 = vmatprep.subr.bf16.mxu0 %v11619_v21  ;;  %10124 = vmatpush3.bf16.msra.mxu1 %v11159_v25 }
  0x4b   : > { %10149 = vmatprep.subr.bf16.mxu1 %v11619_v21 }
  0x4d   : > { %10132 = vmatpush3.bf16.msra.mxu0 %v11145_v22  ;;  %10126 = vmatmul.mubr.bf16.vlgmr.msra.gmra.mrb[0].mxu1 %v8680_v19 }
  0x4e   : > { %10133 = vmatprep.subr.bf16.mxu0 %v11619_v21  ;;  %10151 = vmatprep.mubr.msk.bf16.mxu1 %vm11620_vm0, %v11619_v21 }
  0x51   : > { %10134 = vmatpush3.bf16.msra.mxu0 %v11146_v24 }
  0x52   : > { %10135 = vmatprep.subr.bf16.mxu0 %v11619_v21 }
  0x55   : > { %10136 = vmatpush3.bf16.msra.mxu0 %v11147_v26 }
  0x56   : > { %10137 = vmatprep.subr.bf16.mxu0 %v11619_v21 }
  0x59   : > { %10138 = vmatpush3.bf16.msra.mxu0 %v11148_v27 }
  0x5a   : > { %10139 = vmatprep.subr.bf16.mxu0 %v11619_v21 }
  0x5d   : > { %10140 = vmatpush3.bf16.msra.mxu0 %v11149_v28 }
  0x5e   : > { %10141 = vmatprep.subr.bf16.mxu0 %v11619_v21 }
  0x61   : > { %10142 = vmatpush3.bf16.msra.mxu0 %v11150_v30 }
  0x62   : > { %10143 = vmatprep.subr.bf16.mxu0 %v11619_v21 }
  0x65   : > { %10144 = vmatpush3.bf16.msra.mxu0 %v11151_v32 }
  0x66   : > { %10173 = vmatprep.subr.bf16.mxu0 %v11619_v21 }
  0x68   : > { %10146 = vmatmul.mubr.bf16.vlgmr.msra.gmra.mrb[4].mxu0 %v11869_v33 }
  0x69   : > { %10189 = vmatprep.mubr.msk.bf16.mxu0 %vm11620_vm0, %v11619_v21  ;;  %10174 = vmatpush3.bf16.msra.mxu0 %v11160_v0  ;;  %v1309_v0 = vld [vmem:[%s11762_s23 + $0x20] sm:$0xff] }
  0x6a   : > { %10175 = vmatprep.subr.bf16.mxu0 %v11619_v21 }
  0x6d   : > { %10176 = vmatpush3.bf16.msra.mxu0 %v11161_v1  ;;  %v1310_v1 = vld [vmem:[%s11762_s23 + $0x28] sm:$0xff] }
  0x6e   : > { %10177 = vmatprep.subr.bf16.mxu0 %v11619_v21 }
  0x71   : > { %10178 = vmatpush3.bf16.msra.mxu0 %v11162_v2  ;;  %v1311_v2 = vld [vmem:[%s11762_s23 + $0x30] sm:$0xff] }
  0x72   : > { %10179 = vmatprep.subr.bf16.mxu0 %v11619_v21 }
  0x75   : > { %10180 = vmatpush3.bf16.msra.mxu0 %v11163_v3  ;;  %v1458_v3 = vpack.c.bf16 %v1310_v1, %v1309_v0  ;;  %v1345_v0 = vld [vmem:[%s11762_s23 + $0x140] sm:$0xff]  ;;  %v1346_v1 = vld [vmem:[%s11762_s23 + $0x148] sm:$0xff] }
  0x76   : > { %10181 = vmatprep.subr.bf16.mxu0 %v11619_v21 }
  0x79   : > { %10182 = vmatpush3.bf16.msra.mxu0 %v11164_v4  ;;  %v1312_v4 = vld [vmem:[%s11762_s23 + $0x38] sm:$0xff] }
  0x7a   : > { %10183 = vmatprep.subr.bf16.mxu0 %v11619_v21 }
  0x7d   : > { %10184 = vmatpush3.bf16.msra.mxu0 %v11165_v5  ;;  %v1459_v5 = vpack.c.bf16 %v1312_v4, %v1311_v2  ;;  %v1347_v2 = vld [vmem:[%s11762_s23 + $0x150] sm:$0xff]  ;;  %v1348_v4 = vld [vmem:[%s11762_s23 + $0x158] sm:$0xff] }
  0x7e   : > { %10185 = vmatprep.subr.bf16.mxu0 %v11619_v21 }
  0x81   : > { %10186 = vmatpush3.bf16.msra.mxu0 %v11166_v6  ;;  %v1313_v6 = vld [vmem:[%s11762_s23 + $0x40] sm:$0xff] }
  0x82   : > { %10187 = vmatprep.subr.bf16.mxu0 %v11619_v21 }
  0x85   : > { %10188 = vmatpush3.bf16.msra.mxu0 %v11167_v12  ;;  %v1317_v12 = vld [vmem:[%s11762_s23 + $0x60] sm:$0xff] }
 0x11b   : > { %v11875_v34 = vpop.f32.mrb[0].mxu0 }
 0x11c   : > { %v634_v35 = vpop.f32.mrb[1].mxu0 }
 0x11d   : > { %v11877_v36 = vpop.f32.mrb[2].mxu0 }
 0x11e   : > { %v878_v37 = vpack.c.bf16 %v11877_v36, %v11875_v34  ;;  %v637_v38 = vpop.f32.mrb[3].mxu0 }
 0x11f   : > { %v877_v39 = vpack.c.bf16 %v637_v38, %v634_v35  ;;  %v11946_v38 = vld [vmem:[%s13792_s8] sm:$0xff]  }
 0x120   : > { %v11882_v40 = vpop.f32.mrb[0].mxu1  ;;  %10213 = vmatprep.subr.bf16.mxu0 %v11946_v38 }
 0x121   : > { %10150 = vmatpush3.bf16.xpose.msra.mxu1 %v877_v39  ;;  %v747_v41 = vpop.f32.mrb[1].mxu1 }
 0x122   : > { %10155 = vmatprep.subr.bf16.mxu1 %v11619_v21  ;;  %v11884_v42 = vpop.f32.mrb[2].mxu1 }
 0x123   : > { %v880_v43 = vpack.c.bf16 %v11884_v42, %v11882_v40  ;;  %v750_v44 = vpop.f32.mrb[3].mxu1 }
 0x124   : > { %v879_v45 = vpack.c.bf16 %v750_v44, %v747_v41 }
 0x13b   : > { %v869_v46 = vpop.f32.mrb[4].mxu0 }
 0x13c   : > { %v875_v47 = vmul.f32 0.088388346, %v869_v46  ;;  %v10147_v48 = vpop.f32.mrb[5].mxu0  ;;  %v11170_v46 = vld [vmem:[%s13789_s5 + $0x10] sm:$0xff]  }
 0x13d   : > { %v872_v49 = vpop.f32.mrb[6].mxu0  ;;  %v11172_v48 = vld [vmem:[%s13789_s5 + $0x20] sm:$0xff]  }
 0x13e   : > { %v876_v50 = vpack.c.bf16 %v875_v47, %v875_v47  ;;  %v10148_v51 = vpop.f32.mrb[7].mxu0  ;;  %v11171_v47 = vld [vmem:[%s13789_s5 + $0x18] sm:$0xff]   ;;  %v11173_v49 = vld [vmem:[%s13789_s5 + $0x28] sm:$0xff]  }
 0x13f   : > { %v11175_v51 = vld [vmem:[%s13789_s5 + $0x38] sm:$0xff]  }
 0x140   : > { %10152 = vmatmul.mubr.bf16.vlgmr.msra.gmra.mrb[4].mxu1 %v876_v50  ;;  %v982_v11 = vshrl.u32 %v876_v50, 16  ;;  %v11174_v50 = vld [vmem:[%s13789_s5 + $0x30] sm:$0xff]  }
 0x141   : > { %10156 = vmatpush3.bf16.msra.mxu1 %v879_v45  ;;  %10157 = vmatprep.mubr.msk.bf16.mxu1 %vm11620_vm0, %v11619_v21  ;;  %v11169_v45 = vld [vmem:[%s13789_s5 + $0x8] sm:$0xff]  }
 0x142   : > { %10161 = vmatprep.subr.bf16.mxu1 %v11619_v21 }
 0x213   : > { %v916_v53 = vpop.f32.mrb[4].mxu1 }
 0x214   : > { %v923_v54 = vsel %vm922_vm4, %v916_v53, -1e+09  ;;  %v10153_v55 = vpop.f32.mrb[5].mxu1  ;;  %v11995_v53 = vld [vmem:[%s13792_s8 + $0x10] sm:$0xff]  }
 0x215   : > { %v919_v56 = vpop.f32.mrb[6].mxu1  ;;  %v925_v57 = vsel %vm924_vm5, %v923_v54, -inf  ;;  %v12016_v55 = vld [vmem:[%s13792_s8 + $0x28] sm:$0xff]  }
 0x216   : > { %926 = vmax.xlane.f32.xlu0 %v925_v57  ;;  %v10154_v58 = vpop.f32.mrb[7].mxu1  ;;  %v12023_v56 = vld [vmem:[%s13792_s8 + $0x30] sm:$0xff]   ;;  %v12030_v57 = vld [vmem:[%s13792_s8 + $0x38] sm:$0xff]  }
 0x217   : > { %v1305_v58 = vld [vmem:[%s11762_s23] sm:$0xff] }
 0x2a3   : > { %v927_v59 = vpop.xlane.xlu0 %926 }
 0x2a4   : > { %v928_v60 = vsub.f32 %v923_v54, %v927_v59  ;;  %v12009_v54 = vld [vmem:[%s13792_s8 + $0x20] sm:$0xff]   ;;  %v1306_v59 = vld [vmem:[%s11762_s23 + $0x8] sm:$0xff] }
 0x2a6   : > { %v929_v61 = vmul.f32 1.442695, %v928_v60  ;;  %v1456_v60 = vpack.c.bf16 %v1306_v59, %v1305_v58  ;;  %v1341_v58 = vld [vmem:[%s11762_s23 + $0x120] sm:$0xff]  ;;  %v1342_v59 = vld [vmem:[%s11762_s23 + $0x128] sm:$0xff] }
 0x2a8   : > { %11184 = vpow2.f32 %v929_v61  ;;  %v1307_v61 = vld [vmem:[%s11762_s23 + $0x10] sm:$0xff] }
 0x2b2   : > { %v11185_v62 = vpop.eup %11184 }
 0x2b3   : > { %v931_v63 = vsel %vm924_vm5, %v11185_v62, 0.0 }
 0x2b4   : > { %932 = vadd.xlane.f32.xlu0 %v931_v63 }
 0x341   : > { %v933_v7 = vpop.xlane.xlu0 %932 }
 0x342   : > { %11186 = vrcp.f32 %v933_v7  ;;  %v1314_v7 = vld [vmem:[%s11762_s23 + $0x48] sm:$0xff] }
 0x34c   : > { %v11187_v8 = vpop.eup %11186 }
 0x34d   : > { %v935_v9 = vmul.f32 %v11187_v8, %v11185_v62  ;;  %v1308_v62 = vld [vmem:[%s11762_s23 + $0x18] sm:$0xff]  ;;  %v1315_v8 = vld [vmem:[%s11762_s23 + $0x50] sm:$0xff] }
 0x34e   : > { %v1457_v63 = vpack.c.bf16 %v1308_v62, %v1307_v61  ;;  %v1474_v61 = vpack.c.bf16 %v1342_v59, %v1341_v58  ;;  %v1344_v62 = vld [vmem:[%s11762_s23 + $0x138] sm:$0xff]  ;;  %v1373_v59 = vld [vmem:[%s11762_s23 + $0x220] sm:$0xff] }
 0x34f   : > { %v936_v10 = vpack.c.bf16 %v935_v9, %v935_v9  ;;  %v1460_v9 = vpack.c.bf16 %v1314_v7, %v1313_v6  ;;  %v1349_v6 = vld [vmem:[%s11762_s23 + $0x160] sm:$0xff]  ;;  %v1350_v7 = vld [vmem:[%s11762_s23 + $0x168] sm:$0xff] }
 0x351   : > { %10158 = vmatmul.mubr.msk.bf16.vlgmr.msra.gmra.mrb[8].mxu1 %vm937_vm6, %v936_v10  ;;  %v1316_v10 = vld [vmem:[%s11762_s23 + $0x58] sm:$0xff] }
 0x352   : > { %10162 = vmatpush3.bf16.xpose.msra.mxu1 %v878_v37  ;;  %10163 = vmatprep.mubr.msk.bf16.mxu1 %vm11620_vm0, %v11619_v21 }
 0x353   : > { %10167 = vmatprep.subr.bf16.mxu1 %v11619_v21 }
 0x359   : > { %10164 = vmatmul.mubr.bf16.vlgmr.msra.gmra.mrb[12].mxu1 %v982_v11  ;;  %v1461_v11 = vpack.c.bf16 %v1316_v10, %v1315_v8  ;;  %v1351_v8 = vld [vmem:[%s11762_s23 + $0x170] sm:$0xff]  ;;  %v1352_v10 = vld [vmem:[%s11762_s23 + $0x178] sm:$0xff] }
 0x35a   : > { %10168 = vmatpush3.bf16.msra.mxu1 %v880_v43  ;;  %10169 = vmatprep.mubr.msk.bf16.mxu1 %vm11620_vm0, %v11619_v21  ;;  %v11168_v43 = vld [vmem:[%s13789_s5] sm:$0xff]  }
 0x35b   : > { %10193 = vmatprep.subr.bf16.mxu1 %v11619_v21 }
 0x424   : > { %v975_v13 = vpop.f32.mrb[8].mxu1 }
 0x425   : > { %v1088_v14 = vpack.c.bf16 %v975_v13, %v975_v13  ;;  %v10159_v15 = vpop.f32.mrb[9].mxu1  ;;  %v1318_v13 = vld [vmem:[%s11762_s23 + $0x68] sm:$0xff] }
 0x426   : > { %v978_v16 = vpop.f32.mrb[10].mxu1  ;;  %v1462_v15 = vpack.c.bf16 %v1318_v13, %v1317_v12  ;;  %v1353_v12 = vld [vmem:[%s11762_s23 + $0x180] sm:$0xff]  ;;  %v1354_v13 = vld [vmem:[%s11762_s23 + $0x188] sm:$0xff] }
 0x427   : > { %v10160_v17 = vpop.f32.mrb[11].mxu1  ;;  %10190 = vmatmul.mubr.bf16.vlgmr.msra.gmra.mrb[8].mxu0 %v1088_v14  ;;  %v1319_v14 = vld [vmem:[%s11762_s23 + $0x70] sm:$0xff]  ;;  %v1320_v16 = vld [vmem:[%s11762_s23 + $0x78] sm:$0xff] }
 0x428   : > { %10214 = vmatpush3.bf16.msra.mxu0 %v11946_v38  ;;  %10229 = vmatprep.mubr.bf16.mxu0 %v1456_v60  ;;  %v1463_v17 = vpack.c.bf16 %v1320_v16, %v1319_v14  ;;  %v1343_v60 = vld [vmem:[%s11762_s23 + $0x130] sm:$0xff]  ;;  %v1356_v16 = vld [vmem:[%s11762_s23 + $0x198] sm:$0xff] }
 0x429   : > { %10215 = vmatprep.subr.bf16.mxu0 %v11988_v52  ;;  %v1355_v14 = vld [vmem:[%s11762_s23 + $0x190] sm:$0xff] }
 0x42c   : > { %v1019_v18 = vpop.f32.mrb[12].mxu1  ;;  %10216 = vmatpush3.bf16.msra.mxu0 %v11988_v52 }
 0x42d   : > { %v1026_v19 = vrot.slane %v1019_v18, 7  ;;  %v10165_v20 = vpop.f32.mrb[13].mxu1  ;;  %10217 = vmatprep.subr.bf16.mxu0 %v11995_v53  ;;  %v1321_v18 = vld [vmem:[%s11762_s23 + $0x80] sm:$0xff] }
 0x42e   : > { %v1022_v22 = vpop.f32.mrb[14].mxu1  ;;  %v1323_v20 = vld [vmem:[%s11762_s23 + $0x90] sm:$0xff] }
 0x42f   : > { %v10166_v23 = vpop.f32.mrb[15].mxu1  ;;  %v1028_v24 = vsel %vm922_vm4, %v1026_v19, -1e+09  ;;  %v1322_v19 = vld [vmem:[%s11762_s23 + $0x88] sm:$0xff] }
 0x430   : > { %v1030_v25 = vsel %vm1029_vm7, %v1028_v24, -inf  ;;  %10218 = vmatpush3.bf16.msra.mxu0 %v11995_v53  ;;  %v1464_v22 = vpack.c.bf16 %v1322_v19, %v1321_v18  ;;  %v1324_v23 = vld [vmem:[%s11762_s23 + $0x98] sm:$0xff]  ;;  %v1382_v18 = vld [vmem:[%s11762_s23 + $0x268] sm:$0xff]  ;;  %v1481_v19 = vpack.c.bf16 %v1356_v16, %v1355_v14 }
 0x431   : > { %1031 = vmax.xlane.f32.xlu1 %v1030_v25  ;;  %v1325_v25 = vld [vmem:[%s11762_s23 + $0xa0] sm:$0xff]  ;;  %v1394_v14 = vld [vmem:[%s11762_s23 + $0x2c8] sm:$0xff] }
 0x4be   : > { %v1032_v26 = vpop.xlane.xlu1 %1031 }
 0x4bf   : > { %v1033_v27 = vsub.f32 %v1028_v24, %v1032_v26  ;;  %v1465_v24 = vpack.c.bf16 %v1324_v23, %v1323_v20  ;;  %v1326_v26 = vld [vmem:[%s11762_s23 + $0xa8] sm:$0xff] }
 0x4c1   : > { %v1034_v28 = vmul.f32 1.442695, %v1033_v27  ;;  %v1327_v27 = vld [vmem:[%s11762_s23 + $0xb0] sm:$0xff] }
 0x4c3   : > { %11188 = vpow2.f32 %v1034_v28  ;;  %v1466_v28 = vpack.c.bf16 %v1326_v26, %v1325_v25 }
 0x4cd   : > { %v11189_v29 = vpop.eup %11188 }
 0x4ce   : > { %v1036_v30 = vsel %vm1029_vm7, %v11189_v29, 0.0 }
 0x4cf   : > { %1037 = vadd.xlane.f32.xlu1 %v1036_v30 }
 0x4fa   : > { %v1188_v32 = vpop.f32.mrb[8].mxu0 }
 0x4fb   : > { %v1189_v34 = vadd.f32 %v1188_v32, %v1105_v31  ;;  %v10191_v35 = vpop.f32.mrb[9].mxu0  ;;  %v1329_v32 = vld [vmem:[%s11762_s23 + $0xc0] sm:$0xff] }
 0x4fc   : > { %v1191_v36 = vpop.f32.mrb[10].mxu0  ;;  %v1331_v35 = vld [vmem:[%s11762_s23 + $0xd0] sm:$0xff] }
 0x4fd   : > { %1194 = vst [vmem:[#allocation3] sm:$0x1] %v1189_v34  ;;  %v10192_v37 = vpop.f32.mrb[11].mxu0  ;;  %v1330_v34 = vld [vmem:[%s11762_s23 + $0xc8] sm:$0xff] }
 0x4fe   : > { %v1468_v36 = vpack.c.bf16 %v1330_v34, %v1329_v32  ;;  %v1332_v37 = vld [vmem:[%s11762_s23 + $0xd8] sm:$0xff] }
 0x4ff   : > { %v1360_v32 = vld [vmem:[%s11762_s23 + $0x1b8] sm:$0xff] }
 0x55c   : > { %v1038_v39 = vpop.xlane.xlu1 %1037 }
 0x55d   : > { %11190 = vrcp.f32 %v1038_v39  ;;  %v1469_v39 = vpack.c.bf16 %v1332_v37, %v1331_v35  ;;  %v1361_v35 = vld [vmem:[%s11762_s23 + $0x1c0] sm:$0xff]  ;;  %v1363_v37 = vld [vmem:[%s11762_s23 + $0x1d0] sm:$0xff] }
 0x567   : > { %v11191_v40 = vpop.eup %11190 }
 0x568   : > { %v1040_v41 = vmul.f32 %v11191_v40, %v11189_v29  ;;  %v1328_v29 = vld [vmem:[%s11762_s23 + $0xb8] sm:$0xff]  ;;  %v1333_v40 = vld [vmem:[%s11762_s23 + $0xe0] sm:$0xff] }
 0x569   : > { %v1467_v30 = vpack.c.bf16 %v1328_v29, %v1327_v27  ;;  %v1357_v27 = vld [vmem:[%s11762_s23 + $0x1a0] sm:$0xff]  ;;  %v1359_v29 = vld [vmem:[%s11762_s23 + $0x1b0] sm:$0xff] }
 0x56a   : > { %v1041_v42 = vpack.c.bf16 %v1040_v41, %v1040_v41  ;;  %v1334_v41 = vld [vmem:[%s11762_s23 + $0xe8] sm:$0xff]  ;;  %v1483_v34 = vpack.c.bf16 %v1360_v32, %v1359_v29  ;;  %v1403_v32 = vld [vmem:[%s11762_s23 + $0x310] sm:$0xff] }
 0x56c   : > { %v1043_v44 = vshrl.u32 %v1041_v42, 16  ;;  %v1335_v42 = vld [vmem:[%s11762_s23 + $0xf0] sm:$0xff] }
 0x56e   : > { %10170 = vmatmul.mubr.msk.bf16.vlgmr.msra.gmra.mrb[16].mxu1 %vm937_vm6, %v1043_v44  ;;  %v1336_v44 = vld [vmem:[%s11762_s23 + $0xf8] sm:$0xff] }
 0x56f   : > { %10194 = vmatpush3.bf16.msra.mxu1 %v11168_v43  ;;  %10209 = vmatprep.mubr.msk.bf16.mxu1 %vm11620_vm0, %v11619_v21  ;;  %v1470_v43 = vpack.c.bf16 %v1334_v41, %v1333_v40  ;;  %v1366_v41 = vld [vmem:[%s11762_s23 + $0x1e8] sm:$0xff] }
 0x570   : > { %10195 = vmatprep.subr.bf16.mxu1 %v11619_v21 }
 0x573   : > { %10196 = vmatpush3.bf16.msra.mxu1 %v11169_v45  ;;  %v1471_v45 = vpack.c.bf16 %v1336_v44, %v1335_v42  ;;  %v1367_v42 = vld [vmem:[%s11762_s23 + $0x1f0] sm:$0xff]  ;;  %v1369_v44 = vld [vmem:[%s11762_s23 + $0x200] sm:$0xff] }
 0x574   : > { %10197 = vmatprep.subr.bf16.mxu1 %v11619_v21 }
 0x577   : > { %10198 = vmatpush3.bf16.msra.mxu1 %v11170_v46  ;;  %v1337_v46 = vld [vmem:[%s11762_s23 + $0x100] sm:$0xff] }
 0x578   : > { %10199 = vmatprep.subr.bf16.mxu1 %v11619_v21 }
 0x57b   : > { %10200 = vmatpush3.bf16.msra.mxu1 %v11171_v47  ;;  %v1338_v47 = vld [vmem:[%s11762_s23 + $0x108] sm:$0xff] }
 0x57c   : > { %10201 = vmatprep.subr.bf16.mxu1 %v11619_v21 }
 0x57f   : > { %10202 = vmatpush3.bf16.msra.mxu1 %v11172_v48  ;;  %v1339_v48 = vld [vmem:[%s11762_s23 + $0x110] sm:$0xff] }
 0x580   : > { %10203 = vmatprep.subr.bf16.mxu1 %v11619_v21 }
 0x583   : > { %10204 = vmatpush3.bf16.msra.mxu1 %v11173_v49  ;;  %v1472_v49 = vpack.c.bf16 %v1338_v47, %v1337_v46  ;;  %v1371_v46 = vld [vmem:[%s11762_s23 + $0x210] sm:$0xff]  ;;  %v1384_v47 = vld [vmem:[%s11762_s23 + $0x278] sm:$0xff] }
 0x584   : > { %10205 = vmatprep.subr.bf16.mxu1 %v11619_v21 }
 0x587   : > { %10206 = vmatpush3.bf16.msra.mxu1 %v11174_v50  ;;  %v1340_v50 = vld [vmem:[%s11762_s23 + $0x118] sm:$0xff] }
 0x588   : > { %10207 = vmatprep.subr.bf16.mxu1 %v11619_v21  ;;  %v12002_v21 = vld [vmem:[%s13792_s8 + $0x18] sm:$0xff]  }
 0x589   : > { %10219 = vmatprep.subr.bf16.mxu0 %v12002_v21 }
 0x58a   : > { %10220 = vmatpush3.bf16.msra.mxu0 %v12002_v21 }
 0x58b   : > { %10208 = vmatpush3.bf16.msra.mxu1 %v11175_v51  ;;  %10221 = vmatprep.subr.bf16.mxu0 %v12009_v54  ;;  %v1473_v51 = vpack.c.bf16 %v1340_v50, %v1339_v48  ;;  %v1386_v50 = vld [vmem:[%s11762_s23 + $0x288] sm:$0xff] }
 0x58c   : > { %10381 = vmatprep.subr.bf16.mxu1 %v11946_v38 }
 0x58e   : > { %10222 = vmatpush3.bf16.msra.mxu0 %v12009_v54 }
 0x58f   : > { %10223 = vmatprep.subr.bf16.mxu0 %v12016_v55 }
 0x592   : > { %10224 = vmatpush3.bf16.msra.mxu0 %v12016_v55 }
 0x593   : > { %10225 = vmatprep.subr.bf16.mxu0 %v12023_v56 }
 0x596   : > { %10226 = vmatpush3.bf16.msra.mxu0 %v12023_v56 }
 0x597   : > { %10227 = vmatprep.subr.bf16.mxu0 %v12030_v57 }
 0x59a   : > { %10228 = vmatpush3.bf16.msra.mxu0 %v12030_v57 }
 0x59d   : > { %10230 = vmatmul.mubr.bf16.vlgmr.msra.gmra.mrb[12].mxu0 %v1457_v63  ;;  %v1475_v63 = vpack.c.bf16 %v1344_v62, %v1343_v60  ;;  %v1374_v60 = vld [vmem:[%s11762_s23 + $0x228] sm:$0xff]  ;;  %v1387_v62 = vld [vmem:[%s11762_s23 + $0x290] sm:$0xff] }
 0x59e   : > { %10233 = vmatprep.mubr.bf16.mxu0 %v1458_v3  ;;  %v1476_v3 = vpack.c.bf16 %v1346_v1, %v1345_v0  ;;  %v1490_v0 = vpack.c.bf16 %v1374_v60, %v1373_v59  ;;  %v1376_v1 = vld [vmem:[%s11762_s23 + $0x238] sm:$0xff]  ;;  %v1421_v59 = vld [vmem:[%s11762_s23 + $0x3a0] sm:$0xff]  ;;  %v1422_v60 = vld [vmem:[%s11762_s23 + $0x3a8] sm:$0xff] }
 0x5a5   : > { %10234 = vmatmul.mubr.bf16.gmra.mrb[16].mxu0 %v1459_v5  ;;  %v1477_v5 = vpack.c.bf16 %v1348_v4, %v1347_v2  ;;  %v1389_v2 = vld [vmem:[%s11762_s23 + $0x2a0] sm:$0xff] }
 0x5a6   : > { %10237 = vmatprep.mubr.bf16.mxu0 %v1460_v9  ;;  %v1478_v9 = vpack.c.bf16 %v1350_v7, %v1349_v6  ;;  %v1377_v6 = vld [vmem:[%s11762_s23 + $0x240] sm:$0xff]  ;;  %v1378_v7 = vld [vmem:[%s11762_s23 + $0x248] sm:$0xff] }
 0x5ad   : > { %10238 = vmatmul.mubr.bf16.gmra.mrb[20].mxu0 %v1461_v11  ;;  %v1479_v11 = vpack.c.bf16 %v1352_v10, %v1351_v8  ;;  %v1379_v8 = vld [vmem:[%s11762_s23 + $0x250] sm:$0xff]  ;;  %v1392_v10 = vld [vmem:[%s11762_s23 + $0x2b8] sm:$0xff] }
 0x5ae   : > { %10241 = vmatprep.mubr.bf16.mxu0 %v1462_v15  ;;  %v1480_v15 = vpack.c.bf16 %v1354_v13, %v1353_v12  ;;  %v1380_v12 = vld [vmem:[%s11762_s23 + $0x258] sm:$0xff]  ;;  %v1393_v13 = vld [vmem:[%s11762_s23 + $0x2c0] sm:$0xff] }
 0x5b5   : > { %10242 = vmatmul.mubr.bf16.gmra.mrb[24].mxu0 %v1463_v17  ;;  %v1381_v17 = vld [vmem:[%s11762_s23 + $0x260] sm:$0xff] }
 0x5b6   : > { %10245 = vmatprep.mubr.bf16.mxu0 %v1464_v22  ;;  %v1494_v22 = vpack.c.bf16 %v1382_v18, %v1381_v17  ;;  %v1500_v17 = vpack.c.bf16 %v1394_v14, %v1393_v13  ;;  %v1395_v18 = vld [vmem:[%s11762_s23 + $0x2d0] sm:$0xff] }
 0x5bd   : > { %10246 = vmatmul.mubr.bf16.gmra.mrb[28].mxu0 %v1465_v24 }
 0x5be   : > { %10249 = vmatprep.mubr.bf16.mxu0 %v1466_v28  ;;  %v1358_v28 = vld [vmem:[%s11762_s23 + $0x1a8] sm:$0xff] }
 0x5c5   : > { %10250 = vmatmul.mubr.bf16.gmra.mrb[32].mxu0 %v1467_v30  ;;  %v1482_v30 = vpack.c.bf16 %v1358_v28, %v1357_v27  ;;  %v1401_v27 = vld [vmem:[%s11762_s23 + $0x300] sm:$0xff]  ;;  %v1402_v28 = vld [vmem:[%s11762_s23 + $0x308] sm:$0xff] }
 0x5c6   : > { %10253 = vmatprep.mubr.bf16.mxu0 %v1468_v36  ;;  %v1362_v36 = vld [vmem:[%s11762_s23 + $0x1c8] sm:$0xff] }
 0x5cd   : > { %10254 = vmatmul.mubr.bf16.gmra.mrb[36].mxu0 %v1469_v39  ;;  %v1364_v39 = vld [vmem:[%s11762_s23 + $0x1d8] sm:$0xff] }
 0x5ce   : > { %10257 = vmatprep.mubr.bf16.mxu0 %v1470_v43  ;;  %v1485_v40 = vpack.c.bf16 %v1364_v39, %v1363_v37  ;;  %v1368_v43 = vld [vmem:[%s11762_s23 + $0x1f8] sm:$0xff]  ;;  %v1407_v39 = vld [vmem:[%s11762_s23 + $0x330] sm:$0xff] }
 0x5d5   : > { %10258 = vmatmul.mubr.bf16.gmra.mrb[40].mxu0 %v1471_v45  ;;  %v1370_v45 = vld [vmem:[%s11762_s23 + $0x208] sm:$0xff] }
 0x5d6   : > { %10261 = vmatprep.mubr.bf16.mxu0 %v1472_v49  ;;  %v1488_v48 = vpack.c.bf16 %v1370_v45, %v1369_v44  ;;  %v1372_v49 = vld [vmem:[%s11762_s23 + $0x218] sm:$0xff]  ;;  %v1413_v44 = vld [vmem:[%s11762_s23 + $0x360] sm:$0xff]  ;;  %v1414_v45 = vld [vmem:[%s11762_s23 + $0x368] sm:$0xff] }
 0x5dd   : > { %10262 = vmatmul.mubr.bf16.gmra.mrb[44].mxu0 %v1473_v51  ;;  %v1489_v51 = vpack.c.bf16 %v1372_v49, %v1371_v46  ;;  %v1417_v49 = vld [vmem:[%s11762_s23 + $0x380] sm:$0xff] }
 0x5de   : > { %10265 = vmatprep.mubr.bf16.mxu0 %v1474_v61  ;;  %v1375_v61 = vld [vmem:[%s11762_s23 + $0x230] sm:$0xff] }
 0x5e5   : > { %10266 = vmatmul.mubr.bf16.gmra.mrb[48].mxu0 %v1475_v63  ;;  %v1388_v63 = vld [vmem:[%s11762_s23 + $0x298] sm:$0xff] }
 0x5e6   : > { %10269 = vmatprep.mubr.bf16.mxu0 %v1476_v3  ;;  %v1491_v3 = vpack.c.bf16 %v1376_v1, %v1375_v61  ;;  %v1497_v4 = vpack.c.bf16 %v1388_v63, %v1387_v62  ;;  %v1514_v62 = vpack.c.bf16 %v1422_v60, %v1421_v59  ;;  %v1423_v63 = vld [vmem:[%s11762_s23 + $0x3b0] sm:$0xff]  ;;  %v1425_v1 = vld [vmem:[%s11762_s23 + $0x3c0] sm:$0xff]  ;;  %v1446_v60 = vld [vmem:[%s11762_s23 + $0x468] sm:$0xff] }
 0x5e7   : > { %v1445_v59 = vld [vmem:[%s11762_s23 + $0x460] sm:$0xff] }
 0x5ed   : > { %10270 = vmatmul.mubr.bf16.gmra.mrb[52].mxu0 %v1477_v5 }
 0x5ee   : > { %10273 = vmatprep.mubr.bf16.mxu0 %v1478_v9  ;;  %v1391_v9 = vld [vmem:[%s11762_s23 + $0x2b0] sm:$0xff] }
 0x5ef   : > { %v1499_v16 = vpack.c.bf16 %v1392_v10, %v1391_v9  ;;  %v1430_v9 = vld [vmem:[%s11762_s23 + $0x3e8] sm:$0xff] }
 0x5f5   : > { %10274 = vmatmul.mubr.bf16.gmra.mrb[56].mxu0 %v1479_v11  ;;  %v1492_v11 = vpack.c.bf16 %v1378_v7, %v1377_v6  ;;  %v1428_v6 = vld [vmem:[%s11762_s23 + $0x3d8] sm:$0xff] }
 0x5f6   : > { %10277 = vmatprep.mubr.bf16.mxu0 %v1480_v15  ;;  %v1493_v15 = vpack.c.bf16 %v1380_v12, %v1379_v8  ;;  %v1429_v8 = vld [vmem:[%s11762_s23 + $0x3e0] sm:$0xff] }
 0x5fd   : > { %10278 = vmatmul.mubr.bf16.gmra.mrb[60].mxu0 %v1481_v19  ;;  %v1396_v19 = vld [vmem:[%s11762_s23 + $0x2d8] sm:$0xff] }
 0x5fe   : > { %10281 = vmatprep.mubr.bf16.mxu0 %v1482_v30  ;;  %v1504_v30 = vpack.c.bf16 %v1402_v28, %v1401_v27 }
 0x605   : > { %10282 = vmatmul.mubr.bf16.gmra.mrb[64].mxu0 %v1483_v34  ;;  %v1404_v34 = vld [vmem:[%s11762_s23 + $0x318] sm:$0xff] }
 0x606   : > { %v1505_v37 = vpack.c.bf16 %v1404_v34, %v1403_v32  ;;  %v1436_v32 = vld [vmem:[%s11762_s23 + $0x418] sm:$0xff] }
 0x641   : > { %v1082_v20 = vpop.f32.mrb[16].mxu1 }
 0x642   : > { %v1195_v23 = vpack.c.bf16 %v1082_v20, %v1082_v20  ;;  %v10171_v24 = vpop.f32.mrb[17].mxu1  ;;  %v1397_v20 = vld [vmem:[%s11762_s23 + $0x2e0] sm:$0xff] }
 0x643   : > { %v1085_v25 = vpop.f32.mrb[18].mxu1 }
 0x644   : > { %v10172_v26 = vpop.f32.mrb[19].mxu1  ;;  %10210 = vmatmul.mubr.bf16.vlgmr.msra.gmra.mrb[20].mxu1 %v1195_v23  ;;  %v1501_v23 = vpack.c.bf16 %v1396_v19, %v1395_v18  ;;  %v1399_v25 = vld [vmem:[%s11762_s23 + $0x2f0] sm:$0xff]  ;;  %v1432_v18 = vld [vmem:[%s11762_s23 + $0x3f8] sm:$0xff] }
 0x645   : > { %10389 = vmatpush3.bf16.msra.mxu1 %v11946_v38  ;;  %10305 = vmatprep.mubr.bf16.mxu1 %v1494_v22  ;;  %v1484_v38 = vpack.c.bf16 %v1362_v36, %v1361_v35  ;;  %v1398_v22 = vld [vmem:[%s11762_s23 + $0x2e8] sm:$0xff]  ;;  %v1400_v26 = vld [vmem:[%s11762_s23 + $0x2f8] sm:$0xff]  ;;  %v1405_v35 = vld [vmem:[%s11762_s23 + $0x320] sm:$0xff] }
 0x646   : > { %10382 = vmatprep.subr.bf16.mxu1 %v11988_v52  ;;  %v1502_v24 = vpack.c.bf16 %v1398_v22, %v1397_v20  ;;  %v1503_v29 = vpack.c.bf16 %v1400_v26, %v1399_v25  ;;  %v1406_v36 = vld [vmem:[%s11762_s23 + $0x328] sm:$0xff]  ;;  %v1433_v20 = vld [vmem:[%s11762_s23 + $0x400] sm:$0xff] }
 0x647   : > { %10285 = vmatprep.mubr.bf16.mxu0 %v1484_v38  ;;  %v1506_v38 = vpack.c.bf16 %v1406_v36, %v1405_v35  ;;  %v1434_v22 = vld [vmem:[%s11762_s23 + $0x408] sm:$0xff]  ;;  %v1437_v35 = vld [vmem:[%s11762_s23 + $0x420] sm:$0xff] }
 0x648   : > { %10286 = vmatmul.mubr.bf16.gmra.mrb[68].mxu0 %v1485_v40  ;;  %v1408_v40 = vld [vmem:[%s11762_s23 + $0x338] sm:$0xff]  ;;  %v1520_v28 = vpack.c.bf16 %v1434_v22, %v1433_v20  ;;  %v1438_v36 = vld [vmem:[%s11762_s23 + $0x428] sm:$0xff] }
 0x649   : > { %10390 = vmatpush3.bf16.msra.mxu1 %v11988_v52  ;;  %v1365_v52 = vld [vmem:[%s11762_s23 + $0x1e0] sm:$0xff] }
 0x64a   : > { %10383 = vmatprep.subr.bf16.mxu1 %v11995_v53 }
 0x64d   : > { %10391 = vmatpush3.bf16.msra.mxu1 %v11995_v53  ;;  %v1486_v53 = vpack.c.bf16 %v1366_v41, %v1365_v52  ;;  %v1409_v52 = vld [vmem:[%s11762_s23 + $0x340] sm:$0xff]  ;;  %v1410_v41 = vld [vmem:[%s11762_s23 + $0x348] sm:$0xff] }
 0x64e   : > { %10384 = vmatprep.subr.bf16.mxu1 %v12002_v21 }
 0x64f   : > { %10289 = vmatprep.mubr.bf16.mxu0 %v1486_v53  ;;  %v1508_v53 = vpack.c.bf16 %v1410_v41, %v1409_v52  ;;  %v1522_v41 = vpack.c.bf16 %v1438_v36, %v1437_v35 }
 0x651   : > { %10392 = vmatpush3.bf16.msra.mxu1 %v12002_v21  ;;  %v1487_v21 = vpack.c.bf16 %v1368_v43, %v1367_v42  ;;  %v1507_v42 = vpack.c.bf16 %v1408_v40, %v1407_v39  ;;  %v1411_v43 = vld [vmem:[%s11762_s23 + $0x350] sm:$0xff] }
 0x652   : > { %10385 = vmatprep.subr.bf16.mxu1 %v12009_v54 }
 0x653   : > { %10290 = vmatmul.mubr.bf16.gmra.mrb[72].mxu0 %v1487_v21  ;;  %v1412_v21 = vld [vmem:[%s11762_s23 + $0x358] sm:$0xff] }
 0x654   : > { %10293 = vmatprep.mubr.bf16.mxu0 %v1488_v48  ;;  %v1509_v46 = vpack.c.bf16 %v1412_v21, %v1411_v43  ;;  %v1416_v48 = vld [vmem:[%s11762_s23 + $0x378] sm:$0xff] }
 0x655   : > { %10393 = vmatpush3.bf16.msra.mxu1 %v12009_v54  ;;  %v1383_v54 = vld [vmem:[%s11762_s23 + $0x270] sm:$0xff]  ;;  %v1440_v43 = vld [vmem:[%s11762_s23 + $0x438] sm:$0xff] }
 0x656   : > { %10386 = vmatprep.subr.bf16.mxu1 %v12016_v55  ;;  %v1495_v58 = vpack.c.bf16 %v1384_v47, %v1383_v54  ;;  %v1510_v54 = vpack.c.bf16 %v1414_v45, %v1413_v44  ;;  %v1415_v47 = vld [vmem:[%s11762_s23 + $0x370] sm:$0xff]  ;;  %v1441_v44 = vld [vmem:[%s11762_s23 + $0x440] sm:$0xff]  ;;  %v1442_v45 = vld [vmem:[%s11762_s23 + $0x448] sm:$0xff] }
 0x659   : > { %10394 = vmatpush3.bf16.msra.mxu1 %v12016_v55  ;;  %v1385_v55 = vld [vmem:[%s11762_s23 + $0x280] sm:$0xff] }
 0x65a   : > { %10387 = vmatprep.subr.bf16.mxu1 %v12023_v56 }
 0x65b   : > { %10294 = vmatmul.mubr.bf16.gmra.mrb[76].mxu0 %v1489_v51 }
 0x65c   : > { %10297 = vmatprep.mubr.bf16.mxu0 %v1490_v0  ;;  %v1424_v0 = vld [vmem:[%s11762_s23 + $0x3b8] sm:$0xff] }
 0x65d   : > { %10395 = vmatpush3.bf16.msra.mxu1 %v12023_v56  ;;  %v1496_v56 = vpack.c.bf16 %v1386_v50, %v1385_v55  ;;  %v1418_v55 = vld [vmem:[%s11762_s23 + $0x388] sm:$0xff]  ;;  %v1511_v50 = vpack.c.bf16 %v1416_v48, %v1415_v47 }
 0x65e   : > { %10388 = vmatprep.subr.bf16.mxu1 %v12030_v57  ;;  %v1512_v51 = vpack.c.bf16 %v1418_v55, %v1417_v49  ;;  %v1524_v55 = vpack.c.bf16 %v1442_v45, %v1441_v44 }
 0x661   : > { %10396 = vmatpush3.bf16.msra.mxu1 %v12030_v57  ;;  %v1390_v57 = vld [vmem:[%s11762_s23 + $0x2a8] sm:$0xff] }
 0x662   : > { %v1498_v5 = vpack.c.bf16 %v1390_v57, %v1389_v2  ;;  %v1426_v2 = vld [vmem:[%s11762_s23 + $0x3c8] sm:$0xff]  ;;  %v1515_v57 = vpack.c.bf16 %v1424_v0, %v1423_v63 }
 0x663   : > { %10298 = vmatmul.mubr.bf16.gmra.mrb[80].mxu0 %v1491_v3  ;;  %v1516_v3 = vpack.c.bf16 %v1426_v2, %v1425_v1  ;;  %v1526_v2 = vpack.c.bf16 %v1446_v60, %v1445_v59 }
 0x664   : > { %10306 = vmatmul.mubr.bf16.vlgmr.msra.gmra.mrb[24].mxu1 %v1495_v58  ;;  %10301 = vmatprep.mubr.bf16.mxu0 %v1492_v11  ;;  %v1419_v58 = vld [vmem:[%s11762_s23 + $0x390] sm:$0xff] }
 0x665   : > { %10309 = vmatprep.mubr.bf16.mxu1 %v1496_v56  ;;  %v1420_v56 = vld [vmem:[%s11762_s23 + $0x398] sm:$0xff] }
 0x666   : > { %v1513_v61 = vpack.c.bf16 %v1420_v56, %v1419_v58  ;;  %v1444_v58 = vld [vmem:[%s11762_s23 + $0x458] sm:$0xff] }
 0x66b   : > { %10302 = vmatmul.mubr.bf16.gmra.mrb[84].mxu0 %v1493_v15  ;;  %v1518_v15 = vpack.c.bf16 %v1430_v9, %v1429_v8 }
 0x66c   : > { %10310 = vmatmul.mubr.bf16.gmra.mrb[28].mxu1 %v1497_v4 }
 0x66d   : > { %10313 = vmatprep.mubr.bf16.mxu1 %v1498_v5  ;;  %v1427_v5 = vld [vmem:[%s11762_s23 + $0x3d0] sm:$0xff] }
 0x66e   : > { %v1517_v13 = vpack.c.bf16 %v1428_v6, %v1427_v5  ;;  %v1449_v6 = vld [vmem:[%s11762_s23 + $0x480] sm:$0xff] }
 0x670   : > { %v10231_v4 = vpop.f32.mrb[12].mxu0 }
 0x671   : > { %v1630_v7 = vpop.f32.mrb[13].mxu0 }
 0x672   : > { %v10232_v10 = vpop.f32.mrb[14].mxu0 }
 0x673   : > { %v9509_v11 = vpack.c.bf16 %v10232_v10, %v10231_v4  ;;  %v1633_v12 = vpop.f32.mrb[15].mxu0  ;;  %v1448_v4 = vld [vmem:[%s11762_s23 + $0x478] sm:$0xff] }
 0x674   : > { %10314 = vmatmul.mubr.bf16.gmra.mrb[32].mxu1 %v1499_v16  ;;  %v9504_v14 = vpack.c.bf16 %v1633_v12, %v1630_v7  ;;  %v1450_v7 = vld [vmem:[%s11762_s23 + $0x488] sm:$0xff] }
 0x675   : > { %10317 = vmatprep.mubr.bf16.mxu1 %v1500_v17  ;;  %9876 = vst [vmem:[#allocation2 + $0x8] sm:$0xff] %v9509_v11   ;;  %v1431_v17 = vld [vmem:[%s11762_s23 + $0x3f0] sm:$0xff] }
 0x676   : > { %9505 = vst [vmem:[#allocation2] sm:$0xff] %v9504_v14   ;;  %v1519_v26 = vpack.c.bf16 %v1432_v18, %v1431_v17  ;;  %v1453_v18 = vld [vmem:[%s11762_s23 + $0x4a0] sm:$0xff] }
 0x678   : > { %v10235_v16 = vpop.f32.mrb[16].mxu0 }
 0x679   : > { %v1646_v19 = vpop.f32.mrb[17].mxu0 }
 0x67c   : > { %10318 = vmatmul.mubr.bf16.gmra.mrb[36].mxu1 %v1501_v23  ;;  %v10236_v23 = vpop.f32.mrb[18].mxu0 }
 0x67d   : > { %10321 = vmatprep.mubr.bf16.mxu1 %v1502_v24  ;;  %v9519_v24 = vpack.c.bf16 %v10236_v23, %v10235_v16  ;;  %v1649_v25 = vpop.f32.mrb[19].mxu0  ;;  %v1452_v16 = vld [vmem:[%s11762_s23 + $0x498] sm:$0xff] }
 0x67e   : > { %v9514_v27 = vpack.c.bf16 %v1649_v25, %v1646_v19  ;;  %v1454_v19 = vld [vmem:[%s11762_s23 + $0x4a8] sm:$0xff] }
 0x67f   : > { %9878 = vst [vmem:[#allocation2 + $0x18] sm:$0xff] %v9519_v24  }
 0x680   : > { %9877 = vst [vmem:[#allocation2 + $0x10] sm:$0xff] %v9514_v27  }
 0x684   : > { %10322 = vmatmul.mubr.bf16.gmra.mrb[40].mxu1 %v1503_v29  ;;  %v10239_v29 = vpop.f32.mrb[20].mxu0 }
 0x685   : > { %10325 = vmatprep.mubr.bf16.mxu1 %v1504_v30  ;;  %v1435_v30 = vld [vmem:[%s11762_s23 + $0x410] sm:$0xff]  ;;  %v1662_v34 = vpop.f32.mrb[21].mxu0 }
 0x686   : > { %v1521_v40 = vpack.c.bf16 %v1436_v32, %v1435_v30 }
 0x68c   : > { %10326 = vmatmul.mubr.bf16.gmra.mrb[44].mxu1 %v1505_v37  ;;  %v10240_v37 = vpop.f32.mrb[22].mxu0 }
 0x68d   : > { %10329 = vmatprep.mubr.bf16.mxu1 %v1506_v38  ;;  %v9529_v38 = vpack.c.bf16 %v10240_v37, %v10239_v29  ;;  %v1665_v39 = vpop.f32.mrb[23].mxu0 }
 0x68e   : > { %v9524_v52 = vpack.c.bf16 %v1665_v39, %v1662_v34 }
 0x68f   : > { %9880 = vst [vmem:[#allocation2 + $0x28] sm:$0xff] %v9529_v38  }
 0x690   : > { %9879 = vst [vmem:[#allocation2 + $0x20] sm:$0xff] %v9524_v52  }
 0x694   : > { %10330 = vmatmul.mubr.bf16.gmra.mrb[48].mxu1 %v1507_v42  ;;  %v10243_v42 = vpop.f32.mrb[24].mxu0 }
 0x695   : > { %10333 = vmatprep.mubr.bf16.mxu1 %v1508_v53  ;;  %v1439_v53 = vld [vmem:[%s11762_s23 + $0x430] sm:$0xff]  ;;  %v1678_v21 = vpop.f32.mrb[25].mxu0 }
 0x696   : > { %v1523_v48 = vpack.c.bf16 %v1440_v43, %v1439_v53 }
 0x69c   : > { %10334 = vmatmul.mubr.bf16.gmra.mrb[52].mxu1 %v1509_v46  ;;  %v10244_v46 = vpop.f32.mrb[26].mxu0 }
 0x69d   : > { %10337 = vmatprep.mubr.bf16.mxu1 %v1510_v54  ;;  %v9539_v54 = vpack.c.bf16 %v10244_v46, %v10243_v42  ;;  %v1681_v47 = vpop.f32.mrb[27].mxu0 }
 0x69e   : > { %v9534_v49 = vpack.c.bf16 %v1681_v47, %v1678_v21 }
 0x69f   : > { %9882 = vst [vmem:[#allocation2 + $0x38] sm:$0xff] %v9539_v54  }
 0x6a0   : > { %9881 = vst [vmem:[#allocation2 + $0x30] sm:$0xff] %v9534_v49  }
 0x6a4   : > { %10338 = vmatmul.mubr.bf16.gmra.mrb[56].mxu1 %v1511_v50  ;;  %v10247_v50 = vpop.f32.mrb[28].mxu0 }
 0x6a5   : > { %10341 = vmatprep.mubr.bf16.mxu1 %v1512_v51  ;;  %v1443_v51 = vld [vmem:[%s11762_s23 + $0x450] sm:$0xff]  ;;  %v1694_v56 = vpop.f32.mrb[29].mxu0 }
 0x6a6   : > { %v1525_v0 = vpack.c.bf16 %v1444_v58, %v1443_v51 }
 0x6ac   : > { %10342 = vmatmul.mubr.bf16.gmra.mrb[60].mxu1 %v1513_v61  ;;  %v10248_v61 = vpop.f32.mrb[30].mxu0 }
 0x6ad   : > { %10345 = vmatprep.mubr.bf16.mxu1 %v1514_v62  ;;  %v9549_v62 = vpack.c.bf16 %v10248_v61, %v10247_v50  ;;  %v1697_v63 = vpop.f32.mrb[31].mxu0  ;;  %v1261_v61 = vrot.slane %v1105_v31, 1 }
 0x6ae   : > { %v9544_v1 = vpack.c.bf16 %v1697_v63, %v1694_v56 }
 0x6af   : > { %9884 = vst [vmem:[#allocation2 + $0x48] sm:$0xff] %v9549_v62  }
 0x6b0   : > { %9883 = vst [vmem:[#allocation2 + $0x40] sm:$0xff] %v9544_v1  }
 0x6b4   : > { %10346 = vmatmul.mubr.bf16.gmra.mrb[64].mxu1 %v1515_v57  ;;  %v10251_v57 = vpop.f32.mrb[32].mxu0 }
 0x6b5   : > { %10349 = vmatprep.mubr.bf16.mxu1 %v1516_v3  ;;  %v1447_v3 = vld [vmem:[%s11762_s23 + $0x470] sm:$0xff]  ;;  %v1710_v5 = vpop.f32.mrb[33].mxu0 }
 0x6b6   : > { %v10252_v8 = vpop.f32.mrb[34].mxu0  ;;  %v1527_v11 = vpack.c.bf16 %v1448_v4, %v1447_v3 }
 0x6b7   : > { %v9559_v9 = vpack.c.bf16 %v10252_v8, %v10251_v57  ;;  %v1713_v10 = vpop.f32.mrb[35].mxu0 }
 0x6b8   : > { %v9554_v12 = vpack.c.bf16 %v1713_v10, %v1710_v5  ;;  %v10255_v14 = vpop.f32.mrb[36].mxu0 }
 0x6b9   : > { %9886 = vst [vmem:[#allocation2 + $0x58] sm:$0xff] %v9559_v9   ;;  %v1726_v17 = vpop.f32.mrb[37].mxu0 }
 0x6ba   : > { %9885 = vst [vmem:[#allocation2 + $0x50] sm:$0xff] %v9554_v12   ;;  %v10256_v20 = vpop.f32.mrb[38].mxu0 }
 0x6bb   : > { %v9569_v22 = vpack.c.bf16 %v10256_v20, %v10255_v14  ;;  %v1729_v23 = vpop.f32.mrb[39].mxu0 }
 0x6bc   : > { %10350 = vmatmul.mubr.bf16.gmra.mrb[68].mxu1 %v1517_v13  ;;  %v1528_v13 = vpack.c.bf16 %v1450_v7, %v1449_v6  ;;  %v9564_v25 = vpack.c.bf16 %v1729_v23, %v1726_v17  ;;  %v10259_v27 = vpop.f32.mrb[40].mxu0 }
 0x6bd   : > { %10353 = vmatprep.mubr.bf16.mxu1 %v1518_v15  ;;  %v1451_v15 = vld [vmem:[%s11762_s23 + $0x490] sm:$0xff]  ;;  %9888 = vst [vmem:[#allocation2 + $0x68] sm:$0xff] %v9569_v22   ;;  %v1742_v29 = vpop.f32.mrb[41].mxu0 }
 0x6be   : > { %v1529_v24 = vpack.c.bf16 %v1452_v16, %v1451_v15  ;;  %9887 = vst [vmem:[#allocation2 + $0x60] sm:$0xff] %v9564_v25   ;;  %v10260_v30 = vpop.f32.mrb[42].mxu0 }
 0x6bf   : > { %v9579_v32 = vpack.c.bf16 %v10260_v30, %v10259_v27  ;;  %v1745_v34 = vpop.f32.mrb[43].mxu0 }
 0x6c0   : > { %v9574_v36 = vpack.c.bf16 %v1745_v34, %v1742_v29  ;;  %v10263_v37 = vpop.f32.mrb[44].mxu0 }
 0x6c1   : > { %9890 = vst [vmem:[#allocation2 + $0x78] sm:$0xff] %v9579_v32   ;;  %v1758_v38 = vpop.f32.mrb[45].mxu0 }
 0x6c2   : > { %9889 = vst [vmem:[#allocation2 + $0x70] sm:$0xff] %v9574_v36   ;;  %v10264_v39 = vpop.f32.mrb[46].mxu0 }
 0x6c3   : > { %v1761_v52 = vpop.f32.mrb[47].mxu0 }
 0x6c4   : > { %10354 = vmatmul.mubr.bf16.gmra.mrb[72].mxu1 %v1519_v26  ;;  %v1530_v26 = vpack.c.bf16 %v1454_v19, %v1453_v18  ;;  %v10267_v42 = vpop.f32.mrb[48].mxu0 }
 0x6c5   : > { %10357 = vmatprep.mubr.bf16.mxu1 %v1520_v28  ;;  %v1455_v28 = vld [vmem:[%s11762_s23 + $0x4b0] sm:$0x3f]  ;;  %v1774_v53 = vpop.f32.mrb[49].mxu0 }
 0x6c6   : > { %v1531_v35 = vpack.c.bf16 %v1455_v28, %v1455_v28  ;;  %v10268_v43 = vpop.f32.mrb[50].mxu0 }
 0x6c7   : > { %v9599_v21 = vpack.c.bf16 %v10268_v43, %v10267_v42  ;;  %v1777_v44 = vpop.f32.mrb[51].mxu0 }
 0x6c8   : > { %v9594_v45 = vpack.c.bf16 %v1777_v44, %v1774_v53  ;;  %v10271_v46 = vpop.f32.mrb[52].mxu0 }
 0x6c9   : > { %9894 = vst [vmem:[#allocation2 + $0x98] sm:$0xff] %v9599_v21   ;;  %v1790_v54 = vpop.f32.mrb[53].mxu0 }
 0x6ca   : > { %9893 = vst [vmem:[#allocation2 + $0x90] sm:$0xff] %v9594_v45   ;;  %v10272_v47 = vpop.f32.mrb[54].mxu0 }
 0x6cb   : > { %v1793_v49 = vpop.f32.mrb[55].mxu0 }
 0x6cc   : > { %10358 = vmatmul.mubr.bf16.gmra.mrb[76].mxu1 %v1521_v40  ;;  %v9589_v40 = vpack.c.bf16 %v10264_v39, %v10263_v37  ;;  %v10275_v50 = vpop.f32.mrb[56].mxu0 }
 0x6cd   : > { %10361 = vmatprep.mubr.bf16.mxu1 %v1522_v41  ;;  %v9584_v41 = vpack.c.bf16 %v1761_v52, %v1758_v38  ;;  %v1806_v51 = vpop.f32.mrb[57].mxu0 }
 0x6ce   : > { %9892 = vst [vmem:[#allocation2 + $0x88] sm:$0xff] %v9589_v40   ;;  %v10276_v58 = vpop.f32.mrb[58].mxu0 }
 0x6cf   : > { %9891 = vst [vmem:[#allocation2 + $0x80] sm:$0xff] %v9584_v41   ;;  %v9619_v56 = vpack.c.bf16 %v10276_v58, %v10275_v50  ;;  %v1809_v59 = vpop.f32.mrb[59].mxu0 }
 0x6d0   : > { %v9614_v60 = vpack.c.bf16 %v1809_v59, %v1806_v51  ;;  %v10279_v62 = vpop.f32.mrb[60].mxu0 }
 0x6d1   : > { %9898 = vst [vmem:[#allocation2 + $0xb8] sm:$0xff] %v9619_v56   ;;  %v1822_v63 = vpop.f32.mrb[61].mxu0 }
 0x6d2   : > { %9897 = vst [vmem:[#allocation2 + $0xb0] sm:$0xff] %v9614_v60  }
 0x6d4   : > { %10362 = vmatmul.mubr.bf16.gmra.mrb[80].mxu1 %v1523_v48  ;;  %v9609_v48 = vpack.c.bf16 %v10272_v47, %v10271_v46 }
 0x6d5   : > { %10365 = vmatprep.mubr.bf16.mxu1 %v1524_v55  ;;  %v9604_v55 = vpack.c.bf16 %v1793_v49, %v1790_v54 }
 0x6d6   : > { %9896 = vst [vmem:[#allocation2 + $0xa8] sm:$0xff] %v9609_v48  }
 0x6d7   : > { %9895 = vst [vmem:[#allocation2 + $0xa0] sm:$0xff] %v9604_v55  }
 0x6dc   : > { %10366 = vmatmul.mubr.bf16.gmra.mrb[84].mxu1 %v1525_v0  ;;  %v10280_v0 = vpop.f32.mrb[62].mxu0 }
 0x6dd   : > { %10369 = vmatprep.mubr.bf16.mxu1 %v1526_v2  ;;  %v9629_v2 = vpack.c.bf16 %v10280_v0, %v10279_v62  ;;  %v1825_v57 = vpop.f32.mrb[63].mxu0 }
 0x6de   : > { %v9624_v5 = vpack.c.bf16 %v1825_v57, %v1822_v63  ;;  %v10283_v8 = vpop.f32.mrb[64].mxu0 }
 0x6df   : > { %9900 = vst [vmem:[#allocation2 + $0xc8] sm:$0xff] %v9629_v2   ;;  %v1838_v9 = vpop.f32.mrb[65].mxu0 }
 0x6e0   : > { %9899 = vst [vmem:[#allocation2 + $0xc0] sm:$0xff] %v9624_v5   ;;  %v10284_v10 = vpop.f32.mrb[66].mxu0 }
 0x6e1   : > { %v1841_v33 = vpop.f32.mrb[67].mxu0 }
 0x6e2   : > { %v9634_v31 = vpack.c.bf16 %v1841_v33, %v1838_v9 }
 0x6e4   : > { %10370 = vmatmul.mubr.bf16.gmra.mrb[88].mxu1 %v1527_v11  ;;  %v9639_v11 = vpack.c.bf16 %v10284_v10, %v10283_v8  ;;  %9901 = vst [vmem:[#allocation2 + $0xd0] sm:$0xff] %v9634_v31  }
 0x6e5   : > { %10373 = vmatprep.mubr.bf16.mxu1 %v1528_v13 }
 0x6e6   : > { %9902 = vst [vmem:[#allocation2 + $0xd8] sm:$0xff] %v9639_v11  }
 0x6ec   : > { %10374 = vmatmul.mubr.bf16.gmra.mrb[92].mxu1 %v1529_v24 }
 0x6ed   : > { %10377 = vmatprep.mubr.bf16.mxu1 %v1530_v26 }
 0x6f4   : > { %10378 = vmatmul.mubr.bf16.gmra.mrb[96].mxu1 %v1531_v35 }
 0x717   : > { %v1297_v1 = vpop.f32.mrb[20].mxu1 }
 0x718   : > { %v1298_v3 = vadd.f32 %v1297_v1, %v1261_v61  ;;  %v10211_v4 = vpop.f32.mrb[21].mxu1 }
 0x719   : > { %v1300_v6 = vpop.f32.mrb[22].mxu1 }
 0x71a   : > { %1304 = vst [vmem:[#allocation3 + $0x1] sm:$0x1] %v1298_v3  ;;  %v10212_v7 = vpop.f32.mrb[23].mxu1 }
 0x71b   : > { %v10287_v12 = vpop.f32.mrb[68].mxu0 }
 0x71c   : > { %v1854_v13 = vpop.f32.mrb[69].mxu0 }
 0x71d   : > { %v10288_v14 = vpop.f32.mrb[70].mxu0 }
 0x71e   : > { %v9649_v15 = vpack.c.bf16 %v10288_v14, %v10287_v12  ;;  %v1857_v16 = vpop.f32.mrb[71].mxu0 }
 0x71f   : > { %v9644_v17 = vpack.c.bf16 %v1857_v16, %v1854_v13 }
 0x720   : > { %9904 = vst [vmem:[#allocation2 + $0xe8] sm:$0xff] %v9649_v15  }
 0x721   : > { %9903 = vst [vmem:[#allocation2 + $0xe0] sm:$0xff] %v9644_v17  }
 0x726   : > { %v10291_v18 = vpop.f32.mrb[72].mxu0 }
 0x727   : > { %v1870_v19 = vpop.f32.mrb[73].mxu0 }
 0x728   : > { %v10292_v20 = vpop.f32.mrb[74].mxu0 }
 0x729   : > { %v9659_v22 = vpack.c.bf16 %v10292_v20, %v10291_v18  ;;  %v1873_v23 = vpop.f32.mrb[75].mxu0 }
 0x72a   : > { %v9654_v24 = vpack.c.bf16 %v1873_v23, %v1870_v19 }
 0x72b   : > { %9906 = vst [vmem:[#allocation2 + $0xf8] sm:$0xff] %v9659_v22  }
 0x72c   : > { %9905 = vst [vmem:[#allocation2 + $0xf0] sm:$0xff] %v9654_v24  }
 0x72e   : > { %v10295_v25 = vpop.f32.mrb[76].mxu0 }
 0x72f   : > { %v1886_v26 = vpop.f32.mrb[77].mxu0 }
 0x730   : > { %v10296_v27 = vpop.f32.mrb[78].mxu0 }
 0x731   : > { %v9669_v29 = vpack.c.bf16 %v10296_v27, %v10295_v25  ;;  %v1889_v30 = vpop.f32.mrb[79].mxu0 }
 0x732   : > { %v9664_v34 = vpack.c.bf16 %v1889_v30, %v1886_v26 }
 0x733   : > { %9908 = vst [vmem:[#allocation2 + $0x108] sm:$0xff] %v9669_v29  }
 0x734   : > { %9907 = vst [vmem:[#allocation2 + $0x100] sm:$0xff] %v9664_v34  }
 0x736   : > { %v10299_v39 = vpop.f32.mrb[80].mxu0 }
 0x737   : > { %v10307_v28 = vpop.f32.mrb[24].mxu1  ;;  %v1902_v40 = vpop.f32.mrb[81].mxu0 }
 0x738   : > { %v1934_v32 = vpop.f32.mrb[25].mxu1  ;;  %v10300_v52 = vpop.f32.mrb[82].mxu0 }
 0x739   : > { %v10308_v35 = vpop.f32.mrb[26].mxu1  ;;  %v9679_v42 = vpack.c.bf16 %v10300_v52, %v10299_v39  ;;  %v1905_v53 = vpop.f32.mrb[83].mxu0 }
 0x73a   : > { %v9699_v36 = vpack.c.bf16 %v10308_v35, %v10307_v28  ;;  %v1937_v37 = vpop.f32.mrb[27].mxu1  ;;  %v9674_v21 = vpack.c.bf16 %v1905_v53, %v1902_v40 }
 0x73b   : > { %v9694_v38 = vpack.c.bf16 %v1937_v37, %v1934_v32  ;;  %9910 = vst [vmem:[#allocation2 + $0x118] sm:$0xff] %v9679_v42  }
 0x73c   : > { %9914 = vst [vmem:[#allocation2 + $0x138] sm:$0xff] %v9699_v36   ;;  %9909 = vst [vmem:[#allocation2 + $0x110] sm:$0xff] %v9674_v21  }
 0x73d   : > { %9913 = vst [vmem:[#allocation2 + $0x130] sm:$0xff] %v9694_v38  }
 0x73e   : > { %v10303_v47 = vpop.f32.mrb[84].mxu0 }
 0x73f   : > { %v10311_v41 = vpop.f32.mrb[28].mxu1  ;;  %v1918_v48 = vpop.f32.mrb[85].mxu0 }
 0x740   : > { %v1950_v43 = vpop.f32.mrb[29].mxu1  ;;  %v10304_v49 = vpop.f32.mrb[86].mxu0 }
 0x741   : > { %v10312_v44 = vpop.f32.mrb[30].mxu1  ;;  %v9689_v50 = vpack.c.bf16 %v10304_v49, %v10303_v47  ;;  %v1921_v51 = vpop.f32.mrb[87].mxu0 }
 0x742   : > { %v9709_v45 = vpack.c.bf16 %v10312_v44, %v10311_v41  ;;  %v1953_v46 = vpop.f32.mrb[31].mxu1  ;;  %v9684_v56 = vpack.c.bf16 %v1921_v51, %v1918_v48 }
 0x743   : > { %v9704_v54 = vpack.c.bf16 %v1953_v46, %v1950_v43  ;;  %9912 = vst [vmem:[#allocation2 + $0x128] sm:$0xff] %v9689_v50  }
 0x744   : > { %9916 = vst [vmem:[#allocation2 + $0x148] sm:$0xff] %v9709_v45   ;;  %9911 = vst [vmem:[#allocation2 + $0x120] sm:$0xff] %v9684_v56  }
 0x745   : > { %9915 = vst [vmem:[#allocation2 + $0x140] sm:$0xff] %v9704_v54  }
 0x747   : > { %v10315_v55 = vpop.f32.mrb[32].mxu1 }
 0x748   : > { %v1966_v58 = vpop.f32.mrb[33].mxu1 }
 0x749   : > { %v10316_v59 = vpop.f32.mrb[34].mxu1 }
 0x74a   : > { %v9719_v60 = vpack.c.bf16 %v10316_v59, %v10315_v55  ;;  %v1969_v61 = vpop.f32.mrb[35].mxu1 }
 0x74b   : > { %v9714_v62 = vpack.c.bf16 %v1969_v61, %v1966_v58 }
 0x74c   : > { %9918 = vst [vmem:[#allocation2 + $0x158] sm:$0xff] %v9719_v60  }
 0x74d   : > { %9917 = vst [vmem:[#allocation2 + $0x150] sm:$0xff] %v9714_v62  }
 0x74f   : > { %v10319_v63 = vpop.f32.mrb[36].mxu1 }
 0x750   : > { %v1982_v0 = vpop.f32.mrb[37].mxu1 }
 0x751   : > { %v10320_v1 = vpop.f32.mrb[38].mxu1 }
 0x752   : > { %v9729_v2 = vpack.c.bf16 %v10320_v1, %v10319_v63  ;;  %v1985_v57 = vpop.f32.mrb[39].mxu1 }
 0x753   : > { %v9724_v3 = vpack.c.bf16 %v1985_v57, %v1982_v0 }
 0x754   : > { %9920 = vst [vmem:[#allocation2 + $0x168] sm:$0xff] %v9729_v2  }
 0x755   : > { %9919 = vst [vmem:[#allocation2 + $0x160] sm:$0xff] %v9724_v3  }
 0x757   : > { %v10323_v4 = vpop.f32.mrb[40].mxu1 }
 0x758   : > { %v1998_v5 = vpop.f32.mrb[41].mxu1 }
 0x759   : > { %v10324_v6 = vpop.f32.mrb[42].mxu1 }
 0x75a   : > { %v9739_v7 = vpack.c.bf16 %v10324_v6, %v10323_v4  ;;  %v2001_v8 = vpop.f32.mrb[43].mxu1 }
 0x75b   : > { %v9734_v9 = vpack.c.bf16 %v2001_v8, %v1998_v5 }
 0x75c   : > { %9922 = vst [vmem:[#allocation2 + $0x178] sm:$0xff] %v9739_v7  }
 0x75d   : > { %9921 = vst [vmem:[#allocation2 + $0x170] sm:$0xff] %v9734_v9  }
 0x75f   : > { %v10327_v10 = vpop.f32.mrb[44].mxu1 }
 0x760   : > { %v2014_v11 = vpop.f32.mrb[45].mxu1 }
 0x761   : > { %v10328_v33 = vpop.f32.mrb[46].mxu1 }
 0x762   : > { %v9749_v31 = vpack.c.bf16 %v10328_v33, %v10327_v10  ;;  %v2017_v12 = vpop.f32.mrb[47].mxu1 }
 0x763   : > { %v9744_v13 = vpack.c.bf16 %v2017_v12, %v2014_v11 }
 0x764   : > { %9924 = vst [vmem:[#allocation2 + $0x188] sm:$0xff] %v9749_v31  }
 0x765   : > { %9923 = vst [vmem:[#allocation2 + $0x180] sm:$0xff] %v9744_v13  }
 0x767   : > { %v10331_v14 = vpop.f32.mrb[48].mxu1 }
 0x768   : > { %v2030_v15 = vpop.f32.mrb[49].mxu1 }
 0x769   : > { %v10332_v16 = vpop.f32.mrb[50].mxu1 }
 0x76a   : > { %v9759_v17 = vpack.c.bf16 %v10332_v16, %v10331_v14  ;;  %v2033_v18 = vpop.f32.mrb[51].mxu1 }
 0x76b   : > { %v9754_v19 = vpack.c.bf16 %v2033_v18, %v2030_v15 }
 0x76c   : > { %9926 = vst [vmem:[#allocation2 + $0x198] sm:$0xff] %v9759_v17  }
 0x76d   : > { %9925 = vst [vmem:[#allocation2 + $0x190] sm:$0xff] %v9754_v19  }
 0x76f   : > { %v10335_v20 = vpop.f32.mrb[52].mxu1 }
 0x770   : > { %v2046_v22 = vpop.f32.mrb[53].mxu1 }
 0x771   : > { %v10336_v23 = vpop.f32.mrb[54].mxu1 }
 0x772   : > { %v9769_v24 = vpack.c.bf16 %v10336_v23, %v10335_v20  ;;  %v2049_v25 = vpop.f32.mrb[55].mxu1 }
 0x773   : > { %v9764_v26 = vpack.c.bf16 %v2049_v25, %v2046_v22 }
 0x774   : > { %9928 = vst [vmem:[#allocation2 + $0x1a8] sm:$0xff] %v9769_v24  }
 0x775   : > { %9927 = vst [vmem:[#allocation2 + $0x1a0] sm:$0xff] %v9764_v26  }
 0x777   : > { %v10339_v27 = vpop.f32.mrb[56].mxu1 }
 0x778   : > { %v2062_v28 = vpop.f32.mrb[57].mxu1 }
 0x779   : > { %v10340_v29 = vpop.f32.mrb[58].mxu1 }
 0x77a   : > { %v9779_v30 = vpack.c.bf16 %v10340_v29, %v10339_v27  ;;  %v2065_v32 = vpop.f32.mrb[59].mxu1 }
 0x77b   : > { %v9774_v34 = vpack.c.bf16 %v2065_v32, %v2062_v28 }
 0x77c   : > { %9930 = vst [vmem:[#allocation2 + $0x1b8] sm:$0xff] %v9779_v30  }
 0x77d   : > { %9929 = vst [vmem:[#allocation2 + $0x1b0] sm:$0xff] %v9774_v34  }
 0x77f   : > { %v10343_v35 = vpop.f32.mrb[60].mxu1 }
 0x780   : > { %v2078_v36 = vpop.f32.mrb[61].mxu1 }
 0x781   : > { %v10344_v37 = vpop.f32.mrb[62].mxu1 }
 0x782   : > { %v9789_v38 = vpack.c.bf16 %v10344_v37, %v10343_v35  ;;  %v2081_v39 = vpop.f32.mrb[63].mxu1 }
 0x783   : > { %v9784_v40 = vpack.c.bf16 %v2081_v39, %v2078_v36 }
 0x784   : > { %9932 = vst [vmem:[#allocation2 + $0x1c8] sm:$0xff] %v9789_v38  }
 0x785   : > { %9931 = vst [vmem:[#allocation2 + $0x1c0] sm:$0xff] %v9784_v40  }
 0x787   : > { %v10347_v52 = vpop.f32.mrb[64].mxu1 }
 0x788   : > { %v2094_v41 = vpop.f32.mrb[65].mxu1 }
 0x789   : > { %v10348_v42 = vpop.f32.mrb[66].mxu1 }
 0x78a   : > { %v9799_v53 = vpack.c.bf16 %v10348_v42, %v10347_v52  ;;  %v2097_v43 = vpop.f32.mrb[67].mxu1 }
 0x78b   : > { %v9794_v21 = vpack.c.bf16 %v2097_v43, %v2094_v41 }
 0x78c   : > { %9934 = vst [vmem:[#allocation2 + $0x1d8] sm:$0xff] %v9799_v53  }
 0x78d   : > { %9933 = vst [vmem:[#allocation2 + $0x1d0] sm:$0xff] %v9794_v21  }
 0x78f   : > { %v10351_v44 = vpop.f32.mrb[68].mxu1 }
 0x790   : > { %v2110_v45 = vpop.f32.mrb[69].mxu1 }
 0x791   : > { %v10352_v46 = vpop.f32.mrb[70].mxu1 }
 0x792   : > { %v9809_v54 = vpack.c.bf16 %v10352_v46, %v10351_v44  ;;  %v2113_v47 = vpop.f32.mrb[71].mxu1 }
 0x793   : > { %v9804_v48 = vpack.c.bf16 %v2113_v47, %v2110_v45 }
 0x794   : > { %9936 = vst [vmem:[#allocation2 + $0x1e8] sm:$0xff] %v9809_v54  }
 0x795   : > { %9935 = vst [vmem:[#allocation2 + $0x1e0] sm:$0xff] %v9804_v48  }
 0x797   : > { %v10355_v49 = vpop.f32.mrb[72].mxu1 }
 0x798   : > { %v2126_v55 = vpop.f32.mrb[73].mxu1 }
 0x799   : > { %v10356_v50 = vpop.f32.mrb[74].mxu1 }
 0x79a   : > { %v9819_v51 = vpack.c.bf16 %v10356_v50, %v10355_v49  ;;  %v2129_v58 = vpop.f32.mrb[75].mxu1 }
 0x79b   : > { %v9814_v56 = vpack.c.bf16 %v2129_v58, %v2126_v55 }
 0x79c   : > { %9938 = vst [vmem:[#allocation2 + $0x1f8] sm:$0xff] %v9819_v51  }
 0x79d   : > { %9937 = vst [vmem:[#allocation2 + $0x1f0] sm:$0xff] %v9814_v56  }
 0x79f   : > { %v10359_v59 = vpop.f32.mrb[76].mxu1 }
 0x7a0   : > { %v2142_v60 = vpop.f32.mrb[77].mxu1 }
 0x7a1   : > { %v10360_v61 = vpop.f32.mrb[78].mxu1 }
 0x7a2   : > { %v9829_v62 = vpack.c.bf16 %v10360_v61, %v10359_v59  ;;  %v2145_v63 = vpop.f32.mrb[79].mxu1 }
 0x7a3   : > { %v9824_v0 = vpack.c.bf16 %v2145_v63, %v2142_v60 }
 0x7a4   : > { %9940 = vst [vmem:[#allocation2 + $0x208] sm:$0xff] %v9829_v62  }
 0x7a5   : > { %9939 = vst [vmem:[#allocation2 + $0x200] sm:$0xff] %v9824_v0  }
 0x7a7   : > { %v10363_v1 = vpop.f32.mrb[80].mxu1 }
 0x7a8   : > { %v2158_v2 = vpop.f32.mrb[81].mxu1 }
 0x7a9   : > { %v10364_v57 = vpop.f32.mrb[82].mxu1 }
 0x7aa   : > { %v9839_v3 = vpack.c.bf16 %v10364_v57, %v10363_v1  ;;  %v2161_v4 = vpop.f32.mrb[83].mxu1 }
 0x7ab   : > { %v9834_v5 = vpack.c.bf16 %v2161_v4, %v2158_v2 }
 0x7ac   : > { %9942 = vst [vmem:[#allocation2 + $0x218] sm:$0xff] %v9839_v3  }
 0x7ad   : > { %9941 = vst [vmem:[#allocation2 + $0x210] sm:$0xff] %v9834_v5  }
 0x7af   : > { %v10367_v6 = vpop.f32.mrb[84].mxu1 }
 0x7b0   : > { %v2174_v7 = vpop.f32.mrb[85].mxu1 }
 0x7b1   : > { %v10368_v8 = vpop.f32.mrb[86].mxu1 }
 0x7b2   : > { %v9849_v9 = vpack.c.bf16 %v10368_v8, %v10367_v6  ;;  %v2177_v10 = vpop.f32.mrb[87].mxu1 }
 0x7b3   : > { %v9844_v11 = vpack.c.bf16 %v2177_v10, %v2174_v7 }
 0x7b4   : > { %9944 = vst [vmem:[#allocation2 + $0x228] sm:$0xff] %v9849_v9  }
 0x7b5   : > { %9943 = vst [vmem:[#allocation2 + $0x220] sm:$0xff] %v9844_v11  }
 0x7b7   : > { %v10371_v33 = vpop.f32.mrb[88].mxu1 }
 0x7b8   : > { %v2190_v31 = vpop.f32.mrb[89].mxu1 }
 0x7b9   : > { %v10372_v12 = vpop.f32.mrb[90].mxu1 }
 0x7ba   : > { %v9859_v13 = vpack.c.bf16 %v10372_v12, %v10371_v33  ;;  %v2193_v14 = vpop.f32.mrb[91].mxu1 }
 0x7bb   : > { %v9854_v15 = vpack.c.bf16 %v2193_v14, %v2190_v31 }
 0x7bc   : > { %9946 = vst [vmem:[#allocation2 + $0x238] sm:$0xff] %v9859_v13  }
 0x7bd   : > { %9945 = vst [vmem:[#allocation2 + $0x230] sm:$0xff] %v9854_v15  }
 0x7bf   : > { %v10375_v16 = vpop.f32.mrb[92].mxu1 }
 0x7c0   : > { %v2206_v17 = vpop.f32.mrb[93].mxu1 }
 0x7c1   : > { %v10376_v18 = vpop.f32.mrb[94].mxu1 }
 0x7c2   : > { %v9869_v19 = vpack.c.bf16 %v10376_v18, %v10375_v16  ;;  %v2209_v20 = vpop.f32.mrb[95].mxu1 }
 0x7c3   : > { %v9864_v22 = vpack.c.bf16 %v2209_v20, %v2206_v17 }
 0x7c4   : > { %9948 = vst [vmem:[#allocation2 + $0x248] sm:$0xff] %v9869_v19  }
 0x7c5   : > { %9947 = vst [vmem:[#allocation2 + $0x240] sm:$0xff] %v9864_v22  }
 0x7c7   : > { %v10379_v23 = vpop.f32.mrb[96].mxu1 }
 0x7c8   : > { %v9496_v24 = vpack.c.bf16 %v10379_v23, %v10379_v23  ;;  %v2222_v25 = vpop.f32.mrb[97].mxu1 }
 0x7c9   : > { %v10380_v26 = vpop.f32.mrb[98].mxu1 }
 0x7ca   : > { %2991 = vst [vmem:[#allocation2 + $0x258] sm:$0x7] %v9496_v24  ;;  %v2225_v27 = vpop.f32.mrb[99].mxu1 }
 0x7cb   : > { %v9874_v28 = vpack.c.bf16 %v2225_v27, %v2222_v25 }
 0x7cd   : > { %9949 = vst [vmem:[#allocation2 + $0x250] sm:$0xff] %v9874_v28  }
 0x7ce PF: > { %v11192_v29 = vld [vmem:[#allocation2] sm:$0xff]   ;;  %v13807_v30 = vmov 0   ;;  %v11194_v34 = vld [vmem:[#allocation2 + $0x8] sm:$0xff]   ;;  %v11196_v36 = vld [vmem:[#allocation2 + $0x10] sm:$0xff]   ;;  %vm5780_vm8 = vcmask 1042432   ;;  %vm5683_vm9 = vcmask 441344  }
 0x7cf   : > { %5784 = vmatprep.subr.bf16.mxu1 %v13807_v30  ;;  %6362 = vmatprep.subr.bf16.mxu0 %v13807_v30  ;;  %v11193_v32 = vld [vmem:[#allocation2 + $0x100] sm:$0xff]   ;;  %v11195_v35 = vld [vmem:[#allocation2 + $0x108] sm:$0xff]   ;;  %v11197_v37 = vld [vmem:[#allocation2 + $0x110] sm:$0xff]   ;;  %s13886_s9 = sld [smem:[#allocation37_spill]]  ;;  %vm7358_vm10 = vcmask 1040384  }
 0x7d0   : > { %5785 = vmatpush1.bf16.msra.mxu1 %v11192_v29  ;;  %6363 = vmatpush1.bf16.msra.mxu0 %v11193_v32  ;;  %v11198_v38 = vld [vmem:[#allocation2 + $0x18] sm:$0xff]   ;;  %v11200_v40 = vld [vmem:[#allocation2 + $0x20] sm:$0xff]   ;;  %v11202_v41 = vld [vmem:[#allocation2 + $0x28] sm:$0xff]  }
 0x7d1   : > { %5786 = vmatprep.subr.bf16.mxu1 %v13807_v30  ;;  %6364 = vmatprep.subr.bf16.mxu0 %v13807_v30  ;;  %v11199_v39 = vld [vmem:[#allocation2 + $0x118] sm:$0xff]   ;;  %v11201_v52 = vld [vmem:[#allocation2 + $0x120] sm:$0xff]   ;;  %v11203_v42 = vld [vmem:[#allocation2 + $0x128] sm:$0xff]  }
 0x7d2   : > { %v11204_v53 = vld [vmem:[#allocation2 + $0x30] sm:$0xff]   ;;  %v11206_v21 = vld [vmem:[#allocation2 + $0x38] sm:$0xff]   ;;  %v11208_v45 = vld [vmem:[#allocation2 + $0x40] sm:$0xff]  }
 0x7d3   : > { %v11205_v43 = vld [vmem:[#allocation2 + $0x130] sm:$0xff]   ;;  %v11207_v44 = vld [vmem:[#allocation2 + $0x138] sm:$0xff]   ;;  %v11209_v46 = vld [vmem:[#allocation2 + $0x140] sm:$0xff]  }
 0x7d4   : > { %5787 = vmatpush1.bf16.msra.mxu1 %v11194_v34  ;;  %6365 = vmatpush1.bf16.msra.mxu0 %v11195_v35  ;;  %v12221_v54 = vld [vmem:[%s11767_s25] sm:$0xff]  ;;  %v12224_v47 = vld [vmem:[%s11767_s25 + $0x14] sm:$0xff]  ;;  %v12227_v48 = vld [vmem:[%s11767_s25 + $0x8] sm:$0xff] }
 0x7d5   : > { %5788 = vmatprep.subr.bf16.mxu1 %v13807_v30  ;;  %6366 = vmatprep.subr.bf16.mxu0 %v13807_v30  ;;  %v3184_v49 = vunpack.c.l.s8.bf16 %v12221_v54  ;;  %v13805_v55 = vunpack.c.h.s8.bf16 %v12221_v54  ;;  %v3189_v50 = vunpack.c.l.s8.bf16 %v12224_v47  ;;  %v13806_v51 = vunpack.c.h.s8.bf16 %v12224_v47  ;;  %v12234_v58 = vld [vmem:[%s11767_s25 + $0x1c] sm:$0xff]  ;;  %v11210_v56 = vld [vmem:[#allocation2 + $0x48] sm:$0xff]   ;;  %v11212_v3 = vld [vmem:[#allocation2 + $0x50] sm:$0xff]  }
 0x7d6   : > { %v3186_v59 = vunpack.c.l.s8.bf16 %v12227_v48  ;;  %v3187_v60 = vunpack.c.h.s8.bf16 %v12227_v48  ;;  %v3191_v61 = vunpack.c.l.s8.bf16 %v12234_v58  ;;  %v3192_v62 = vunpack.c.h.s8.bf16 %v12234_v58  ;;  %v11211_v63 = vld [vmem:[#allocation2 + $0x148] sm:$0xff]   ;;  %v11213_v4 = vld [vmem:[#allocation2 + $0x150] sm:$0xff]   ;;  %v11214_v5 = vld [vmem:[#allocation2 + $0x58] sm:$0xff]  }
 0x7d7   : > { %v8885_v0 = vcombine.high %v3184_v49, %v3189_v50  ;;  %v12249_v1 = vcombine.low %v13805_v55, %v13806_v51  ;;  %v11215_v6 = vld [vmem:[#allocation2 + $0x158] sm:$0xff]   ;;  %v11216_v7 = vld [vmem:[#allocation2 + $0x60] sm:$0xff]   ;;  %v11218_v9 = vld [vmem:[#allocation2 + $0x68] sm:$0xff]   ;;  %v8884_v23 = vcombine.low %v3184_v49, %v3189_v50 }
 0x7d8   : > { %5789 = vmatpush1.bf16.msra.mxu1 %v11196_v36  ;;  %6367 = vmatpush1.bf16.msra.mxu0 %v11197_v37  ;;  %v8889_v2 = vcombine.high %v3186_v59, %v3191_v61  ;;  %v12252_v57 = vcombine.low %v3187_v60, %v3192_v62  ;;  %v11217_v8 = vld [vmem:[#allocation2 + $0x160] sm:$0xff]   ;;  %v11219_v10 = vld [vmem:[#allocation2 + $0x168] sm:$0xff]   ;;  %v11220_v11 = vld [vmem:[#allocation2 + $0x70] sm:$0xff]   ;;  %v12268_v16 = vcombine.high %v3187_v60, %v3192_v62 }
 0x7d9   : > { %5790 = vmatprep.subr.bf16.mxu1 %v13807_v30  ;;  %6368 = vmatprep.subr.bf16.mxu0 %v13807_v30  ;;  %v11221_v33 = vld [vmem:[#allocation2 + $0x170] sm:$0xff]   ;;  %v2998_v31 = vld [vmem:[%s11767_s25 + $0x28] sm:$0xff]  ;;  %v3001_v12 = vld [vmem:[%s11767_s25 + $0x3c] sm:$0xff]  ;;  %v8888_v25 = vcombine.low %v3186_v59, %v3191_v61 }
 0x7da   : > { %5816 = vmatprep.mubr.bf16.mxu1 %v8885_v0  ;;  %6394 = vmatprep.mubr.bf16.mxu0 %v8889_v2  ;;  %v2999_v13 = vld [vmem:[%s11767_s25 + $0x30] sm:$0xff]  ;;  %v3002_v14 = vld [vmem:[%s11767_s25 + $0x44] sm:$0xff]  ;;  %v11222_v15 = vld [vmem:[#allocation2 + $0x78] sm:$0xff]   ;;  %v3194_v18 = vunpack.c.l.s8.bf16 %v2998_v31  ;;  %v3199_v19 = vunpack.c.l.s8.bf16 %v3001_v12 }
 0x7db   : > { %v11223_v17 = vld [vmem:[#allocation2 + $0x178] sm:$0xff]   ;;  %v3196_v20 = vunpack.c.l.s8.bf16 %v2999_v13  ;;  %v3201_v22 = vunpack.c.l.s8.bf16 %v3002_v14  ;;  %v11224_v24 = vld [vmem:[#allocation2 + $0x80] sm:$0xff]   ;;  %v3004_v28 = vld [vmem:[%s11767_s25 + $0x50] sm:$0xff] }
 0x7dc   : > { %5791 = vmatpush1.bf16.msra.mxu1 %v11198_v38  ;;  %6369 = vmatpush1.bf16.msra.mxu0 %v11199_v39  ;;  %v11225_v26 = vld [vmem:[#allocation2 + $0x180] sm:$0xff]   ;;  %v8895_v27 = vcombine.high %v3194_v18, %v3199_v19  ;;  %v12281_v34 = vld [vmem:[%s11767_s25 + $0x58] sm:$0xff]  ;;  %v12284_v35 = vld [vmem:[%s11767_s25 + $0x6c] sm:$0xff]  ;;  %v3204_v36 = vunpack.c.l.s8.bf16 %v3004_v28 }
 0x7dd   : > { %5792 = vmatprep.subr.bf16.mxu1 %v13807_v30  ;;  %6370 = vmatprep.subr.bf16.mxu0 %v13807_v30  ;;  %v3007_v29 = vld [vmem:[%s11767_s25 + $0x64] sm:$0xff]  ;;  %v8899_v32 = vcombine.high %v3196_v20, %v3201_v22  ;;  %v3013_v48 = vld [vmem:[%s11767_s25 + $0x8c] sm:$0xff]  ;;  %v12300_v58 = vld [vmem:[%s11767_s25 + $0x94] sm:$0xff]  ;;  %v3207_v62 = vunpack.c.h.s8.bf16 %v12281_v34 }
 0x7de   : > { %v3209_v37 = vunpack.c.l.s8.bf16 %v3007_v29  ;;  %v11227_v38 = vld [vmem:[#allocation2 + $0x88] sm:$0xff]   ;;  %v12297_v50 = vld [vmem:[%s11767_s25 + $0x80] sm:$0xff]  ;;  %v3219_v61 = vunpack.c.l.s8.bf16 %v3013_v48  ;;  %v3221_v2 = vunpack.c.l.s8.bf16 %v12300_v58  ;;  %v11234_v29 = vld [vmem:[#allocation2 + $0x1b0] sm:$0xff]  }
 0x7df   : > { %v11226_v39 = vld [vmem:[#allocation2 + $0x188] sm:$0xff]   ;;  %v3216_v0 = vunpack.c.l.s8.bf16 %v12297_v50  ;;  %v12320_v12 = vld [vmem:[%s11767_s25 + $0xbc] sm:$0xff] }
 0x7e0   : > { %5793 = vmatpush1.bf16.msra.mxu1 %v11200_v40  ;;  %6371 = vmatpush1.bf16.msra.mxu0 %v11201_v52  ;;  %v3206_v40 = vunpack.c.l.s8.bf16 %v12281_v34  ;;  %v3211_v52 = vunpack.c.l.s8.bf16 %v12284_v35  ;;  %v12317_v31 = vld [vmem:[%s11767_s25 + $0xa8] sm:$0xff]  ;;  %v12338_v28 = vld [vmem:[%s11767_s25 + $0xdc] sm:$0xff] }
 0x7e1   : > { %5794 = vmatprep.subr.bf16.mxu1 %v13807_v30  ;;  %6372 = vmatprep.subr.bf16.mxu0 %v13807_v30  ;;  %v12529_v55 = vld [vmem:[%s11767_s25 + $0x280] sm:$0xff] }
 0x7e2   : > { %v12541_v51 = vld [vmem:[%s11767_s25 + $0x2bc] sm:$0xff] }
 0x7e4   : > { %5795 = vmatpush1.bf16.msra.mxu1 %v11202_v41  ;;  %6373 = vmatpush1.bf16.msra.mxu0 %v11203_v42  ;;  %v8894_v41 = vcombine.low %v3194_v18, %v3199_v19  ;;  %v3197_v42 = vunpack.c.h.s8.bf16 %v2999_v13  ;;  %v11236_v13 = vld [vmem:[#allocation2 + $0xa0] sm:$0xff]   ;;  %v11232_v18 = vld [vmem:[#allocation2 + $0x1a8] sm:$0xff]  }
 0x7e5   : > { %5796 = vmatprep.subr.bf16.mxu1 %v13807_v30  ;;  %6374 = vmatprep.subr.bf16.mxu0 %v13807_v30  ;;  %v11239_v19 = vld [vmem:[#allocation2 + $0xa8] sm:$0xff]  }
 0x7e8   : > { %5797 = vmatpush1.bf16.msra.mxu1 %v11204_v53  ;;  %6375 = vmatpush1.bf16.msra.mxu0 %v11205_v43  ;;  %v3202_v53 = vunpack.c.h.s8.bf16 %v3002_v14  ;;  %v8898_v43 = vcombine.low %v3196_v20, %v3201_v22  ;;  %v3217_v20 = vunpack.c.h.s8.bf16 %v12297_v50  ;;  %v3222_v22 = vunpack.c.h.s8.bf16 %v12300_v58 }
 0x7e9   : > { %5798 = vmatprep.subr.bf16.mxu1 %v13807_v30  ;;  %6376 = vmatprep.subr.bf16.mxu0 %v13807_v30 }
 0x7ea   : > { %v12293_v49 = vcombine.high %v3197_v42, %v3202_v53  ;;  %v12302_v59 = vcombine.low %v3197_v42, %v3202_v53  ;;  %v11245_v42 = vld [vmem:[#allocation2 + $0xb8] sm:$0xff]   ;;  %v3227_v53 = vunpack.c.h.s8.bf16 %v12317_v31 }
 0x7ec   : > { %5799 = vmatpush1.bf16.msra.mxu1 %v11206_v21  ;;  %6377 = vmatpush1.bf16.msra.mxu0 %v11207_v44  ;;  %v8905_v21 = vcombine.high %v3204_v36, %v3209_v37  ;;  %v11228_v44 = vld [vmem:[#allocation2 + $0x190] sm:$0xff]  }
 0x7ed   : > { %5800 = vmatprep.subr.bf16.mxu1 %v13807_v30  ;;  %6378 = vmatprep.subr.bf16.mxu0 %v13807_v30 }
 0x7f0   : > { %5801 = vmatpush1.bf16.msra.mxu1 %v11208_v45  ;;  %6379 = vmatpush1.bf16.msra.mxu0 %v11209_v46  ;;  %v8909_v45 = vcombine.high %v3206_v40, %v3211_v52  ;;  %v3010_v46 = vld [vmem:[%s11767_s25 + $0x78] sm:$0xff] }
 0x7f1   : > { %5802 = vmatprep.subr.bf16.mxu1 %v13807_v30  ;;  %6380 = vmatprep.subr.bf16.mxu0 %v13807_v30  ;;  %v3214_v60 = vunpack.c.l.s8.bf16 %v3010_v46 }
 0x7f4   : > { %5803 = vmatpush1.bf16.msra.mxu1 %v11210_v56  ;;  %6381 = vmatpush1.bf16.msra.mxu0 %v11211_v63  ;;  %v11230_v56 = vld [vmem:[#allocation2 + $0x90] sm:$0xff]   ;;  %v3212_v63 = vunpack.c.h.s8.bf16 %v12284_v35 }
 0x7f5   : > { %5804 = vmatprep.subr.bf16.mxu1 %v13807_v30  ;;  %6382 = vmatprep.subr.bf16.mxu0 %v13807_v30  ;;  %v12342_v35 = vld [vmem:[%s11767_s25 + $0xd0] sm:$0xff] }
 0x7f6   : > { %v12323_v14 = vcombine.low %v3207_v62, %v3212_v63 }
 0x7f8   : > { %5805 = vmatpush1.bf16.msra.mxu1 %v11212_v3  ;;  %6383 = vmatpush1.bf16.msra.mxu0 %v11213_v4  ;;  %v11229_v3 = vld [vmem:[#allocation2 + $0x198] sm:$0xff]  }
 0x7f9   : > { %5806 = vmatprep.subr.bf16.mxu1 %v13807_v30  ;;  %6384 = vmatprep.subr.bf16.mxu0 %v13807_v30  ;;  %v11233_v4 = vld [vmem:[#allocation2 + $0x98] sm:$0xff]  }
 0x7fc   : > { %5807 = vmatpush1.bf16.msra.mxu1 %v11214_v5  ;;  %6385 = vmatpush1.bf16.msra.mxu0 %v11215_v6  ;;  %v8904_v5 = vcombine.low %v3204_v36, %v3209_v37  ;;  %v12310_v6 = vld [vmem:[%s11767_s25 + $0xa0] sm:$0xff]  ;;  %v11242_v37 = vld [vmem:[#allocation2 + $0xb0] sm:$0xff]  }
 0x7fd   : > { %5808 = vmatprep.subr.bf16.mxu1 %v13807_v30  ;;  %6386 = vmatprep.subr.bf16.mxu0 %v13807_v30  ;;  %v12345_v36 = vld [vmem:[%s11767_s25 + $0xe4] sm:$0xff] }
 0x800   : > { %5809 = vmatpush1.bf16.msra.mxu1 %v11216_v7  ;;  %6387 = vmatpush1.bf16.msra.mxu0 %v11217_v8  ;;  %v12313_v7 = vcombine.high %v3207_v62, %v3212_v63  ;;  %v8908_v8 = vcombine.low %v3206_v40, %v3211_v52  ;;  %v3239_v52 = vunpack.c.l.s8.bf16 %v12338_v28  ;;  %v12364_v62 = vld [vmem:[%s11767_s25 + $0xf8] sm:$0xff]  ;;  %v12367_v63 = vld [vmem:[%s11767_s25 + $0x10c] sm:$0xff] }
 0x801   : > { %5810 = vmatprep.subr.bf16.mxu1 %v13807_v30  ;;  %6388 = vmatprep.subr.bf16.mxu0 %v13807_v30  ;;  %v3247_v28 = vunpack.c.h.s8.bf16 %v12364_v62 }
 0x804   : > { %5811 = vmatpush1.bf16.msra.mxu1 %v11218_v9  ;;  %6389 = vmatpush1.bf16.msra.mxu0 %v11219_v10  ;;  %v8915_v9 = vcombine.high %v3214_v60, %v3219_v61  ;;  %v3019_v10 = vld [vmem:[%s11767_s25 + $0xb4] sm:$0xff] }
 0x805   : > { %5812 = vmatprep.subr.bf16.mxu1 %v13807_v30  ;;  %6390 = vmatprep.subr.bf16.mxu0 %v13807_v30 }
 0x808   : > { %5813 = vmatpush1.bf16.msra.mxu1 %v11220_v11  ;;  %6391 = vmatpush1.bf16.msra.mxu0 %v11221_v33  ;;  %v8919_v11 = vcombine.high %v3216_v0, %v3221_v2  ;;  %v11231_v33 = vld [vmem:[#allocation2 + $0x1a0] sm:$0xff]  }
 0x809   : > { %5814 = vmatprep.subr.bf16.mxu1 %v13807_v30  ;;  %6392 = vmatprep.subr.bf16.mxu0 %v13807_v30 }
 0x80c   : > { %5815 = vmatpush1.bf16.msra.mxu1 %v11222_v15  ;;  %6393 = vmatpush1.bf16.msra.mxu0 %v11223_v17  ;;  %v3224_v15 = vunpack.c.l.s8.bf16 %v12310_v6  ;;  %v3229_v17 = vunpack.c.l.s8.bf16 %v3019_v10  ;;  %v3242_v6 = vunpack.c.h.s8.bf16 %v12345_v36  ;;  %v11238_v10 = vld [vmem:[#allocation2 + $0x1c8] sm:$0xff]  }
 0x80d   : > { %6073 = vmatprep.subr.bf16.mxu1 %v13807_v30  ;;  %6651 = vmatprep.subr.bf16.mxu0 %v13807_v30 }
 0x80e   : > { %v8925_v34 = vcombine.high %v3224_v15, %v3229_v17  ;;  %v8924_v46 = vcombine.low %v3224_v15, %v3229_v17  ;;  %v3034_v17 = vld [vmem:[%s11767_s25 + $0x118] sm:$0xff] }
 0x80f   : > { %5817 = vmatmul.mubr.bf16.vlgmr.msra.gmra.mrb[0].mxu1 %v8884_v23  ;;  %6395 = vmatmul.mubr.bf16.vlgmr.msra.gmra.mrb[0].mxu0 %v8888_v25  ;;  %v3226_v23 = vunpack.c.l.s8.bf16 %v12317_v31  ;;  %v12332_v25 = vcombine.high %v3217_v20, %v3222_v22 }
 0x810   : > { %6074 = vmatpush1.bf16.msra.mxu1 %v11224_v24  ;;  %6652 = vmatpush1.bf16.msra.mxu0 %v11225_v26  ;;  %v3231_v24 = vunpack.c.l.s8.bf16 %v12320_v12  ;;  %v8914_v26 = vcombine.low %v3214_v60, %v3219_v61  ;;  %v3031_v60 = vld [vmem:[%s11767_s25 + $0x104] sm:$0xff] }
 0x811   : > { %5824 = vmatprep.mubr.bf16.mxu1 %v8895_v27  ;;  %6402 = vmatprep.mubr.bf16.mxu0 %v8899_v32  ;;  %v12335_v27 = vld [vmem:[%s11767_s25 + $0xc8] sm:$0xff]  ;;  %v8918_v32 = vcombine.low %v3216_v0, %v3221_v2  ;;  %v11237_v61 = vld [vmem:[#allocation2 + $0x1c0] sm:$0xff]  }
 0x812   : > { %6653 = vmatprep.subr.bf16.mxu0 %v13807_v30  ;;  %6075 = vmatprep.subr.bf16.mxu1 %v13807_v30  ;;  %v3234_v40 = vunpack.c.l.s8.bf16 %v12335_v27  ;;  %v8928_v48 = vcombine.low %v3226_v23, %v3231_v24  ;;  %v11248_v0 = vld [vmem:[#allocation2 + $0xc0] sm:$0xff]  }
 0x814   : > { %6076 = vmatpush1.bf16.msra.mxu1 %v11227_v38  ;;  %6654 = vmatpush1.bf16.msra.mxu0 %v11226_v39  ;;  %v8929_v38 = vcombine.high %v3226_v23, %v3231_v24  ;;  %v12348_v39 = vcombine.low %v3217_v20, %v3222_v22  ;;  %v8935_v50 = vcombine.high %v3234_v40, %v3239_v52  ;;  %v12384_v20 = vld [vmem:[%s11767_s25 + $0x120] sm:$0xff]  ;;  %v12387_v22 = vld [vmem:[%s11767_s25 + $0x134] sm:$0xff] }
 0x815   : > { %6077 = vmatprep.subr.bf16.mxu1 %v13807_v30  ;;  %6655 = vmatprep.subr.bf16.mxu0 %v13807_v30  ;;  %v8934_v31 = vcombine.low %v3234_v40, %v3239_v52  ;;  %v11252_v23 = vld [vmem:[#allocation2 + $0xd0] sm:$0xff]  }
 0x817   : > { %5825 = vmatmul.mubr.bf16.gmra.mrb[4].mxu1 %v8894_v41  ;;  %6403 = vmatmul.mubr.bf16.gmra.mrb[4].mxu0 %v8898_v43  ;;  %v11235_v41 = vld [vmem:[#allocation2 + $0x1b8] sm:$0xff]   ;;  %v3232_v43 = vunpack.c.h.s8.bf16 %v12320_v12 }
 0x818   : > { %5832 = vmatprep.mubr.bf16.mxu1 %v8905_v21  ;;  %6410 = vmatprep.mubr.bf16.mxu0 %v8909_v45  ;;  %v3236_v21 = vunpack.c.l.s8.bf16 %v12342_v35 }
 0x819   : > { %6656 = vmatpush1.bf16.msra.mxu0 %v11228_v44  ;;  %6078 = vmatpush1.bf16.msra.mxu1 %v11230_v56  ;;  %v3241_v44 = vunpack.c.l.s8.bf16 %v12345_v36  ;;  %v12358_v45 = vcombine.high %v3227_v53, %v3232_v43  ;;  %v3028_v56 = vld [vmem:[%s11767_s25 + $0xf0] sm:$0xff]  ;;  %v12370_v2 = vcombine.low %v3227_v53, %v3232_v43  ;;  %v11243_v53 = vld [vmem:[#allocation2 + $0x1e0] sm:$0xff]   ;;  %v12404_v43 = vld [vmem:[%s11767_s25 + $0x148] sm:$0xff] }
 0x81a   : > { %6657 = vmatprep.subr.bf16.mxu0 %v13807_v30  ;;  %6079 = vmatprep.subr.bf16.mxu1 %v13807_v30 }
 0x81b   : > { %v8939_v58 = vcombine.high %v3236_v21, %v3241_v44  ;;  %v8938_v12 = vcombine.low %v3236_v21, %v3241_v44  ;;  %v12407_v21 = vld [vmem:[%s11767_s25 + $0x15c] sm:$0xff] }
 0x81d   : > { %6658 = vmatpush1.bf16.msra.mxu0 %v11229_v3  ;;  %6080 = vmatpush1.bf16.msra.mxu1 %v11233_v4  ;;  %v3244_v3 = vunpack.c.l.s8.bf16 %v3028_v56  ;;  %v3249_v4 = vunpack.c.l.s8.bf16 %v3031_v60  ;;  %v3262_v56 = vunpack.c.h.s8.bf16 %v12387_v22  ;;  %v3266_v60 = vunpack.c.l.s8.bf16 %v12404_v43 }
 0x81e   : > { %6659 = vmatprep.subr.bf16.mxu0 %v13807_v30  ;;  %6081 = vmatprep.subr.bf16.mxu1 %v13807_v30 }
 0x81f   : > { %5833 = vmatmul.mubr.bf16.gmra.mrb[8].mxu1 %v8904_v5  ;;  %6411 = vmatmul.mubr.bf16.gmra.mrb[8].mxu0 %v8908_v8  ;;  %v3237_v5 = vunpack.c.h.s8.bf16 %v12342_v35  ;;  %v3246_v8 = vunpack.c.l.s8.bf16 %v12364_v62  ;;  %v11241_v35 = vld [vmem:[#allocation2 + $0x1d8] sm:$0xff]   ;;  %v11244_v62 = vld [vmem:[#allocation2 + $0x1e8] sm:$0xff]  }
 0x820   : > { %5840 = vmatprep.mubr.bf16.mxu1 %v8915_v9  ;;  %6418 = vmatprep.mubr.bf16.mxu0 %v8919_v11  ;;  %v3251_v9 = vunpack.c.l.s8.bf16 %v12367_v63  ;;  %v11250_v11 = vld [vmem:[#allocation2 + $0xc8] sm:$0xff]  }
 0x821   : > { %6660 = vmatpush1.bf16.msra.mxu0 %v11231_v33  ;;  %6082 = vmatpush1.bf16.msra.mxu1 %v11236_v13  ;;  %v12378_v33 = vcombine.high %v3237_v5, %v3242_v6  ;;  %v8945_v13 = vcombine.high %v3244_v3, %v3249_v4  ;;  %v12390_v24 = vcombine.low %v3237_v5, %v3242_v6  ;;  %v3046_v6 = vld [vmem:[%s11767_s25 + $0x168] sm:$0xff] }
 0x822   : > { %6661 = vmatprep.subr.bf16.mxu0 %v13807_v30  ;;  %6083 = vmatprep.subr.bf16.mxu1 %v13807_v30  ;;  %v8949_v15 = vcombine.high %v3246_v8, %v3251_v9 }
 0x825   : > { %6662 = vmatpush1.bf16.msra.mxu0 %v11232_v18  ;;  %6084 = vmatpush1.bf16.msra.mxu1 %v11239_v19  ;;  %v3037_v18 = vld [vmem:[%s11767_s25 + $0x12c] sm:$0xff] }
 0x826   : > { %6663 = vmatprep.subr.bf16.mxu0 %v13807_v30  ;;  %6085 = vmatprep.subr.bf16.mxu1 %v13807_v30  ;;  %v11240_v19 = vld [vmem:[#allocation2 + $0x1d0] sm:$0xff]   ;;  %v3259_v27 = vunpack.c.l.s8.bf16 %v3037_v18  ;;  %v11247_v18 = vld [vmem:[#allocation2 + $0x1f8] sm:$0xff]  }
 0x827   : > { %5841 = vmatmul.mubr.bf16.gmra.mrb[12].mxu1 %v8914_v26  ;;  %6419 = vmatmul.mubr.bf16.gmra.mrb[12].mxu0 %v8918_v32  ;;  %v3254_v26 = vunpack.c.l.s8.bf16 %v3034_v17  ;;  %v3256_v32 = vunpack.c.l.s8.bf16 %v12384_v20 }
 0x828   : > { %5848 = vmatprep.mubr.bf16.mxu1 %v8925_v34  ;;  %6426 = vmatprep.mubr.bf16.mxu0 %v8929_v38  ;;  %v3261_v34 = vunpack.c.l.s8.bf16 %v12387_v22  ;;  %v8948_v38 = vcombine.low %v3246_v8, %v3251_v9  ;;  %v3049_v8 = vld [vmem:[%s11767_s25 + $0x17c] sm:$0xff]  ;;  %v11246_v9 = vld [vmem:[#allocation2 + $0x1f0] sm:$0xff]  }
 0x829   : > { %6664 = vmatpush1.bf16.msra.mxu0 %v11234_v29  ;;  %6086 = vmatpush1.bf16.msra.mxu1 %v11242_v37  ;;  %v3252_v29 = vunpack.c.h.s8.bf16 %v12367_v63  ;;  %v8944_v37 = vcombine.low %v3244_v3, %v3249_v4  ;;  %v8955_v40 = vcombine.high %v3254_v26, %v3259_v27 }
 0x82a   : > { %6665 = vmatprep.subr.bf16.mxu0 %v13807_v30  ;;  %6087 = vmatprep.subr.bf16.mxu1 %v13807_v30  ;;  %v8959_v52 = vcombine.high %v3256_v32, %v3261_v34  ;;  %v8958_v3 = vcombine.low %v3256_v32, %v3261_v34 }
 0x82b   : > { %v12398_v36 = vcombine.high %v3247_v28, %v3252_v29  ;;  %v12410_v44 = vcombine.low %v3247_v28, %v3252_v29  ;;  %v12437_v28 = vld [vmem:[%s11767_s25 + $0x198] sm:$0xff]  ;;  %v12440_v29 = vld [vmem:[%s11767_s25 + $0x1ac] sm:$0xff] }
 0x82d   : > { %6666 = vmatpush1.bf16.msra.mxu0 %v11235_v41  ;;  %6088 = vmatpush1.bf16.msra.mxu1 %v11245_v42  ;;  %v3040_v41 = vld [vmem:[%s11767_s25 + $0x140] sm:$0xff]  ;;  %v3043_v42 = vld [vmem:[%s11767_s25 + $0x154] sm:$0xff] }
 0x82e   : > { %6667 = vmatprep.subr.bf16.mxu0 %v13807_v30  ;;  %6089 = vmatprep.subr.bf16.mxu1 %v13807_v30 }
 0x82f   : > { %5849 = vmatmul.mubr.bf16.gmra.mrb[16].mxu1 %v8924_v46  ;;  %6427 = vmatmul.mubr.bf16.gmra.mrb[16].mxu0 %v8928_v48  ;;  %v3264_v46 = vunpack.c.l.s8.bf16 %v3040_v41  ;;  %v3269_v48 = vunpack.c.l.s8.bf16 %v3043_v42 }
 0x830   : > { %5856 = vmatprep.mubr.bf16.mxu1 %v8935_v50  ;;  %6434 = vmatprep.mubr.bf16.mxu0 %v8939_v58  ;;  %v11254_v50 = vld [vmem:[#allocation2 + $0xd8] sm:$0xff]   ;;  %v3257_v58 = vunpack.c.h.s8.bf16 %v12384_v20 }
 0x831   : > { %6668 = vmatpush1.bf16.msra.mxu0 %v11237_v61  ;;  %6090 = vmatpush1.bf16.msra.mxu1 %v11248_v0  ;;  %v3271_v61 = vunpack.c.l.s8.bf16 %v12407_v21  ;;  %v8954_v0 = vcombine.low %v3254_v26, %v3259_v27  ;;  %v8965_v4 = vcombine.high %v3264_v46, %v3269_v48  ;;  %v3052_v26 = vld [vmem:[%s11767_s25 + $0x190] sm:$0xff]  ;;  %v3055_v27 = vld [vmem:[%s11767_s25 + $0x1a4] sm:$0xff] }
 0x832   : > { %6669 = vmatprep.subr.bf16.mxu0 %v13807_v30  ;;  %6091 = vmatprep.subr.bf16.mxu1 %v13807_v30  ;;  %v12417_v63 = vcombine.high %v3257_v58, %v3262_v56  ;;  %v3284_v32 = vunpack.c.l.s8.bf16 %v3052_v26  ;;  %v3289_v34 = vunpack.c.l.s8.bf16 %v3055_v27  ;;  %v12480_v26 = vld [vmem:[%s11767_s25 + $0x208] sm:$0xff]  ;;  %v12483_v27 = vld [vmem:[%s11767_s25 + $0x21c] sm:$0xff] }
 0x833   : > { %v8969_v5 = vcombine.high %v3266_v60, %v3271_v61  ;;  %v8968_v20 = vcombine.low %v3266_v60, %v3271_v61 }
 0x834   : > { %v8985_v41 = vcombine.high %v3284_v32, %v3289_v34 }
 0x835   : > { %6670 = vmatpush1.bf16.msra.mxu0 %v11238_v10  ;;  %6092 = vmatpush1.bf16.msra.mxu1 %v11250_v11  ;;  %v12423_v10 = vld [vmem:[%s11767_s25 + $0x170] sm:$0xff]  ;;  %v12426_v11 = vld [vmem:[%s11767_s25 + $0x184] sm:$0xff] }
 0x836   : > { %6671 = vmatprep.subr.bf16.mxu0 %v13807_v30  ;;  %6093 = vmatprep.subr.bf16.mxu1 %v13807_v30  ;;  %v3281_v17 = vunpack.c.l.s8.bf16 %v12426_v11 }
 0x837   : > { %5857 = vmatmul.mubr.bf16.gmra.mrb[20].mxu1 %v8934_v31  ;;  %6435 = vmatmul.mubr.bf16.gmra.mrb[20].mxu0 %v8938_v12  ;;  %v12429_v31 = vcombine.low %v3257_v58, %v3262_v56  ;;  %v3274_v12 = vunpack.c.l.s8.bf16 %v3046_v6  ;;  %v12466_v6 = vld [vmem:[%s11767_s25 + $0x1f4] sm:$0xff] }
 0x838   : > { %5864 = vmatprep.mubr.bf16.mxu1 %v8945_v13  ;;  %6442 = vmatprep.mubr.bf16.mxu0 %v8949_v15  ;;  %v3279_v13 = vunpack.c.l.s8.bf16 %v3049_v8  ;;  %v3276_v15 = vunpack.c.l.s8.bf16 %v12423_v10  ;;  %v12469_v8 = vld [vmem:[%s11767_s25 + $0x1e8] sm:$0xff] }
 0x839   : > { %6672 = vmatpush1.bf16.msra.mxu0 %v11240_v19  ;;  %6094 = vmatpush1.bf16.msra.mxu1 %v11252_v23  ;;  %v8964_v19 = vcombine.low %v3264_v46, %v3269_v48  ;;  %v12450_v46 = vld [vmem:[%s11767_s25 + $0x1cc] sm:$0xff]  ;;  %v12453_v48 = vld [vmem:[%s11767_s25 + $0x1c0] sm:$0xff] }
 0x83a   : > { %6673 = vmatprep.subr.bf16.mxu0 %v13807_v30  ;;  %6095 = vmatprep.subr.bf16.mxu1 %v13807_v30  ;;  %v8975_v22 = vcombine.high %v3274_v12, %v3279_v13  ;;  %v8979_v23 = vcombine.high %v3276_v15, %v3281_v17  ;;  %v3299_v56 = vunpack.c.l.s8.bf16 %v12450_v46  ;;  %v3296_v60 = vunpack.c.l.s8.bf16 %v12453_v48 }
 0x83d   : > { %6674 = vmatpush1.bf16.msra.mxu0 %v11241_v35  ;;  %6096 = vmatpush1.bf16.msra.mxu1 %v11254_v50  ;;  %v11255_v35 = vld [vmem:[#allocation2 + $0xe0] sm:$0xff]   ;;  %v12456_v50 = vld [vmem:[%s11767_s25 + $0x1d4] sm:$0xff] }
 0x83e   : > { %6675 = vmatprep.subr.bf16.mxu0 %v13807_v30  ;;  %6097 = vmatprep.subr.bf16.mxu1 %v13807_v30  ;;  %v3301_v61 = vunpack.c.l.s8.bf16 %v12456_v50 }
 0x83f   : > { %5865 = vmatmul.mubr.bf16.gmra.mrb[24].mxu1 %v8944_v37  ;;  %6443 = vmatmul.mubr.bf16.gmra.mrb[24].mxu0 %v8948_v38  ;;  %v3286_v37 = vunpack.c.l.s8.bf16 %v12437_v28  ;;  %v3291_v38 = vunpack.c.l.s8.bf16 %v12440_v29 }
 0x840   : > { %5872 = vmatprep.mubr.bf16.mxu1 %v8955_v40  ;;  %6450 = vmatprep.mubr.bf16.mxu0 %v8959_v52  ;;  %v8974_v40 = vcombine.low %v3274_v12, %v3279_v13  ;;  %v8978_v52 = vcombine.low %v3276_v15, %v3281_v17  ;;  %v3309_v13 = vunpack.c.l.s8.bf16 %v12466_v6  ;;  %v11257_v15 = vld [vmem:[#allocation2 + $0xe8] sm:$0xff]   ;;  %v3306_v17 = vunpack.c.l.s8.bf16 %v12469_v8 }
 0x841   : > { %6676 = vmatpush1.bf16.msra.mxu0 %v11243_v53  ;;  %6098 = vmatpush1.bf16.msra.mxu1 %v11255_v35  ;;  %v8989_v42 = vcombine.high %v3286_v37, %v3291_v38  ;;  %v12447_v53 = vld [vmem:[%s11767_s25 + $0x1b8] sm:$0xff]  ;;  %v3314_v35 = vunpack.c.l.s8.bf16 %v12480_v26 }
 0x842   : > { %6677 = vmatprep.subr.bf16.mxu0 %v13807_v30  ;;  %6099 = vmatprep.subr.bf16.mxu1 %v13807_v30  ;;  %v3294_v58 = vunpack.c.l.s8.bf16 %v12447_v53 }
 0x845   : > { %6678 = vmatpush1.bf16.msra.mxu0 %v11244_v62  ;;  %v8984_v62 = vcombine.low %v3284_v32, %v3289_v34  ;;  %6100 = vmatpush1.bf16.msra.mxu1 %v11257_v15  ;;  %v12486_v32 = vld [vmem:[%s11767_s25 + $0x210] sm:$0xff]  ;;  %v12489_v34 = vld [vmem:[%s11767_s25 + $0x224] sm:$0xff] }
 0x846   : > { %6679 = vmatprep.subr.bf16.mxu0 %v13807_v30  ;;  %6101 = vmatprep.subr.bf16.mxu1 %v13807_v30 }
 0x847   : > { %5873 = vmatmul.mubr.bf16.gmra.mrb[28].mxu1 %v8954_v0  ;;  %6451 = vmatmul.mubr.bf16.gmra.mrb[28].mxu0 %v8958_v3  ;;  %v8988_v0 = vcombine.low %v3286_v37, %v3291_v38  ;;  %v8995_v3 = vcombine.high %v3294_v58, %v3299_v56  ;;  %v3319_v37 = vunpack.c.l.s8.bf16 %v12483_v27  ;;  %v3316_v38 = vunpack.c.l.s8.bf16 %v12486_v32 }
 0x848   : > { %5880 = vmatprep.mubr.bf16.mxu1 %v8965_v4  ;;  %6458 = vmatprep.mubr.bf16.mxu0 %v8969_v5  ;;  %v8999_v4 = vcombine.high %v3296_v60, %v3301_v61  ;;  %v12463_v5 = vld [vmem:[%s11767_s25 + $0x1e0] sm:$0xff] }
 0x849   : > { %6680 = vmatpush1.bf16.msra.mxu0 %v11246_v9  ;;  %v12472_v9 = vld [vmem:[%s11767_s25 + $0x1fc] sm:$0xff]  ;;  %v3304_v12 = vunpack.c.l.s8.bf16 %v12463_v5  ;;  %v9014_v15 = vcombine.low %v3314_v35, %v3319_v37 }
 0x84a   : > { %6681 = vmatprep.subr.bf16.mxu0 %v13807_v30 }
 0x84d   : > { %6682 = vmatpush1.bf16.msra.mxu0 %v11247_v18  ;;  %v3311_v18 = vunpack.c.l.s8.bf16 %v12472_v9 }
 0x84e   : > { %6940 = vmatprep.subr.bf16.mxu0 %v13807_v30 }
 0x84f   : > { %5881 = vmatmul.mubr.bf16.gmra.mrb[32].mxu1 %v8964_v19  ;;  %6459 = vmatmul.mubr.bf16.gmra.mrb[32].mxu0 %v8968_v20  ;;  %v8994_v19 = vcombine.low %v3294_v58, %v3299_v56  ;;  %v8998_v20 = vcombine.low %v3296_v60, %v3301_v61  ;;  %v12496_v56 = vld [vmem:[%s11767_s25 + $0x230] sm:$0xff]  ;;  %v12499_v60 = vld [vmem:[%s11767_s25 + $0x244] sm:$0xff]  ;;  %v12502_v61 = vld [vmem:[%s11767_s25 + $0x238] sm:$0xff] }
 0x850   : > { %5888 = vmatprep.mubr.bf16.mxu1 %v8975_v22  ;;  %6466 = vmatprep.mubr.bf16.mxu0 %v8979_v23  ;;  %v9005_v22 = vcombine.high %v3304_v12, %v3309_v13  ;;  %v9009_v23 = vcombine.high %v3306_v17, %v3311_v18 }
 0x857   : > { %5889 = vmatmul.mubr.bf16.gmra.mrb[36].mxu1 %v8974_v40  ;;  %6467 = vmatmul.mubr.bf16.gmra.mrb[36].mxu0 %v8978_v52  ;;  %v3321_v40 = vunpack.c.l.s8.bf16 %v12489_v34  ;;  %v9004_v52 = vcombine.low %v3304_v12, %v3309_v13  ;;  %v3326_v12 = vunpack.c.l.s8.bf16 %v12502_v61 }
 0x858   : > { %5896 = vmatprep.mubr.bf16.mxu1 %v8985_v41  ;;  %6474 = vmatprep.mubr.bf16.mxu0 %v8989_v42  ;;  %v9008_v41 = vcombine.low %v3306_v17, %v3311_v18  ;;  %v9015_v42 = vcombine.high %v3314_v35, %v3319_v37 }
 0x859   : > { %v9019_v58 = vcombine.high %v3316_v38, %v3321_v40  ;;  %v9018_v17 = vcombine.low %v3316_v38, %v3321_v40 }
 0x85f   : > { %5897 = vmatmul.mubr.bf16.gmra.mrb[40].mxu1 %v8984_v62  ;;  %6475 = vmatmul.mubr.bf16.gmra.mrb[40].mxu0 %v8988_v0  ;;  %v12505_v62 = vld [vmem:[%s11767_s25 + $0x24c] sm:$0xff]  ;;  %v3324_v0 = vunpack.c.l.s8.bf16 %v12496_v56 }
 0x860   : > { %5904 = vmatprep.mubr.bf16.mxu1 %v8995_v3  ;;  %6482 = vmatprep.mubr.bf16.mxu0 %v8999_v4  ;;  %v3329_v3 = vunpack.c.l.s8.bf16 %v12499_v60  ;;  %v11259_v4 = vld [vmem:[#allocation2 + $0xf0] sm:$0xff]   ;;  %v3331_v13 = vunpack.c.l.s8.bf16 %v12505_v62 }
 0x861   : > { %6102 = vmatpush1.bf16.msra.mxu1 %v11259_v4 }
 0x862   : > { %6103 = vmatprep.subr.bf16.mxu1 %v13807_v30  ;;  %v9025_v18 = vcombine.high %v3324_v0, %v3329_v3 }
 0x867   : > { %5905 = vmatmul.mubr.bf16.gmra.mrb[44].mxu1 %v8994_v19  ;;  %6483 = vmatmul.mubr.bf16.gmra.mrb[44].mxu0 %v8998_v20  ;;  %v9029_v19 = vcombine.high %v3326_v12, %v3331_v13  ;;  %v12513_v20 = vld [vmem:[%s11767_s25 + $0x258] sm:$0xff] }
 0x868   : > { %5912 = vmatprep.mubr.bf16.mxu1 %v9005_v22  ;;  %6490 = vmatprep.mubr.bf16.mxu0 %v9009_v23  ;;  %v12516_v22 = vld [vmem:[%s11767_s25 + $0x26c] sm:$0xff]  ;;  %v12519_v23 = vld [vmem:[%s11767_s25 + $0x260] sm:$0xff]  ;;  %v3334_v35 = vunpack.c.l.s8.bf16 %v12513_v20 }
 0x869   : > { %v3339_v37 = vunpack.c.l.s8.bf16 %v12516_v22  ;;  %v3336_v38 = vunpack.c.l.s8.bf16 %v12519_v23 }
 0x86f   : > { %5913 = vmatmul.mubr.bf16.gmra.mrb[48].mxu1 %v9004_v52  ;;  %6491 = vmatmul.mubr.bf16.gmra.mrb[48].mxu0 %v9008_v41  ;;  %v12522_v52 = vld [vmem:[%s11767_s25 + $0x274] sm:$0xff]  ;;  %v9024_v41 = vcombine.low %v3324_v0, %v3329_v3  ;;  %v9034_v0 = vcombine.low %v3334_v35, %v3339_v37 }
 0x870   : > { %5920 = vmatprep.mubr.bf16.mxu1 %v9015_v42  ;;  %6498 = vmatprep.mubr.bf16.mxu0 %v9019_v58  ;;  %v3341_v40 = vunpack.c.l.s8.bf16 %v12522_v52  ;;  %v9028_v42 = vcombine.low %v3326_v12, %v3331_v13  ;;  %v9035_v58 = vcombine.high %v3334_v35, %v3339_v37  ;;  %v12538_v13 = vld [vmem:[%s11767_s25 + $0x2a8] sm:$0xff]  ;;  %v13844_v35 = vunpack.c.h.s8.bf16 %v12221_v54 }
 0x872   : > { %v9039_v4 = vcombine.high %v3336_v38, %v3341_v40  ;;  %v9038_v3 = vcombine.low %v3336_v38, %v3341_v40 }
 0x877   : > { %5921 = vmatmul.mubr.bf16.gmra.mrb[52].mxu1 %v9014_v15  ;;  %6499 = vmatmul.mubr.bf16.gmra.mrb[52].mxu0 %v9018_v17  ;;  %v12532_v15 = vld [vmem:[%s11767_s25 + $0x294] sm:$0xff]  ;;  %v3344_v17 = vunpack.c.l.s8.bf16 %v12529_v55 }
 0x878   : > { %5928 = vmatprep.mubr.bf16.mxu1 %v9025_v18  ;;  %6506 = vmatprep.mubr.bf16.mxu0 %v9029_v19  ;;  %v3349_v18 = vunpack.c.l.s8.bf16 %v12532_v15  ;;  %v11261_v19 = vld [vmem:[#allocation2 + $0xf8] sm:$0xff]  }
 0x879   : > { %6104 = vmatpush1.bf16.msra.mxu1 %v11261_v19  ;;  %v12553_v19 = vld [vmem:[%s11767_s25 + $0x2d0] sm:$0xff] }
 0x87a   : > { %10397 = vmatprep.subr.bf16.mxu1 %v13807_v30  ;;  %v9045_v12 = vcombine.high %v3344_v17, %v3349_v18  ;;  %v9044_v38 = vcombine.low %v3344_v17, %v3349_v18 }
 0x87f   : > { %5929 = vmatmul.mubr.bf16.gmra.mrb[56].mxu1 %v9024_v41  ;;  %6507 = vmatmul.mubr.bf16.gmra.mrb[56].mxu0 %v9028_v42  ;;  %v3354_v41 = vunpack.c.l.s8.bf16 %v12538_v13  ;;  %v3359_v42 = vunpack.c.l.s8.bf16 %v12541_v51 }
 0x880   : > { %5936 = vmatprep.mubr.bf16.mxu1 %v9035_v58  ;;  %6514 = vmatprep.mubr.bf16.mxu0 %v9039_v4  ;;  %v13843_v58 = vunpack.c.h.s8.bf16 %v12224_v47  ;;  %v11249_v4 = vld [vmem:[#allocation2 + $0x200] sm:$0xff]   ;;  %v3364_v47 = vunpack.c.l.s8.bf16 %v12553_v19 }
 0x881   : > { %v9055_v40 = vcombine.high %v3354_v41, %v3359_v42  ;;  %v9054_v17 = vcombine.low %v3354_v41, %v3359_v42  ;;  %v11256_v41 = vld [vmem:[#allocation2 + $0x218] sm:$0xff]  }
 0x882   : > { %v12549_v37 = vcombine.high %v13844_v35, %v13843_v58 }
 0x887   : > { %5937 = vmatmul.mubr.bf16.gmra.mrb[60].mxu1 %v9034_v0  ;;  %6515 = vmatmul.mubr.bf16.gmra.mrb[60].mxu0 %v9038_v3  ;;  %v12556_v0 = vld [vmem:[%s11767_s25 + $0x2e4] sm:$0xff]  ;;  %v12564_v3 = vld [vmem:[%s11767_s25 + $0x2f8] sm:$0xff] }
 0x888   : > { %5944 = vmatprep.mubr.bf16.mxu1 %v9045_v12  ;;  %6683 = vmatprep.mubr.bf16.mxu0 %v12268_v16  ;;  %v3369_v54 = vunpack.c.l.s8.bf16 %v12556_v0  ;;  %v11251_v16 = vld [vmem:[#allocation2 + $0x208] sm:$0xff]  }
 0x889   : > { %v12567_v12 = vld [vmem:[%s11767_s25 + $0x30c] sm:$0xff] }
 0x88a   : > { %v9065_v18 = vcombine.high %v3364_v47, %v3369_v54  ;;  %v3379_v58 = vunpack.c.l.s8.bf16 %v12567_v12  ;;  %v9064_v42 = vcombine.low %v3364_v47, %v3369_v54  ;;  %v11260_v47 = vld [vmem:[#allocation2 + $0x228] sm:$0xff]  }
 0x88f   : > { %5945 = vmatmul.mubr.bf16.gmra.mrb[64].mxu1 %v9044_v38  ;;  %6684 = vmatmul.mubr.bf16.vlgmr.msra.gmra.mrb[0].mxu0 %v12252_v57  ;;  %v11253_v57 = vld [vmem:[#allocation2 + $0x210] sm:$0xff]   ;;  %v12576_v38 = vld [vmem:[%s11767_s25 + $0x320] sm:$0xff] }
 0x890   : > { %5952 = vmatprep.mubr.bf16.mxu1 %v9055_v40  ;;  %6941 = vmatpush1.bf16.msra.mxu0 %v11249_v4  ;;  %v12579_v40 = vld [vmem:[%s11767_s25 + $0x334] sm:$0xff] }
 0x891   : > { %6691 = vmatprep.mubr.bf16.mxu0 %v12293_v49  ;;  %6942 = vmatprep.subr.bf16.mxu0 %v13807_v30  ;;  %v3374_v49 = vunpack.c.l.s8.bf16 %v12564_v3  ;;  %v3389_v4 = vunpack.c.l.s8.bf16 %v12579_v40 }
 0x893   : > { %v9075_v35 = vcombine.high %v3374_v49, %v3379_v58  ;;  %v9074_v54 = vcombine.low %v3374_v49, %v3379_v58  ;;  %v11263_v49 = vld [vmem:[#allocation2 + $0x238] sm:$0xff]  }
 0x894   : > { %6943 = vmatpush1.bf16.msra.mxu0 %v11251_v16 }
 0x895   : > { %6944 = vmatprep.subr.bf16.mxu0 %v13807_v30 }
 0x897   : > { %5953 = vmatmul.mubr.bf16.gmra.mrb[68].mxu1 %v9054_v17  ;;  %6692 = vmatmul.mubr.bf16.gmra.mrb[4].mxu0 %v12302_v59  ;;  %v11258_v59 = vld [vmem:[#allocation2 + $0x220] sm:$0xff]   ;;  %v12588_v17 = vld [vmem:[%s11767_s25 + $0x348] sm:$0xff] }
 0x898   : > { %5960 = vmatprep.mubr.bf16.mxu1 %v9065_v18  ;;  %6699 = vmatprep.mubr.bf16.mxu0 %v12313_v7  ;;  %v3384_v7 = vunpack.c.l.s8.bf16 %v12576_v38  ;;  %v12591_v18 = vld [vmem:[%s11767_s25 + $0x35c] sm:$0xff] }
 0x899   : > { %6945 = vmatpush1.bf16.msra.mxu0 %v11253_v57  ;;  %v3399_v57 = vunpack.c.l.s8.bf16 %v12591_v18 }
 0x89a   : > { %6946 = vmatprep.subr.bf16.mxu0 %v13807_v30  ;;  %v9085_v16 = vcombine.high %v3384_v7, %v3389_v4  ;;  %v9084_v58 = vcombine.low %v3384_v7, %v3389_v4  ;;  %v12611_v4 = vld [vmem:[%s11767_s25 + $0x398] sm:$0xff] }
 0x89d   : > { %6947 = vmatpush1.bf16.msra.mxu0 %v11256_v41 }
 0x89e   : > { %6948 = vmatprep.subr.bf16.mxu0 %v13807_v30 }
 0x89f   : > { %5961 = vmatmul.mubr.bf16.gmra.mrb[72].mxu1 %v9064_v42  ;;  %6700 = vmatmul.mubr.bf16.gmra.mrb[8].mxu0 %v12323_v14  ;;  %v11262_v14 = vld [vmem:[#allocation2 + $0x230] sm:$0xff]  }
 0x8a0   : > { %5968 = vmatprep.mubr.bf16.mxu1 %v9075_v35  ;;  %6707 = vmatprep.mubr.bf16.mxu0 %v12332_v25  ;;  %v3394_v25 = vunpack.c.l.s8.bf16 %v12588_v17  ;;  %v12600_v42 = vld [vmem:[%s11767_s25 + $0x370] sm:$0xff]  ;;  %v12603_v35 = vld [vmem:[%s11767_s25 + $0x384] sm:$0xff] }
 0x8a1   : > { %6949 = vmatpush1.bf16.msra.mxu0 %v11258_v59 }
 0x8a2   : > { %6950 = vmatprep.subr.bf16.mxu0 %v13807_v30  ;;  %v9095_v41 = vcombine.high %v3394_v25, %v3399_v57  ;;  %v9094_v59 = vcombine.low %v3394_v25, %v3399_v57  ;;  %v12622_v25 = vld [vmem:[%s11767_s25 + $0x3c0] sm:$0xff]  ;;  %v12625_v57 = vld [vmem:[%s11767_s25 + $0x3d4] sm:$0xff] }
 0x8a5   : > { %6951 = vmatpush1.bf16.msra.mxu0 %v11260_v47  ;;  %v12614_v47 = vld [vmem:[%s11767_s25 + $0x3ac] sm:$0xff] }
 0x8a6   : > { %6952 = vmatprep.subr.bf16.mxu0 %v13807_v30 }
 0x8a7   : > { %5969 = vmatmul.mubr.bf16.gmra.mrb[76].mxu1 %v9074_v54  ;;  %6708 = vmatmul.mubr.bf16.gmra.mrb[12].mxu0 %v12348_v39  ;;  %v3404_v39 = vunpack.c.l.s8.bf16 %v12600_v42  ;;  %v3419_v54 = vunpack.c.l.s8.bf16 %v12614_v47 }
 0x8a8   : > { %5976 = vmatprep.mubr.bf16.mxu1 %v9085_v16  ;;  %6715 = vmatprep.mubr.bf16.mxu0 %v12358_v45  ;;  %v3409_v45 = vunpack.c.l.s8.bf16 %v12603_v35  ;;  %v11264_v16 = vld [vmem:[#allocation2 + $0x240] sm:$0xff]  }
 0x8a9   : > { %6953 = vmatpush1.bf16.msra.mxu0 %v11262_v14 }
 0x8aa   : > { %6954 = vmatprep.subr.bf16.mxu0 %v13807_v30  ;;  %v9105_v7 = vcombine.high %v3404_v39, %v3409_v45 }
 0x8ad   : > { %6955 = vmatpush1.bf16.msra.mxu0 %v11263_v49  ;;  %v3429_v49 = vunpack.c.l.s8.bf16 %v12625_v57 }
 0x8ae   : > { %6956 = vmatprep.subr.bf16.mxu0 %v13807_v30 }
 0x8af   : > { %5977 = vmatmul.mubr.bf16.gmra.mrb[80].mxu1 %v9084_v58  ;;  %6716 = vmatmul.mubr.bf16.gmra.mrb[16].mxu0 %v12370_v2  ;;  %v3414_v2 = vunpack.c.l.s8.bf16 %v12611_v4  ;;  %v3272_v58 = vunpack.c.h.s8.bf16 %v12407_v21  ;;  %v3282_v21 = vunpack.c.h.s8.bf16 %v12426_v11  ;;  %v3287_v11 = vunpack.c.h.s8.bf16 %v12437_v28 }
 0x8b0   : > { %5984 = vmatprep.mubr.bf16.mxu1 %v9095_v41  ;;  %6723 = vmatprep.mubr.bf16.mxu0 %v12378_v33  ;;  %v9104_v33 = vcombine.low %v3404_v39, %v3409_v45 }
 0x8b1   : > { %6957 = vmatpush1.bf16.msra.mxu0 %v11264_v16  ;;  %v9115_v14 = vcombine.high %v3414_v2, %v3419_v54  ;;  %v9114_v41 = vcombine.low %v3414_v2, %v3419_v54 }
 0x8b2   : > { %6958 = vmatprep.subr.bf16.mxu0 %v13807_v30  ;;  %v12648_v30 = vld [vmem:[%s11767_s25 + $0x424] sm:$0xff] }
 0x8b7   : > { %5985 = vmatmul.mubr.bf16.gmra.mrb[84].mxu1 %v9094_v59  ;;  %6724 = vmatmul.mubr.bf16.gmra.mrb[20].mxu0 %v12390_v24  ;;  %v3424_v24 = vunpack.c.l.s8.bf16 %v12622_v25  ;;  %v12634_v59 = vld [vmem:[%s11767_s25 + $0x3e8] sm:$0xff] }
 0x8b8   : > { %5992 = vmatprep.mubr.bf16.mxu1 %v9105_v7  ;;  %6731 = vmatprep.mubr.bf16.mxu0 %v12398_v36  ;;  %v3267_v36 = vunpack.c.h.s8.bf16 %v12404_v43  ;;  %v12637_v7 = vld [vmem:[%s11767_s25 + $0x3fc] sm:$0xff]  ;;  %v3277_v43 = vunpack.c.h.s8.bf16 %v12423_v10  ;;  %v11265_v10 = vld [vmem:[#allocation2 + $0x248] sm:$0xff]  }
 0x8b9   : > { %v9125_v39 = vcombine.high %v3424_v24, %v3429_v49  ;;  %v9124_v2 = vcombine.low %v3424_v24, %v3429_v49  ;;  %v3292_v24 = vunpack.c.h.s8.bf16 %v12440_v29  ;;  %6959 = vmatpush1.bf16.msra.mxu0 %v11265_v10  ;;  %v12666_v10 = vld [vmem:[%s11767_s25 + $0x460] sm:$0xff] }
 0x8ba   : > { %v8971_v45 = vcombine.high %v3267_v36, %v3272_v58  ;;  %v8970_v54 = vcombine.low %v3267_v36, %v3272_v58  ;;  %v13845_v36 = vmov 0   ;;  %v8980_v58 = vcombine.low %v3277_v43, %v3282_v21 }
 0x8bb   : > { %6960 = vmatprep.subr.bf16.mxu0 %v13845_v36 }
 0x8bf   : > { %5993 = vmatmul.mubr.bf16.gmra.mrb[88].mxu1 %v9104_v33  ;;  %6732 = vmatmul.mubr.bf16.gmra.mrb[24].mxu0 %v12410_v44  ;;  %v3434_v44 = vunpack.c.l.s8.bf16 %v12634_v59  ;;  %v8981_v33 = vcombine.high %v3277_v43, %v3282_v21  ;;  %v8990_v21 = vcombine.low %v3287_v11, %v3292_v24 }
 0x8c0   : > { %6000 = vmatprep.mubr.bf16.mxu1 %v9115_v14  ;;  %6739 = vmatprep.mubr.bf16.mxu0 %v12417_v63  ;;  %v3439_v63 = vunpack.c.l.s8.bf16 %v12637_v7  ;;  %v12645_v14 = vld [vmem:[%s11767_s25 + $0x410] sm:$0xff] }
 0x8c2   : > { %v9135_v16 = vcombine.high %v3434_v44, %v3439_v63  ;;  %v9134_v49 = vcombine.low %v3434_v44, %v3439_v63  ;;  %v3297_v44 = vunpack.c.h.s8.bf16 %v12453_v48  ;;  %v3302_v63 = vunpack.c.h.s8.bf16 %v12456_v50 }
 0x8c3   : > { %v3307_v48 = vunpack.c.h.s8.bf16 %v12469_v8  ;;  %v3312_v50 = vunpack.c.h.s8.bf16 %v12472_v9  ;;  %v11266_v8 = vld [vmem:[#allocation2 + $0x250] sm:$0xff]   ;;  %v3317_v9 = vunpack.c.h.s8.bf16 %v12486_v32 }
 0x8c4   : > { %6961 = vmatpush1.bf16.msra.mxu0 %v11266_v8  ;;  %v12700_v8 = vld [vmem:[%s11767_s25 + $0x4ec] sm:$0xff] }
 0x8c5   : > { %6962 = vmatprep.subr.bf16.mxu0 %v13845_v36 }
 0x8c7   : > { %6001 = vmatmul.mubr.bf16.gmra.mrb[92].mxu1 %v9114_v41  ;;  %6740 = vmatmul.mubr.bf16.gmra.mrb[28].mxu0 %v12429_v31  ;;  %v3444_v31 = vunpack.c.l.s8.bf16 %v12645_v14  ;;  %v3449_v41 = vunpack.c.l.s8.bf16 %v12648_v30 }
 0x8c8   : > { %6008 = vmatprep.mubr.bf16.mxu1 %v9125_v39  ;;  %6747 = vmatprep.mubr.bf16.mxu0 %v8971_v45  ;;  %v8991_v45 = vcombine.high %v3287_v11, %v3292_v24  ;;  %v9011_v24 = vcombine.high %v3307_v48, %v3312_v50 }
 0x8c9   : > { %v9145_v39 = vcombine.high %v3444_v31, %v3449_v41  ;;  %v9144_v43 = vcombine.low %v3444_v31, %v3449_v41  ;;  %v9000_v41 = vcombine.low %v3297_v44, %v3302_v63 }
 0x8cf   : > { %6009 = vmatmul.mubr.bf16.gmra.mrb[96].mxu1 %v9124_v2  ;;  %6748 = vmatmul.mubr.bf16.gmra.mrb[32].mxu0 %v8970_v54  ;;  %v12656_v2 = vld [vmem:[%s11767_s25 + $0x438] sm:$0xff]  ;;  %v12659_v54 = vld [vmem:[%s11767_s25 + $0x44c] sm:$0xff] }
 0x8d0   : > { %6016 = vmatprep.mubr.bf16.mxu1 %v9135_v16  ;;  %6755 = vmatprep.mubr.bf16.mxu0 %v8981_v33  ;;  %13846 = vst [vmem:[#allocation16_spill] sm:$0xff] %v12659_v54  ;;  %v3454_v28 = vunpack.c.l.s8.bf16 %v12656_v2  ;;  %v3459_v29 = vunpack.c.l.s8.bf16 %v12659_v54  ;;  %v9001_v33 = vcombine.high %v3297_v44, %v3302_v63  ;;  %v12679_v54 = vld [vmem:[%s11767_s25 + $0x49c] sm:$0xff]  ;;  %v9010_v44 = vcombine.low %v3307_v48, %v3312_v50 }
 0x8d2   : > { %v9155_v16 = vcombine.high %v3454_v28, %v3459_v29  ;;  %v9154_v31 = vcombine.low %v3454_v28, %v3459_v29  ;;  %v3322_v28 = vunpack.c.h.s8.bf16 %v12489_v34 }
 0x8d4   : > { %v9020_v50 = vcombine.low %v3317_v9, %v3322_v28 }
 0x8d7   : > { %6017 = vmatmul.mubr.bf16.gmra.mrb[100].mxu1 %v9134_v49  ;;  %6756 = vmatmul.mubr.bf16.gmra.mrb[36].mxu0 %v8980_v58  ;;  %v12669_v49 = vld [vmem:[%s11767_s25 + $0x474] sm:$0xff]  ;;  %v3464_v58 = vunpack.c.l.s8.bf16 %v12666_v10 }
 0x8d8   : > { %6024 = vmatprep.mubr.bf16.mxu1 %v9145_v39  ;;  %6763 = vmatprep.mubr.bf16.mxu0 %v8991_v45  ;;  %v3469_v39 = vunpack.c.l.s8.bf16 %v12669_v49  ;;  %v12676_v45 = vld [vmem:[%s11767_s25 + $0x488] sm:$0xff] }
 0x8da   : > { %v9165_v11 = vcombine.high %v3464_v58, %v3469_v39  ;;  %v9164_v29 = vcombine.low %v3464_v58, %v3469_v39  ;;  %v3327_v58 = vunpack.c.h.s8.bf16 %v12502_v61  ;;  %v3332_v39 = vunpack.c.h.s8.bf16 %v12505_v62  ;;  %v11267_v61 = vld [vmem:[#allocation2 + $0x258] ss:$0 sps:$4 sm:$0x77]  }
 0x8db   : > { %v3337_v62 = vunpack.c.h.s8.bf16 %v12519_v23 }
 0x8df   : > { %6025 = vmatmul.mubr.bf16.gmra.mrb[104].mxu1 %v9144_v43  ;;  %6764 = vmatmul.mubr.bf16.gmra.mrb[40].mxu0 %v8990_v21  ;;  %v3474_v43 = vunpack.c.l.s8.bf16 %v12676_v45  ;;  %v3479_v21 = vunpack.c.l.s8.bf16 %v12679_v54 }
 0x8e0   : > { %6032 = vmatprep.mubr.bf16.mxu1 %v9155_v16  ;;  %6771 = vmatprep.mubr.bf16.mxu0 %v9001_v33  ;;  %v9021_v16 = vcombine.high %v3317_v9, %v3322_v28  ;;  %v12687_v33 = vld [vmem:[%s11767_s25 + $0x4b0] sm:$0xff]  ;;  %v9030_v28 = vcombine.low %v3327_v58, %v3332_v39 }
 0x8e1   : > { %v9175_v63 = vcombine.high %v3474_v43, %v3479_v21  ;;  %v3484_v32 = vunpack.c.l.s8.bf16 %v12687_v33  ;;  %v9174_v48 = vcombine.low %v3474_v43, %v3479_v21  ;;  %v3342_v43 = vunpack.c.h.s8.bf16 %v12522_v52 }
 0x8e2   : > { %v5782_v21 = vsel %vm5780_vm8, %v11267_v61, 0 }
 0x8e3   : > { %6963 = vmatpush1.bf16.msra.mxu0 %v5782_v21  ;;  %v11397_v21 = vld [vmem:[%s11767_s25 + $0x3c] sm:$0xff] }
 0x8e7   : > { %6033 = vmatmul.mubr.bf16.gmra.mrb[108].mxu1 %v9154_v31  ;;  %6772 = vmatmul.mubr.bf16.gmra.mrb[44].mxu0 %v9000_v41  ;;  %v12690_v31 = vld [vmem:[%s11767_s25 + $0x4c4] sm:$0xff] }
 0x8e8   : > { %6040 = vmatprep.mubr.bf16.mxu1 %v9165_v11  ;;  %6779 = vmatprep.mubr.bf16.mxu0 %v9011_v24  ;;  %v3489_v34 = vunpack.c.l.s8.bf16 %v12690_v31  ;;  %v9031_v11 = vcombine.high %v3327_v58, %v3332_v39  ;;  %v12697_v24 = vld [vmem:[%s11767_s25 + $0x4d8] sm:$0xff]  ;;  %v12715_v58 = vld [vmem:[%s11767_s25 + $0x2b0] sm:$0xff]  ;;  %v12718_v39 = vld [vmem:[%s11767_s25 + $0x2c4] sm:$0xff] }
 0x8e9   : > { %13847 = vst [vmem:[#allocation17_spill] sm:$0xff] %v12715_v58  ;;  %13848 = vst [vmem:[#allocation18_spill] sm:$0xff] %v12718_v39 }
 0x8ea   : > { %v9185_v41 = vcombine.high %v3484_v32, %v3489_v34  ;;  %v9184_v9 = vcombine.low %v3484_v32, %v3489_v34  ;;  %v9040_v34 = vcombine.low %v3337_v62, %v3342_v43 }
 0x8ef   : > { %6041 = vmatmul.mubr.bf16.gmra.mrb[112].mxu1 %v9164_v29  ;;  %6780 = vmatmul.mubr.bf16.gmra.mrb[48].mxu0 %v9010_v44  ;;  %v3494_v29 = vunpack.c.l.s8.bf16 %v12697_v24  ;;  %v3499_v44 = vunpack.c.l.s8.bf16 %v12700_v8 }
 0x8f0   : > { %6048 = vmatprep.mubr.bf16.mxu1 %v9175_v63  ;;  %6787 = vmatprep.mubr.bf16.mxu0 %v9021_v16  ;;  %v9041_v16 = vcombine.high %v3337_v62, %v3342_v43 }
 0x8f1   : > { %v9195_v63 = vcombine.high %v3494_v29, %v3499_v44  ;;  %v9194_v32 = vcombine.low %v3494_v29, %v3499_v44  ;;  %v3357_v29 = vunpack.c.h.s8.bf16 %v12715_v58  ;;  %v3362_v44 = vunpack.c.h.s8.bf16 %v12718_v39  ;;  %v12832_v58 = vld [vmem:[%s11767_s25 + $0x440] sm:$0xff] }
 0x8f7   : > { %6049 = vmatmul.mubr.bf16.gmra.mrb[116].mxu1 %v9174_v48  ;;  %6788 = vmatmul.mubr.bf16.gmra.mrb[52].mxu0 %v9020_v50  ;;  %v12707_v48 = vld [vmem:[%s11767_s25 + $0x288] sm:$0xff]  ;;  %v12710_v50 = vld [vmem:[%s11767_s25 + $0x29c] sm:$0xff] }
 0x8f8   : > { %6056 = vmatprep.mubr.bf16.mxu1 %v9185_v41  ;;  %6795 = vmatprep.mubr.bf16.mxu0 %v9031_v11  ;;  %v3347_v23 = vunpack.c.h.s8.bf16 %v12707_v48  ;;  %v3352_v52 = vunpack.c.h.s8.bf16 %v12710_v50  ;;  %v11396_v11 = vld [vmem:[%s11767_s25 + $0x28] sm:$0xff] }
 0x8f9   : > { %v3195_v61 = vunpack.c.h.s8.bf16 %v11396_v11 }
 0x8fa   : > { %v9051_v41 = vcombine.high %v3347_v23, %v3352_v52  ;;  %v9050_v62 = vcombine.low %v3347_v23, %v3352_v52 }
 0x8ff   : > { %6057 = vmatmul.mubr.bf16.gmra.mrb[120].mxu1 %v9184_v9  ;;  %6796 = vmatmul.mubr.bf16.gmra.mrb[56].mxu0 %v9030_v28  ;;  %v3200_v9 = vunpack.c.h.s8.bf16 %v11397_v21  ;;  %v9061_v28 = vcombine.high %v3357_v29, %v3362_v44  ;;  %v9060_v21 = vcombine.low %v3357_v29, %v3362_v44  ;;  %v11404_v44 = vld [vmem:[#allocation2 + $0x110] sm:$0xff]  }
 0x900   : > { %6064 = vmatprep.mubr.bf16.mxu1 %v9195_v63  ;;  %6803 = vmatprep.mubr.bf16.mxu0 %v9041_v16  ;;  %v12726_v63 = vld [vmem:[%s11767_s25 + $0x2d8] sm:$0xff]  ;;  %v12729_v16 = vld [vmem:[%s11767_s25 + $0x2ec] sm:$0xff] }
 0x901   : > { %v8897_v43 = vcombine.high %v3195_v61, %v3200_v9  ;;  %13849 = vst [vmem:[#allocation19_spill] sm:$0xff] %v12726_v63  ;;  %13850 = vst [vmem:[#allocation20_spill] sm:$0xff] %v12729_v16  ;;  %v3367_v23 = vunpack.c.h.s8.bf16 %v12726_v63  ;;  %v3372_v52 = vunpack.c.h.s8.bf16 %v12729_v16  ;;  %v11403_v16 = vld [vmem:[%s11767_s25 + $0x8c] sm:$0xff]  ;;  %v11405_v63 = vld [vmem:[#allocation2 + $0x118] sm:$0xff]  }
 0x903   : > { %v9071_v39 = vcombine.high %v3367_v23, %v3372_v52 }
 0x907   : > { %6065 = vmatmul.mubr.bf16.gmra.mrb[124].mxu1 %v9194_v32  ;;  %6804 = vmatmul.mubr.bf16.gmra.mrb[60].mxu0 %v9040_v34  ;;  %v11399_v32 = vld [vmem:[%s11767_s25 + $0x50] sm:$0xff] }
 0x908   : > { %6105 = vmatprep.mubr.bf16.mxu1 %v12549_v37  ;;  %6811 = vmatprep.mubr.bf16.mxu0 %v9051_v41  ;;  %v11398_v37 = vld [vmem:[#allocation2 + $0x100] sm:$0xff]   ;;  %v3205_v34 = vunpack.c.h.s8.bf16 %v11399_v32 }
 0x909   : > { %v11400_v41 = vld [vmem:[%s11767_s25 + $0x64] sm:$0xff] }
 0x90a   : > { %v3210_v11 = vunpack.c.h.s8.bf16 %v11400_v41  ;;  %v12739_v32 = vld [vmem:[%s11767_s25 + $0x300] sm:$0xff] }
 0x90b   : > { %13851 = vst [vmem:[#allocation21_spill] sm:$0xff] %v12739_v32 }
 0x90f   : > { %6106 = vmatmul.mubr.bf16.vlgmr.msra.gmra.mrb[0].mxu1 %v12249_v1  ;;  %6812 = vmatmul.mubr.bf16.gmra.mrb[64].mxu0 %v9050_v62  ;;  %v8896_v1 = vcombine.low %v3195_v61, %v3200_v9  ;;  %v8907_v62 = vcombine.high %v3205_v34, %v3210_v11  ;;  %v3220_v61 = vunpack.c.h.s8.bf16 %v11403_v16  ;;  %v3377_v9 = vunpack.c.h.s8.bf16 %v12739_v32  ;;  %v12753_v16 = vld [vmem:[%s11767_s25 + $0x33c] sm:$0xff]  ;;  %v11409_v32 = vld [vmem:[#allocation2 + $0x128] sm:$0xff]  }
 0x910   : > { %10413 = vmatpush1.bf16.msra.mxu1 %v11398_v37  ;;  %6113 = vmatprep.mubr.bf16.mxu1 %v8897_v43  ;;  %v11401_v37 = vld [vmem:[#allocation2 + $0x108] sm:$0xff]   ;;  %v12742_v43 = vld [vmem:[%s11767_s25 + $0x314] sm:$0xff]  ;;  %13854 = vst [vmem:[#allocation24_spill] sm:$0xff] %v12753_v16 }
 0x911   : > { %6819 = vmatprep.mubr.bf16.mxu0 %v9061_v28  ;;  %10398 = vmatprep.subr.bf16.mxu1 %v13845_v36  ;;  %13852 = vst [vmem:[#allocation22_spill] sm:$0xff] %v12742_v43  ;;  %v11402_v28 = vld [vmem:[%s11767_s25 + $0x78] sm:$0xff]  ;;  %v3382_v29 = vunpack.c.h.s8.bf16 %v12742_v43 }
 0x912   : > { %v3215_v41 = vunpack.c.h.s8.bf16 %v11402_v28  ;;  %v12750_v28 = vld [vmem:[%s11767_s25 + $0x328] sm:$0xff]  ;;  %v11407_v43 = vld [vmem:[%s11767_s25 + $0xb4] sm:$0xff] }
 0x913   : > { %13853 = vst [vmem:[#allocation23_spill] sm:$0xff] %v12750_v28 }
 0x914   : > { %10414 = vmatpush1.bf16.msra.mxu1 %v11401_v37  ;;  %v9081_v37 = vcombine.high %v3377_v9, %v3382_v29 }
 0x915   : > { %10399 = vmatprep.subr.bf16.mxu1 %v13845_v36 }
 0x917   : > { %6114 = vmatmul.mubr.bf16.gmra.mrb[4].mxu1 %v8896_v1  ;;  %6820 = vmatmul.mubr.bf16.gmra.mrb[68].mxu0 %v9060_v21  ;;  %v8906_v1 = vcombine.low %v3205_v34, %v3210_v11  ;;  %v9070_v21 = vcombine.low %v3367_v23, %v3372_v52  ;;  %v3230_v34 = vunpack.c.h.s8.bf16 %v11407_v43  ;;  %v3387_v11 = vunpack.c.h.s8.bf16 %v12750_v28  ;;  %v11408_v23 = vld [vmem:[#allocation2 + $0x120] sm:$0xff]   ;;  %v11413_v28 = vld [vmem:[#allocation2 + $0x138] sm:$0xff]  }
 0x918   : > { %6121 = vmatprep.mubr.bf16.mxu1 %v8907_v62  ;;  %6827 = vmatprep.mubr.bf16.mxu0 %v9071_v39  ;;  %v8917_v62 = vcombine.high %v3215_v41, %v3220_v61  ;;  %v11406_v39 = vld [vmem:[%s11767_s25 + $0xa0] sm:$0xff]  ;;  %v8916_v52 = vcombine.low %v3215_v41, %v3220_v61 }
 0x919   : > { %10415 = vmatpush1.bf16.msra.mxu1 %v11404_v44  ;;  %v3225_v44 = vunpack.c.h.s8.bf16 %v11406_v39  ;;  %v12762_v39 = vld [vmem:[%s11767_s25 + $0x350] sm:$0xff]  ;;  %v12765_v43 = vld [vmem:[%s11767_s25 + $0x364] sm:$0xff] }
 0x91a   : > { %10400 = vmatprep.subr.bf16.mxu1 %v13845_v36  ;;  %13855 = vst [vmem:[#allocation25_spill] sm:$0xff] %v12762_v39  ;;  %13856 = vst [vmem:[#allocation26_spill] sm:$0xff] %v12765_v43  ;;  %v3397_v61 = vunpack.c.h.s8.bf16 %v12762_v39  ;;  %v11417_v39 = vld [vmem:[#allocation2 + $0x148] sm:$0xff]  }
 0x91d   : > { %10416 = vmatpush1.bf16.msra.mxu1 %v11405_v63  ;;  %v3392_v63 = vunpack.c.h.s8.bf16 %v12753_v16  ;;  %v11411_v16 = vld [vmem:[%s11767_s25 + $0xdc] sm:$0xff] }
 0x91e   : > { %10401 = vmatprep.subr.bf16.mxu1 %v13845_v36  ;;  %v3240_v41 = vunpack.c.h.s8.bf16 %v11411_v16  ;;  %v12777_v16 = vld [vmem:[%s11767_s25 + $0x38c] sm:$0xff] }
 0x91f   : > { %6122 = vmatmul.mubr.bf16.gmra.mrb[8].mxu1 %v8906_v1  ;;  %6828 = vmatmul.mubr.bf16.gmra.mrb[72].mxu0 %v9070_v21  ;;  %v9080_v1 = vcombine.low %v3377_v9, %v3382_v29  ;;  %v8927_v21 = vcombine.high %v3225_v44, %v3230_v34  ;;  %v11412_v9 = vld [vmem:[#allocation2 + $0x130] sm:$0xff]   ;;  %v8926_v29 = vcombine.low %v3225_v44, %v3230_v34 }
 0x920   : > { %6129 = vmatprep.mubr.bf16.mxu1 %v8917_v62  ;;  %6835 = vmatprep.mubr.bf16.mxu0 %v9081_v37  ;;  %v9091_v62 = vcombine.high %v3387_v11, %v3392_v63  ;;  %v11410_v37 = vld [vmem:[%s11767_s25 + $0xc8] sm:$0xff]  ;;  %13858 = vst [vmem:[#allocation28_spill] sm:$0xff] %v12777_v16 }
 0x921   : > { %10417 = vmatpush1.bf16.msra.mxu1 %v11408_v23  ;;  %v3235_v23 = vunpack.c.h.s8.bf16 %v11410_v37  ;;  %v12774_v37 = vld [vmem:[%s11767_s25 + $0x378] sm:$0xff] }
 0x922   : > { %10402 = vmatprep.subr.bf16.mxu1 %v13845_v36  ;;  %13857 = vst [vmem:[#allocation27_spill] sm:$0xff] %v12774_v37  ;;  %v3407_v34 = vunpack.c.h.s8.bf16 %v12774_v37  ;;  %v11421_v37 = vld [vmem:[#allocation2 + $0x158] sm:$0xff]  }
 0x925   : > { %10418 = vmatpush1.bf16.msra.mxu1 %v11409_v32  ;;  %v3402_v32 = vunpack.c.h.s8.bf16 %v12765_v43  ;;  %v11415_v43 = vld [vmem:[%s11767_s25 + $0x104] sm:$0xff] }
 0x926   : > { %10403 = vmatprep.subr.bf16.mxu1 %v13845_v36  ;;  %v3250_v44 = vunpack.c.h.s8.bf16 %v11415_v43  ;;  %v12789_v43 = vld [vmem:[%s11767_s25 + $0x3b4] sm:$0xff] }
 0x927   : > { %6130 = vmatmul.mubr.bf16.gmra.mrb[12].mxu1 %v8916_v52  ;;  %6836 = vmatmul.mubr.bf16.gmra.mrb[76].mxu0 %v9080_v1  ;;  %v9090_v52 = vcombine.low %v3387_v11, %v3392_v63  ;;  %v8937_v1 = vcombine.high %v3235_v23, %v3240_v41  ;;  %v11416_v11 = vld [vmem:[#allocation2 + $0x140] sm:$0xff]   ;;  %v8936_v63 = vcombine.low %v3235_v23, %v3240_v41 }
 0x928   : > { %6137 = vmatprep.mubr.bf16.mxu1 %v8927_v21  ;;  %6843 = vmatprep.mubr.bf16.mxu0 %v9091_v62  ;;  %v9101_v21 = vcombine.high %v3397_v61, %v3402_v32  ;;  %v11414_v62 = vld [vmem:[%s11767_s25 + $0xf0] sm:$0xff]  ;;  %13860 = vst [vmem:[#allocation30_spill] sm:$0xff] %v12789_v43 }
 0x929   : > { %10419 = vmatpush1.bf16.msra.mxu1 %v11412_v9  ;;  %v3245_v9 = vunpack.c.h.s8.bf16 %v11414_v62  ;;  %v12786_v62 = vld [vmem:[%s11767_s25 + $0x3a0] sm:$0xff] }
 0x92a   : > { %10404 = vmatprep.subr.bf16.mxu1 %v13845_v36  ;;  %13859 = vst [vmem:[#allocation29_spill] sm:$0xff] %v12786_v62  ;;  %v3417_v41 = vunpack.c.h.s8.bf16 %v12786_v62  ;;  %v11425_v62 = vld [vmem:[#allocation2 + $0x168] sm:$0xff]  }
 0x92d   : > { %10420 = vmatpush1.bf16.msra.mxu1 %v11413_v28  ;;  %v3412_v28 = vunpack.c.h.s8.bf16 %v12777_v16  ;;  %v11419_v16 = vld [vmem:[%s11767_s25 + $0x12c] sm:$0xff] }
 0x92e   : > { %10405 = vmatprep.subr.bf16.mxu1 %v13845_v36  ;;  %v3260_v23 = vunpack.c.h.s8.bf16 %v11419_v16  ;;  %v12801_v16 = vld [vmem:[%s11767_s25 + $0x3dc] sm:$0xff] }
 0x92f   : > { %6138 = vmatmul.mubr.bf16.gmra.mrb[16].mxu1 %v8926_v29  ;;  %6844 = vmatmul.mubr.bf16.gmra.mrb[80].mxu0 %v9090_v52  ;;  %v9100_v29 = vcombine.low %v3397_v61, %v3402_v32  ;;  %v8947_v52 = vcombine.high %v3245_v9, %v3250_v44  ;;  %v11420_v61 = vld [vmem:[#allocation2 + $0x150] sm:$0xff]   ;;  %v8946_v32 = vcombine.low %v3245_v9, %v3250_v44 }
 0x930   : > { %6145 = vmatprep.mubr.bf16.mxu1 %v8937_v1  ;;  %6851 = vmatprep.mubr.bf16.mxu0 %v9101_v21  ;;  %v9111_v1 = vcombine.high %v3407_v34, %v3412_v28  ;;  %v11418_v21 = vld [vmem:[%s11767_s25 + $0x118] sm:$0xff]  ;;  %13862 = vst [vmem:[#allocation32_spill] sm:$0xff] %v12801_v16 }
 0x931   : > { %10421 = vmatpush1.bf16.msra.mxu1 %v11416_v11  ;;  %v3255_v11 = vunpack.c.h.s8.bf16 %v11418_v21  ;;  %v12798_v21 = vld [vmem:[%s11767_s25 + $0x3c8] sm:$0xff] }
 0x932   : > { %10406 = vmatprep.subr.bf16.mxu1 %v13845_v36  ;;  %13861 = vst [vmem:[#allocation31_spill] sm:$0xff] %v12798_v21  ;;  %v3427_v44 = vunpack.c.h.s8.bf16 %v12798_v21  ;;  %v11429_v21 = vld [vmem:[#allocation2 + $0x178] sm:$0xff]  }
 0x935   : > { %10422 = vmatpush1.bf16.msra.mxu1 %v11417_v39  ;;  %v3422_v39 = vunpack.c.h.s8.bf16 %v12789_v43  ;;  %v11423_v43 = vld [vmem:[%s11767_s25 + $0x154] sm:$0xff] }
 0x936   : > { %10407 = vmatprep.subr.bf16.mxu1 %v13845_v36  ;;  %v3270_v9 = vunpack.c.h.s8.bf16 %v11423_v43  ;;  %v12813_v43 = vld [vmem:[%s11767_s25 + $0x404] sm:$0xff] }
 0x937   : > { %6146 = vmatmul.mubr.bf16.gmra.mrb[20].mxu1 %v8936_v63  ;;  %6852 = vmatmul.mubr.bf16.gmra.mrb[84].mxu0 %v9100_v29  ;;  %v9110_v63 = vcombine.low %v3407_v34, %v3412_v28  ;;  %v8957_v29 = vcombine.high %v3255_v11, %v3260_v23  ;;  %v11424_v34 = vld [vmem:[#allocation2 + $0x160] sm:$0xff]   ;;  %v8956_v28 = vcombine.low %v3255_v11, %v3260_v23 }
 0x938   : > { %6153 = vmatprep.mubr.bf16.mxu1 %v8947_v52  ;;  %6859 = vmatprep.mubr.bf16.mxu0 %v9111_v1  ;;  %v9121_v52 = vcombine.high %v3417_v41, %v3422_v39  ;;  %v11422_v1 = vld [vmem:[%s11767_s25 + $0x140] sm:$0xff]  ;;  %13864 = vst [vmem:[#allocation34_spill] sm:$0xff] %v12813_v43 }
 0x939   : > { %10423 = vmatpush1.bf16.msra.mxu1 %v11420_v61  ;;  %v3265_v61 = vunpack.c.h.s8.bf16 %v11422_v1  ;;  %v12810_v1 = vld [vmem:[%s11767_s25 + $0x3f0] sm:$0xff] }
 0x93a   : > { %10408 = vmatprep.subr.bf16.mxu1 %v13845_v36  ;;  %13863 = vst [vmem:[#allocation33_spill] sm:$0xff] %v12810_v1  ;;  %v3437_v23 = vunpack.c.h.s8.bf16 %v12810_v1 }
 0x93d   : > { %10424 = vmatpush1.bf16.msra.mxu1 %v11421_v37  ;;  %v3432_v37 = vunpack.c.h.s8.bf16 %v12801_v16  ;;  %v11427_v16 = vld [vmem:[%s11767_s25 + $0x17c] sm:$0xff] }
 0x93e   : > { %10409 = vmatprep.subr.bf16.mxu1 %v13845_v36  ;;  %v3280_v11 = vunpack.c.h.s8.bf16 %v11427_v16  ;;  %v12825_v16 = vld [vmem:[%s11767_s25 + $0x42c] sm:$0xff] }
 0x93f   : > { %6154 = vmatmul.mubr.bf16.gmra.mrb[24].mxu1 %v8946_v32  ;;  %6860 = vmatmul.mubr.bf16.gmra.mrb[88].mxu0 %v9110_v63  ;;  %v9120_v32 = vcombine.low %v3417_v41, %v3422_v39  ;;  %v8967_v63 = vcombine.high %v3265_v61, %v3270_v9  ;;  %v11428_v41 = vld [vmem:[#allocation2 + $0x170] sm:$0xff]   ;;  %v8966_v39 = vcombine.low %v3265_v61, %v3270_v9  ;;  %v3452_v61 = vunpack.c.h.s8.bf16 %v12825_v16 }
 0x940   : > { %6161 = vmatprep.mubr.bf16.mxu1 %v8957_v29  ;;  %6867 = vmatprep.mubr.bf16.mxu0 %v9121_v52  ;;  %v9131_v29 = vcombine.high %v3427_v44, %v3432_v37  ;;  %v11426_v52 = vld [vmem:[%s11767_s25 + $0x168] sm:$0xff] }
 0x941   : > { %10425 = vmatpush1.bf16.msra.mxu1 %v11424_v34  ;;  %v3275_v34 = vunpack.c.h.s8.bf16 %v11426_v52  ;;  %v12822_v52 = vld [vmem:[%s11767_s25 + $0x418] sm:$0xff] }
 0x942   : > { %10410 = vmatprep.subr.bf16.mxu1 %v13845_v36 }
 0x943   : > { %v8976_v9 = vcombine.low %v3275_v34, %v3280_v11 }
 0x945   : > { %10426 = vmatpush1.bf16.msra.mxu1 %v11425_v62  ;;  %v3442_v62 = vunpack.c.h.s8.bf16 %v12813_v43 }
 0x946   : > { %10411 = vmatprep.subr.bf16.mxu1 %v13845_v36 }
 0x947   : > { %6162 = vmatmul.mubr.bf16.gmra.mrb[28].mxu1 %v8956_v28  ;;  %6868 = vmatmul.mubr.bf16.gmra.mrb[92].mxu0 %v9120_v32  ;;  %v9130_v28 = vcombine.low %v3427_v44, %v3432_v37  ;;  %v8977_v32 = vcombine.high %v3275_v34, %v3280_v11 }
 0x948   : > { %6169 = vmatprep.mubr.bf16.mxu1 %v8967_v63  ;;  %6875 = vmatprep.mubr.bf16.mxu0 %v9131_v29  ;;  %v9141_v63 = vcombine.high %v3437_v23, %v3442_v62  ;;  %v11430_v29 = vld [vmem:[%s11767_s25 + $0x190] sm:$0xff] }
 0x949   : > { %10427 = vmatpush1.bf16.msra.mxu1 %v11428_v41  ;;  %v3285_v43 = vunpack.c.h.s8.bf16 %v11430_v29  ;;  %v11431_v41 = vld [vmem:[%s11767_s25 + $0x1a4] sm:$0xff] }
 0x94a   : > { %10412 = vmatprep.subr.bf16.mxu1 %v13845_v36  ;;  %v3290_v1 = vunpack.c.h.s8.bf16 %v11431_v41  ;;  %v3447_v36 = vunpack.c.h.s8.bf16 %v12822_v52  ;;  %v12842_v41 = vld [vmem:[%s11767_s25 + $0x468] sm:$0xff] }
 0x94c   : > { %v8987_v44 = vcombine.high %v3285_v43, %v3290_v1  ;;  %v9151_v37 = vcombine.high %v3447_v36, %v3452_v61  ;;  %v8986_v11 = vcombine.low %v3285_v43, %v3290_v1 }
 0x94d   : > { %10428 = vmatpush1.bf16.msra.mxu1 %v11429_v21  ;;  %v9140_v21 = vcombine.low %v3437_v23, %v3442_v62  ;;  %v9150_v23 = vcombine.low %v3447_v36, %v3452_v61 }
 0x94f   : > { %6170 = vmatmul.mubr.bf16.gmra.mrb[32].mxu1 %v8966_v39  ;;  %6876 = vmatmul.mubr.bf16.gmra.mrb[96].mxu0 %v9130_v28  ;;  %v12835_v39 = vld [vmem:[%s11767_s25 + $0x454] sm:$0xff]  ;;  %v3295_v28 = vunpack.c.h.s8.bf16 %v12447_v53  ;;  %v3305_v53 = vunpack.c.h.s8.bf16 %v12463_v5  ;;  %v3315_v5 = vunpack.c.h.s8.bf16 %v12480_v26  ;;  %v3325_v26 = vunpack.c.h.s8.bf16 %v12496_v56 }
 0x950   : > { %6177 = vmatprep.mubr.bf16.mxu1 %v8977_v32  ;;  %6883 = vmatprep.mubr.bf16.mxu0 %v9141_v63  ;;  %v3300_v32 = vunpack.c.h.s8.bf16 %v12450_v46  ;;  %v3457_v63 = vunpack.c.h.s8.bf16 %v12832_v58  ;;  %v3462_v34 = vunpack.c.h.s8.bf16 %v12835_v39  ;;  %v3310_v46 = vunpack.c.h.s8.bf16 %v12466_v6 }
 0x951   : > { %v3320_v6 = vunpack.c.h.s8.bf16 %v12483_v27  ;;  %v3330_v27 = vunpack.c.h.s8.bf16 %v12499_v60  ;;  %v3340_v56 = vunpack.c.h.s8.bf16 %v12516_v22 }
 0x952   : > { %v8997_v62 = vcombine.high %v3295_v28, %v3300_v32  ;;  %v9161_v29 = vcombine.high %v3457_v63, %v3462_v34  ;;  %v8996_v43 = vcombine.low %v3295_v28, %v3300_v32  ;;  %v9160_v36 = vcombine.low %v3457_v63, %v3462_v34 }
 0x953   : > { %v9007_v61 = vcombine.high %v3305_v53, %v3310_v46  ;;  %v9006_v32 = vcombine.low %v3305_v53, %v3310_v46  ;;  %v9017_v34 = vcombine.high %v3315_v5, %v3320_v6  ;;  %v9016_v46 = vcombine.low %v3315_v5, %v3320_v6  ;;  %v2994_v6 = vld [vmem:[%s11767_s25 + $0x10] ss:$20 sps:$4 sm:$0xff]  }
 0x957   : > { %6178 = vmatmul.mubr.bf16.gmra.mrb[36].mxu1 %v8976_v9  ;;  %6884 = vmatmul.mubr.bf16.gmra.mrb[100].mxu0 %v9140_v21  ;;  %v12845_v9 = vld [vmem:[%s11767_s25 + $0x47c] sm:$0xff]  ;;  %v3467_v21 = vunpack.c.h.s8.bf16 %v12842_v41 }
 0x958   : > { %6185 = vmatprep.mubr.bf16.mxu1 %v8987_v44  ;;  %6891 = vmatprep.mubr.bf16.mxu0 %v9151_v37  ;;  %v3472_v1 = vunpack.c.h.s8.bf16 %v12845_v9  ;;  %v12852_v37 = vld [vmem:[%s11767_s25 + $0x490] sm:$0xff] }
 0x95a   : > { %v9171_v44 = vcombine.high %v3467_v21, %v3472_v1  ;;  %v9170_v63 = vcombine.low %v3467_v21, %v3472_v1  ;;  %v9027_v1 = vcombine.high %v3325_v26, %v3330_v27 }
 0x95f   : > { %6186 = vmatmul.mubr.bf16.gmra.mrb[40].mxu1 %v8986_v11  ;;  %6892 = vmatmul.mubr.bf16.gmra.mrb[104].mxu0 %v9150_v23  ;;  %v12855_v11 = vld [vmem:[%s11767_s25 + $0x4a4] sm:$0xff]  ;;  %v3477_v23 = vunpack.c.h.s8.bf16 %v12852_v37 }
 0x960   : > { %6193 = vmatprep.mubr.bf16.mxu1 %v8997_v62  ;;  %6899 = vmatprep.mubr.bf16.mxu0 %v9161_v29  ;;  %13865 = vst [vmem:[#allocation35_spill] sm:$0xff] %v12855_v11  ;;  %v3482_v28 = vunpack.c.h.s8.bf16 %v12855_v11  ;;  %v12862_v29 = vld [vmem:[%s11767_s25 + $0x4b8] sm:$0xff] }
 0x961   : > { %v3182_v11 = vld [vmem:[%s11767_s25 + $0x4f4] sm:$0xff] }
 0x962   : > { %v9181_v62 = vcombine.high %v3477_v23, %v3482_v28  ;;  %v9180_v21 = vcombine.low %v3477_v23, %v3482_v28  ;;  %v3345_v23 = vunpack.c.h.s8.bf16 %v12529_v55  ;;  %v3350_v28 = vunpack.c.h.s8.bf16 %v12532_v15 }
 0x967   : > { %6194 = vmatmul.mubr.bf16.gmra.mrb[44].mxu1 %v8996_v43  ;;  %6900 = vmatmul.mubr.bf16.gmra.mrb[108].mxu0 %v9160_v36  ;;  %v12865_v43 = vld [vmem:[%s11767_s25 + $0x4cc] sm:$0xff]  ;;  %v3487_v36 = vunpack.c.h.s8.bf16 %v12862_v29 }
 0x968   : > { %6201 = vmatprep.mubr.bf16.mxu1 %v9007_v61  ;;  %6907 = vmatprep.mubr.bf16.mxu0 %v9171_v44  ;;  %13866 = vst [vmem:[#allocation36_spill] sm:$0xff] %v12865_v43  ;;  %v3492_v53 = vunpack.c.h.s8.bf16 %v12865_v43  ;;  %v3179_v44 = vld [vmem:[%s11767_s25 + $0x4e0] sm:$0xff] }
 0x969   : > { %v3497_v60 = vunpack.c.h.s8.bf16 %v3179_v44 }
 0x96a   : > { %v9191_v61 = vcombine.high %v3487_v36, %v3492_v53 }
 0x96f   : > { %6202 = vmatmul.mubr.bf16.gmra.mrb[48].mxu1 %v9006_v32  ;;  %6908 = vmatmul.mubr.bf16.gmra.mrb[112].mxu0 %v9170_v63  ;;  %v3335_v32 = vunpack.c.h.s8.bf16 %v12513_v20  ;;  %v3502_v63 = vunpack.c.h.s8.bf16 %v3182_v11  ;;  %v3188_v20 = vunpack.c.l.s8.bf16 %v2994_v6 }
 0x970   : > { %6209 = vmatprep.mubr.bf16.mxu1 %v9017_v34  ;;  %6915 = vmatprep.mubr.bf16.mxu0 %v9181_v62  ;;  %v9026_v34 = vcombine.low %v3325_v26, %v3330_v27  ;;  %v9190_v62 = vcombine.low %v3487_v36, %v3492_v53  ;;  %v3000_v26 = vld [vmem:[%s11767_s25 + $0x38] ss:$20 sps:$4 sm:$0xff]   ;;  %v3355_v27 = vunpack.c.h.s8.bf16 %v12538_v13  ;;  %v9046_v36 = vcombine.low %v3345_v23, %v3350_v28 }
 0x971   : > { %v9037_v43 = vcombine.high %v3335_v32, %v3340_v56  ;;  %v9201_v5 = vcombine.high %v3497_v60, %v3502_v63  ;;  %v9036_v22 = vcombine.low %v3335_v32, %v3340_v56  ;;  %v3198_v55 = vunpack.c.l.s8.bf16 %v3000_v26  ;;  %v3006_v32 = vld [vmem:[%s11767_s25 + $0x60] ss:$20 sps:$4 sm:$0xff]  }
 0x972   : > { %v3203_v15 = vunpack.c.h.s8.bf16 %v3000_v26  ;;  %v3365_v56 = vunpack.c.h.s8.bf16 %v12553_v19  ;;  %v3213_v13 = vunpack.c.h.s8.bf16 %v3006_v32  ;;  %v3390_v26 = vunpack.c.h.s8.bf16 %v12579_v40 }
 0x974   : > { %v8903_v44 = vcombine.high %v3198_v55, %v3203_v15 }
 0x977   : > { %6210 = vmatmul.mubr.bf16.gmra.mrb[52].mxu1 %v9016_v46  ;;  %6916 = vmatmul.mubr.bf16.gmra.mrb[116].mxu0 %v9180_v21  ;;  %v3193_v46 = vunpack.c.h.s8.bf16 %v2994_v6  ;;  %v9200_v21 = vcombine.low %v3497_v60, %v3502_v63  ;;  %v3370_v60 = vunpack.c.h.s8.bf16 %v12556_v0  ;;  %v3012_v6 = vld [vmem:[%s11767_s25 + $0x88] ss:$20 sps:$4 sm:$0xff]  }
 0x978   : > { %6217 = vmatprep.mubr.bf16.mxu1 %v9027_v1  ;;  %6923 = vmatprep.mubr.bf16.mxu0 %v9191_v61  ;;  %v9047_v1 = vcombine.high %v3345_v23, %v3350_v28  ;;  %v3375_v23 = vunpack.c.h.s8.bf16 %v12564_v3  ;;  %v3380_v28 = vunpack.c.h.s8.bf16 %v12567_v12  ;;  %v3218_v19 = vunpack.c.l.s8.bf16 %v3012_v6 }
 0x979   : > { %v8893_v11 = vcombine.high %v3188_v20, %v3193_v46  ;;  %v8892_v53 = vcombine.low %v3188_v20, %v3193_v46  ;;  %v3223_v0 = vunpack.c.h.s8.bf16 %v3012_v6  ;;  %v9066_v20 = vcombine.low %v3365_v56, %v3370_v60 }
 0x97f   : > { %6218 = vmatmul.mubr.bf16.gmra.mrb[56].mxu1 %v9026_v34  ;;  %6924 = vmatmul.mubr.bf16.gmra.mrb[120].mxu0 %v9190_v62  ;;  %v8902_v34 = vcombine.low %v3198_v55, %v3203_v15  ;;  %v9067_v62 = vcombine.high %v3365_v56, %v3370_v60 }
 0x980   : > { %6225 = vmatprep.mubr.bf16.mxu1 %v9037_v43  ;;  %6931 = vmatprep.mubr.bf16.mxu0 %v9201_v5  ;;  %v3360_v43 = vunpack.c.h.s8.bf16 %v12541_v51  ;;  %v3208_v51 = vunpack.c.l.s8.bf16 %v3006_v32 }
 0x982   : > { %v9057_v61 = vcombine.high %v3355_v27, %v3360_v43  ;;  %v9056_v63 = vcombine.low %v3355_v27, %v3360_v43  ;;  %v8913_v5 = vcombine.high %v3208_v51, %v3213_v13  ;;  %v8912_v46 = vcombine.low %v3208_v51, %v3213_v13  ;;  %v3030_v51 = vld [vmem:[%s11767_s25 + $0x100] ss:$20 sps:$4 sm:$0xff]  }
 0x983   : > { %v9076_v27 = vcombine.low %v3375_v23, %v3380_v28  ;;  %v8922_v43 = vcombine.low %v3218_v19, %v3223_v0  ;;  %v3405_v13 = vunpack.c.h.s8.bf16 %v12600_v42 }
 0x987   : > { %6226 = vmatmul.mubr.bf16.gmra.mrb[60].mxu1 %v9036_v22  ;;  %6932 = vmatmul.mubr.bf16.gmra.mrb[124].mxu0 %v9200_v21  ;;  %v9077_v22 = vcombine.high %v3375_v23, %v3380_v28  ;;  %v8923_v21 = vcombine.high %v3218_v19, %v3223_v0  ;;  %v3036_v23 = vld [vmem:[%s11767_s25 + $0x128] ss:$20 sps:$4 sm:$0xff]   ;;  %v3415_v28 = vunpack.c.h.s8.bf16 %v12611_v4  ;;  %v3420_v19 = vunpack.c.h.s8.bf16 %v12614_v47 }
 0x988   : > { %6233 = vmatprep.mubr.bf16.mxu1 %v9047_v1  ;;  %9280 = vmatprep.mubr.msk.bf16.mxu0 %vm5683_vm9, %v8893_v11  ;;  %v3018_v1 = vld [vmem:[%s11767_s25 + $0xb0] ss:$20 sps:$4 sm:$0xff]   ;;  %v3385_v11 = vunpack.c.h.s8.bf16 %v12576_v38  ;;  %v3258_v42 = vunpack.c.l.s8.bf16 %v3036_v23 }
 0x989   : > { %v3228_v3 = vunpack.c.l.s8.bf16 %v3018_v1  ;;  %v3233_v12 = vunpack.c.h.s8.bf16 %v3018_v1  ;;  %v3425_v1 = vunpack.c.h.s8.bf16 %v12622_v25 }
 0x98a   : > { %v9087_v55 = vcombine.high %v3385_v11, %v3390_v26 }
 0x98b   : > { %v8933_v15 = vcombine.high %v3228_v3, %v3233_v12  ;;  %v8932_v32 = vcombine.low %v3228_v3, %v3233_v12 }
 0x98f   : > { %6234 = vmatmul.mubr.bf16.gmra.mrb[64].mxu1 %v9046_v36  ;;  %6973 = vmatmul.mubr.bf16.vlgmr.msra.gmra.mrb[0].mxu0 %v8892_v53  ;;  %v3024_v36 = vld [vmem:[%s11767_s25 + $0xd8] ss:$20 sps:$4 sm:$0xff]   ;;  %v3395_v53 = vunpack.c.h.s8.bf16 %v12588_v17  ;;  %v3248_v17 = vunpack.c.l.s8.bf16 %v3030_v51 }
 0x990   : > { %6241 = vmatprep.mubr.bf16.mxu1 %v9057_v61  ;;  %9281 = vmatprep.mubr.msk.bf16.mxu0 %vm5683_vm9, %v8903_v44  ;;  %v3400_v61 = vunpack.c.h.s8.bf16 %v12591_v18  ;;  %v3238_v38 = vunpack.c.l.s8.bf16 %v3024_v36  ;;  %v3243_v40 = vunpack.c.h.s8.bf16 %v3024_v36  ;;  %v9086_v44 = vcombine.low %v3385_v11, %v3390_v26 }
 0x991   : > { %v3253_v18 = vunpack.c.h.s8.bf16 %v3030_v51  ;;  %v3430_v11 = vunpack.c.h.s8.bf16 %v12625_v57  ;;  %v9116_v26 = vcombine.low %v3415_v28, %v3420_v19 }
 0x992   : > { %v9097_v56 = vcombine.high %v3395_v53, %v3400_v61  ;;  %v8943_v60 = vcombine.high %v3238_v38, %v3243_v40 }
 0x993   : > { %v8953_v6 = vcombine.high %v3248_v17, %v3253_v18  ;;  %v9127_v12 = vcombine.high %v3425_v1, %v3430_v11  ;;  %v9126_v36 = vcombine.low %v3425_v1, %v3430_v11 }
 0x997   : > { %6242 = vmatmul.mubr.bf16.gmra.mrb[68].mxu1 %v9056_v63  ;;  %6981 = vmatmul.mubr.bf16.gmra.mrb[4].mxu0 %v8902_v34  ;;  %v3410_v63 = vunpack.c.h.s8.bf16 %v12603_v35  ;;  %v9096_v34 = vcombine.low %v3395_v53, %v3400_v61  ;;  %v3263_v35 = vunpack.c.h.s8.bf16 %v3036_v23 }
 0x998   : > { %6249 = vmatprep.mubr.bf16.mxu1 %v9067_v62  ;;  %9282 = vmatprep.mubr.msk.bf16.mxu0 %vm5683_vm9, %v8913_v5  ;;  %v8942_v62 = vcombine.low %v3238_v38, %v3243_v40  ;;  %v3054_v40 = vld [vmem:[%s11767_s25 + $0x1a0] ss:$20 sps:$4 sm:$0xff]  }
 0x999   : > { %v9107_v5 = vcombine.high %v3405_v13, %v3410_v63  ;;  %v9106_v0 = vcombine.low %v3405_v13, %v3410_v63  ;;  %v8962_v3 = vcombine.low %v3258_v42, %v3263_v35  ;;  %v3060_v63 = vld [vmem:[%s11767_s25 + $0x1c8] ss:$20 sps:$4 sm:$0xff]  }
 0x99f   : > { %6250 = vmatmul.mubr.bf16.gmra.mrb[72].mxu1 %v9066_v20  ;;  %6989 = vmatmul.mubr.bf16.gmra.mrb[8].mxu0 %v8912_v46  ;;  %v8952_v20 = vcombine.low %v3248_v17, %v3253_v18  ;;  %v9117_v46 = vcombine.high %v3415_v28, %v3420_v19  ;;  %v3455_v17 = vunpack.c.h.s8.bf16 %v12656_v2  ;;  %v13867_v18 = vld [vmem:[#allocation16_spill] sm:$0xff]  ;;  %v3465_v19 = vunpack.c.h.s8.bf16 %v12666_v10 }
 0x9a0   : > { %6257 = vmatprep.mubr.bf16.mxu1 %v9077_v22  ;;  %9283 = vmatprep.mubr.msk.bf16.mxu0 %vm5683_vm9, %v8923_v21  ;;  %v8963_v22 = vcombine.high %v3258_v42, %v3263_v35  ;;  %v3042_v21 = vld [vmem:[%s11767_s25 + $0x150] ss:$20 sps:$4 sm:$0xff]   ;;  %v3470_v42 = vunpack.c.h.s8.bf16 %v12669_v49  ;;  %v3475_v10 = vunpack.c.h.s8.bf16 %v12676_v45  ;;  %v3480_v49 = vunpack.c.h.s8.bf16 %v12679_v54 }
 0x9a1   : > { %v3268_v4 = vunpack.c.l.s8.bf16 %v3042_v21  ;;  %v3273_v47 = vunpack.c.h.s8.bf16 %v3042_v21  ;;  %v3066_v28 = vld [vmem:[%s11767_s25 + $0x1f0] ss:$20 sps:$4 sm:$0xff]   ;;  %v3485_v54 = vunpack.c.h.s8.bf16 %v12687_v33  ;;  %v3490_v45 = vunpack.c.h.s8.bf16 %v12690_v31 }
 0x9a2   : > { %v3308_v2 = vunpack.c.l.s8.bf16 %v3066_v28  ;;  %v3313_v35 = vunpack.c.h.s8.bf16 %v3066_v28  ;;  %v9167_v1 = vcombine.high %v3465_v19, %v3470_v42  ;;  %v3495_v33 = vunpack.c.h.s8.bf16 %v12697_v24  ;;  %v3090_v28 = vld [vmem:[%s11767_s25 + $0x290] ss:$20 sps:$4 sm:$0xff]  }
 0x9a3   : > { %v8972_v53 = vcombine.low %v3268_v4, %v3273_v47  ;;  %v3500_v31 = vunpack.c.h.s8.bf16 %v12700_v8  ;;  %v3346_v24 = vunpack.c.l.s8.bf16 %v12707_v48  ;;  %v3351_v8 = vunpack.c.l.s8.bf16 %v12710_v50  ;;  %v13868_v48 = vld [vmem:[#allocation17_spill] sm:$0xff] }
 0x9a4   : > { %v3356_v50 = vunpack.c.l.s8.bf16 %v13868_v48 }
 0x9a7   : > { %6258 = vmatmul.mubr.bf16.gmra.mrb[76].mxu1 %v9076_v27  ;;  %6997 = vmatmul.mubr.bf16.gmra.mrb[12].mxu0 %v8922_v43  ;;  %v8973_v27 = vcombine.high %v3268_v4, %v3273_v47  ;;  %v3048_v43 = vld [vmem:[%s11767_s25 + $0x178] ss:$20 sps:$4 sm:$0xff]   ;;  %v9013_v4 = vcombine.high %v3308_v2, %v3313_v35 }
 0x9a8   : > { %6265 = vmatprep.mubr.bf16.mxu1 %v9087_v55  ;;  %9284 = vmatprep.mubr.msk.bf16.mxu0 %vm5683_vm9, %v8933_v15  ;;  %v3435_v55 = vunpack.c.h.s8.bf16 %v12634_v59  ;;  %v3440_v15 = vunpack.c.h.s8.bf16 %v12637_v7  ;;  %v3278_v25 = vunpack.c.l.s8.bf16 %v3048_v43  ;;  %v3283_v57 = vunpack.c.h.s8.bf16 %v3048_v43  ;;  %v3072_v47 = vld [vmem:[%s11767_s25 + $0x218] ss:$20 sps:$4 sm:$0xff]  }
 0x9a9   : > { %v3288_v59 = vunpack.c.l.s8.bf16 %v3054_v40  ;;  %v3293_v7 = vunpack.c.h.s8.bf16 %v3054_v40  ;;  %v9166_v43 = vcombine.low %v3465_v19, %v3470_v42  ;;  %v3348_v19 = vunpack.c.l.s8.bf16 %v3090_v28 }
 0x9aa   : > { %v9137_v61 = vcombine.high %v3435_v55, %v3440_v15  ;;  %v8983_v38 = vcombine.high %v3278_v25, %v3283_v57  ;;  %v3353_v42 = vunpack.c.h.s8.bf16 %v3090_v28 }
 0x9ab   : > { %v8993_v13 = vcombine.high %v3288_v59, %v3293_v7 }
 0x9af   : > { %6266 = vmatmul.mubr.bf16.gmra.mrb[80].mxu1 %v9086_v44  ;;  %7005 = vmatmul.mubr.bf16.gmra.mrb[16].mxu0 %v8932_v32  ;;  %v3445_v44 = vunpack.c.h.s8.bf16 %v12645_v14  ;;  %v3450_v32 = vunpack.c.h.s8.bf16 %v12648_v30  ;;  %v3298_v30 = vunpack.c.l.s8.bf16 %v3060_v63  ;;  %v3303_v14 = vunpack.c.h.s8.bf16 %v3060_v63 }
 0x9b0   : > { %6273 = vmatprep.mubr.bf16.mxu1 %v9097_v56  ;;  %9285 = vmatprep.mubr.msk.bf16.mxu0 %vm5683_vm9, %v8943_v60  ;;  %v9136_v56 = vcombine.low %v3435_v55, %v3440_v15  ;;  %v8982_v60 = vcombine.low %v3278_v25, %v3283_v57  ;;  %v9012_v15 = vcombine.low %v3308_v2, %v3313_v35 }
 0x9b1   : > { %v9147_v51 = vcombine.high %v3445_v44, %v3450_v32  ;;  %v9003_v23 = vcombine.high %v3298_v30, %v3303_v14  ;;  %v9002_v21 = vcombine.low %v3298_v30, %v3303_v14  ;;  %v9177_v25 = vcombine.high %v3475_v10, %v3480_v49 }
 0x9b2   : > { %v9186_v30 = vcombine.low %v3485_v54, %v3490_v45 }
 0x9b7   : > { %6274 = vmatmul.mubr.bf16.gmra.mrb[84].mxu1 %v9096_v34  ;;  %7013 = vmatmul.mubr.bf16.gmra.mrb[20].mxu0 %v8942_v62  ;;  %v3460_v34 = vunpack.c.h.s8.bf16 %v13867_v18  ;;  %v9146_v62 = vcombine.low %v3445_v44, %v3450_v32  ;;  %v9176_v32 = vcombine.low %v3475_v10, %v3480_v49  ;;  %v13869_v10 = vld [vmem:[#allocation18_spill] sm:$0xff] }
 0x9b8   : > { %6281 = vmatprep.mubr.bf16.mxu1 %v9107_v5  ;;  %9286 = vmatprep.mubr.msk.bf16.mxu0 %vm5683_vm9, %v8953_v6  ;;  %v8992_v5 = vcombine.low %v3288_v59, %v3293_v7  ;;  %v3361_v49 = vunpack.c.l.s8.bf16 %v13869_v10 }
 0x9b9   : > { %v9157_v6 = vcombine.high %v3455_v17, %v3460_v34 }
 0x9bf   : > { %6282 = vmatmul.mubr.bf16.gmra.mrb[88].mxu1 %v9106_v0  ;;  %7021 = vmatmul.mubr.bf16.gmra.mrb[24].mxu0 %v8952_v20 }
 0x9c0   : > { %6289 = vmatprep.mubr.bf16.mxu1 %v9117_v46  ;;  %9287 = vmatprep.mubr.msk.bf16.mxu0 %vm5683_vm9, %v8963_v22  ;;  %v9156_v46 = vcombine.low %v3455_v17, %v3460_v34 }
 0x9c7   : > { %6290 = vmatmul.mubr.bf16.gmra.mrb[92].mxu1 %v9116_v26  ;;  %7029 = vmatmul.mubr.bf16.gmra.mrb[28].mxu0 %v8962_v3  ;;  %v3318_v26 = vunpack.c.l.s8.bf16 %v3072_v47  ;;  %v3323_v3 = vunpack.c.h.s8.bf16 %v3072_v47  ;;  %v3096_v47 = vld [vmem:[%s11767_s25 + $0x2b8] ss:$20 sps:$4 sm:$0xff]  }
 0x9c8   : > { %6297 = vmatprep.mubr.bf16.mxu1 %v9127_v12  ;;  %9288 = vmatprep.mubr.msk.bf16.mxu0 %vm5683_vm9, %v8973_v27 }
 0x9c9   : > { %v9022_v7 = vcombine.low %v3318_v26, %v3323_v3 }
 0x9cf   : > { %6298 = vmatmul.mubr.bf16.gmra.mrb[96].mxu1 %v9126_v36  ;;  %7037 = vmatmul.mubr.bf16.gmra.mrb[32].mxu0 %v8972_v53  ;;  %v9023_v36 = vcombine.high %v3318_v26, %v3323_v3  ;;  %v3078_v53 = vld [vmem:[%s11767_s25 + $0x240] ss:$20 sps:$4 sm:$0xff]   ;;  %v3358_v26 = vunpack.c.l.s8.bf16 %v3096_v47  ;;  %v3363_v3 = vunpack.c.h.s8.bf16 %v3096_v47 }
 0x9d0   : > { %6305 = vmatprep.mubr.bf16.mxu1 %v9137_v61  ;;  %9289 = vmatprep.mubr.msk.bf16.mxu0 %vm5683_vm9, %v8983_v38  ;;  %v3328_v61 = vunpack.c.l.s8.bf16 %v3078_v53  ;;  %v3333_v38 = vunpack.c.h.s8.bf16 %v3078_v53  ;;  %v13874_v47 = vld [vmem:[#allocation23_spill] sm:$0xff] }
 0x9d1   : > { %v3386_v48 = vunpack.c.l.s8.bf16 %v13874_v47 }
 0x9d7   : > { %6306 = vmatmul.mubr.bf16.gmra.mrb[100].mxu1 %v9136_v56  ;;  %7045 = vmatmul.mubr.bf16.gmra.mrb[36].mxu0 %v8982_v60  ;;  %v9187_v56 = vcombine.high %v3485_v54, %v3490_v45  ;;  %v9063_v54 = vcombine.high %v3358_v26, %v3363_v3  ;;  %v3102_v45 = vld [vmem:[%s11767_s25 + $0x2e0] ss:$20 sps:$4 sm:$0xff]  }
 0x9d8   : > { %6313 = vmatprep.mubr.bf16.mxu1 %v9147_v51  ;;  %9290 = vmatprep.mubr.msk.bf16.mxu0 %vm5683_vm9, %v8993_v13  ;;  %v9033_v51 = vcombine.high %v3328_v61, %v3333_v38  ;;  %v3084_v13 = vld [vmem:[%s11767_s25 + $0x268] ss:$20 sps:$4 sm:$0xff]  }
 0x9d9   : > { %v3338_v63 = vunpack.c.l.s8.bf16 %v3084_v13  ;;  %v3343_v17 = vunpack.c.h.s8.bf16 %v3084_v13  ;;  %v9058_v13 = vcombine.low %v3356_v50, %v3361_v49 }
 0x9df   : > { %6314 = vmatmul.mubr.bf16.gmra.mrb[104].mxu1 %v9146_v62  ;;  %7053 = vmatmul.mubr.bf16.gmra.mrb[40].mxu0 %v8992_v5  ;;  %v9032_v62 = vcombine.low %v3328_v61, %v3333_v38  ;;  %v9197_v5 = vcombine.high %v3495_v33, %v3500_v31  ;;  %v13870_v61 = vld [vmem:[#allocation19_spill] sm:$0xff] }
 0x9e0   : > { %6321 = vmatprep.mubr.bf16.mxu1 %v9157_v6  ;;  %9291 = vmatprep.mubr.msk.bf16.mxu0 %vm5683_vm9, %v9003_v23  ;;  %v9043_v23 = vcombine.high %v3338_v63, %v3343_v17  ;;  %v3366_v38 = vunpack.c.l.s8.bf16 %v13870_v61  ;;  %v3120_v61 = vld [vmem:[%s11767_s25 + $0x358] ss:$20 sps:$4 sm:$0xff]  }
 0x9e2   : > { %v12926_v0 = vpop.f32.mrb[0].mxu1 }
 0x9e3   : > { %v6109_v20 = vpop.f32.mrb[1].mxu1 }
 0x9e4   : > { %v12928_v22 = vpop.f32.mrb[2].mxu1  ;;  %v9196_v20 = vcombine.low %v3495_v33, %v3500_v31  ;;  %v9062_v31 = vcombine.low %v3358_v26, %v3363_v3 }
 0x9e5   : > { %v6112_v11 = vpop.f32.mrb[3].mxu1 }
 0x9e7   : > { %6322 = vmatmul.mubr.bf16.gmra.mrb[108].mxu1 %v9156_v46  ;;  %7061 = vmatmul.mubr.bf16.gmra.mrb[44].mxu0 %v9002_v21  ;;  %v9042_v21 = vcombine.low %v3338_v63, %v3343_v17 }
 0x9e8   : > { %6329 = vmatprep.mubr.bf16.mxu1 %v9167_v1  ;;  %9292 = vmatprep.mubr.msk.bf16.mxu0 %vm5683_vm9, %v9013_v4  ;;  %v9049_v1 = vcombine.high %v3346_v24, %v3351_v8  ;;  %v9053_v4 = vcombine.high %v3348_v19, %v3353_v42 }
 0x9ea   : > { %v12934_v12 = vpop.f32.mrb[4].mxu1 }
 0x9eb   : > { %v6117_v27 = vpop.f32.mrb[5].mxu1 }
 0x9ec   : > { %v12936_v55 = vpop.f32.mrb[6].mxu1 }
 0x9ed   : > { %v6120_v57 = vpop.f32.mrb[7].mxu1 }
 0x9ee   : > { %v9052_v57 = vcombine.low %v3348_v19, %v3353_v42 }
 0x9ef   : > { %6330 = vmatmul.mubr.bf16.gmra.mrb[112].mxu1 %v9166_v43  ;;  %7069 = vmatmul.mubr.bf16.gmra.mrb[48].mxu0 %v9012_v15  ;;  %v9048_v15 = vcombine.low %v3346_v24, %v3351_v8 }
 0x9f0   : > { %6337 = vmatprep.mubr.bf16.mxu1 %v9177_v25  ;;  %9293 = vmatprep.mubr.msk.bf16.mxu0 %vm5683_vm9, %v9023_v36  ;;  %v9059_v36 = vcombine.high %v3356_v50, %v3361_v49  ;;  %v13875_v50 = vld [vmem:[#allocation24_spill] sm:$0xff] }
 0x9f1   : > { %v3391_v10 = vunpack.c.l.s8.bf16 %v13875_v50 }
 0x9f2   : > { %v12942_v40 = vpop.f32.mrb[8].mxu1 }
 0x9f3   : > { %v6125_v44 = vpop.f32.mrb[9].mxu1 }
 0x9f4   : > { %v12944_v59 = vpop.f32.mrb[10].mxu1  ;;  %v13871_v44 = vld [vmem:[#allocation20_spill] sm:$0xff] }
 0x9f5   : > { %v6128_v60 = vpop.f32.mrb[11].mxu1 }
 0x9f7   : > { %6338 = vmatmul.mubr.bf16.gmra.mrb[116].mxu1 %v9176_v32  ;;  %7077 = vmatmul.mubr.bf16.gmra.mrb[52].mxu0 %v9022_v7  ;;  %v3371_v32 = vunpack.c.l.s8.bf16 %v13871_v44  ;;  %v3368_v7 = vunpack.c.l.s8.bf16 %v3102_v45 }
 0x9f8   : > { %6345 = vmatprep.mubr.bf16.mxu1 %v9187_v56  ;;  %9294 = vmatprep.mubr.msk.bf16.mxu0 %vm5683_vm9, %v9033_v51  ;;  %v3373_v56 = vunpack.c.h.s8.bf16 %v3102_v45 }
 0x9f9   : > { %v9069_v63 = vcombine.high %v3366_v38, %v3371_v32  ;;  %v9068_v42 = vcombine.low %v3366_v38, %v3371_v32  ;;  %v13876_v38 = vld [vmem:[#allocation25_spill] sm:$0xff]  ;;  %v13877_v32 = vld [vmem:[#allocation26_spill] sm:$0xff] }
 0x9fa   : > { %v12950_v18 = vpop.f32.mrb[12].mxu1  ;;  %v3396_v44 = vunpack.c.l.s8.bf16 %v13876_v38 }
 0x9fb   : > { %v6133_v34 = vpop.f32.mrb[13].mxu1 }
 0x9fc   : > { %v12952_v14 = vpop.f32.mrb[14].mxu1  ;;  %v9073_v34 = vcombine.high %v3368_v7, %v3373_v56 }
 0x9fd   : > { %v6136_v6 = vpop.f32.mrb[15].mxu1 }
 0x9fe   : > { %v13873_v6 = vld [vmem:[#allocation22_spill] sm:$0xff] }
 0x9ff   : > { %6346 = vmatmul.mubr.bf16.gmra.mrb[120].mxu1 %v9186_v30  ;;  %7085 = vmatmul.mubr.bf16.gmra.mrb[56].mxu0 %v9032_v62  ;;  %v3108_v30 = vld [vmem:[%s11767_s25 + $0x308] ss:$20 sps:$4 sm:$0xff]  }
 0xa00   : > { %6353 = vmatprep.mubr.bf16.mxu1 %v9197_v5  ;;  %9295 = vmatprep.mubr.msk.bf16.mxu0 %vm5683_vm9, %v9043_v23  ;;  %v13872_v62 = vld [vmem:[#allocation21_spill] sm:$0xff]  ;;  %v3381_v23 = vunpack.c.l.s8.bf16 %v13873_v6  ;;  %v3378_v28 = vunpack.c.l.s8.bf16 %v3108_v30  ;;  %v3383_v24 = vunpack.c.h.s8.bf16 %v3108_v30  ;;  %v3126_v6 = vld [vmem:[%s11767_s25 + $0x380] ss:$20 sps:$4 sm:$0xff]  }
 0xa01   : > { %v3376_v5 = vunpack.c.l.s8.bf16 %v13872_v62 }
 0xa02   : > { %v12958_v2 = vpop.f32.mrb[16].mxu1 }
 0xa03   : > { %v6141_v35 = vpop.f32.mrb[17].mxu1 }
 0xa04   : > { %v12960_v46 = vpop.f32.mrb[18].mxu1 }
 0xa05   : > { %v6144_v11 = vpop.f32.mrb[19].mxu1 }
 0xa06   : > { %v9083_v11 = vcombine.high %v3378_v28, %v3383_v24 }
 0xa07   : > { %6354 = vmatmul.mubr.bf16.gmra.mrb[124].mxu1 %v9196_v20  ;;  %7093 = vmatmul.mubr.bf16.gmra.mrb[60].mxu0 %v9042_v21  ;;  %v9072_v20 = vcombine.low %v3368_v7, %v3373_v56  ;;  %v9079_v21 = vcombine.high %v3376_v5, %v3381_v23  ;;  %v3401_v7 = vunpack.c.l.s8.bf16 %v13877_v32  ;;  %v3398_v56 = vunpack.c.l.s8.bf16 %v3120_v61 }
 0xa08   : > { %6522 = vmatprep.mubr.bf16.mxu1 %v9049_v1  ;;  %9296 = vmatprep.mubr.msk.bf16.mxu0 %vm5683_vm9, %v9053_v4  ;;  %v3114_v4 = vld [vmem:[%s11767_s25 + $0x330] ss:$20 sps:$4 sm:$0xff]  }
 0xa09   : > { %v3388_v49 = vunpack.c.l.s8.bf16 %v3114_v4  ;;  %v3393_v26 = vunpack.c.h.s8.bf16 %v3114_v4  ;;  %v9099_v30 = vcombine.high %v3396_v44, %v3401_v7 }
 0xa0a   : > { %v12966_v27 = vpop.f32.mrb[20].mxu1 }
 0xa0b   : > { %v6149_v43 = vpop.f32.mrb[21].mxu1  ;;  %v9093_v45 = vcombine.high %v3388_v49, %v3393_v26 }
 0xa0c   : > { %v12968_v25 = vpop.f32.mrb[22].mxu1 }
 0xa0d   : > { %v6152_v53 = vpop.f32.mrb[23].mxu1 }
 0xa0e   : > { %v9089_v53 = vcombine.high %v3386_v48, %v3391_v10 }
 0xa0f   : > { %6523 = vmatmul.mubr.bf16.vlgmr.msra.gmra.mrb[64].mxu1 %v9048_v15  ;;  %7101 = vmatmul.mubr.bf16.gmra.mrb[64].mxu0 %v9052_v57  ;;  %v9078_v15 = vcombine.low %v3376_v5, %v3381_v23  ;;  %v13878_v23 = vld [vmem:[#allocation27_spill] sm:$0xff] }
 0xa10   : > { %6530 = vmatprep.mubr.bf16.mxu1 %v9059_v36  ;;  %9297 = vmatprep.mubr.msk.bf16.mxu0 %vm5683_vm9, %v9063_v54  ;;  %v9082_v36 = vcombine.low %v3378_v28, %v3383_v24  ;;  %v3406_v28 = vunpack.c.l.s8.bf16 %v13878_v23  ;;  %v13879_v24 = vld [vmem:[#allocation28_spill] sm:$0xff] }
 0xa12   : > { %v12974_v60 = vpop.f32.mrb[24].mxu1 }
 0xa13   : > { %v6157_v51 = vpop.f32.mrb[25].mxu1 }
 0xa14   : > { %v12976_v33 = vpop.f32.mrb[26].mxu1  ;;  %v3403_v51 = vunpack.c.h.s8.bf16 %v3120_v61 }
 0xa15   : > { %v6160_v17 = vpop.f32.mrb[27].mxu1 }
 0xa16   : > { %v9103_v5 = vcombine.high %v3398_v56, %v3403_v51  ;;  %v9102_v47 = vcombine.low %v3398_v56, %v3403_v51 }
 0xa17   : > { %6531 = vmatmul.mubr.bf16.gmra.mrb[68].mxu1 %v9058_v13  ;;  %7109 = vmatmul.mubr.bf16.gmra.mrb[68].mxu0 %v9062_v31 }
 0xa18   : > { %6538 = vmatprep.mubr.bf16.mxu1 %v9069_v63  ;;  %9298 = vmatprep.mubr.msk.bf16.mxu0 %vm5683_vm9, %v9073_v34  ;;  %v9088_v63 = vcombine.low %v3386_v48, %v3391_v10  ;;  %v9092_v34 = vcombine.low %v3388_v49, %v3393_v26  ;;  %v3132_v49 = vld [vmem:[%s11767_s25 + $0x3a8] ss:$20 sps:$4 sm:$0xff]  }
 0xa19   : > { %v13880_v26 = vld [vmem:[#allocation29_spill] sm:$0xff] }
 0xa1a   : > { %v12982_v8 = vpop.f32.mrb[28].mxu1 }
 0xa1b   : > { %v6165_v19 = vpop.f32.mrb[29].mxu1 }
 0xa1c   : > { %v12984_v35 = vpop.f32.mrb[30].mxu1  ;;  %v3411_v19 = vunpack.c.l.s8.bf16 %v13879_v24 }
 0xa1d   : > { %v6168_v1 = vpop.f32.mrb[31].mxu1 }
 0xa1e   : > { %v9109_v48 = vcombine.high %v3406_v28, %v3411_v19  ;;  %v9108_v38 = vcombine.low %v3406_v28, %v3411_v19 }
 0xa1f   : > { %6539 = vmatmul.mubr.bf16.gmra.mrb[72].mxu1 %v9068_v42  ;;  %7117 = vmatmul.mubr.bf16.gmra.mrb[72].mxu0 %v9072_v20  ;;  %v3408_v42 = vunpack.c.l.s8.bf16 %v3126_v6  ;;  %v3413_v20 = vunpack.c.h.s8.bf16 %v3126_v6 }
 0xa20   : > { %6546 = vmatprep.mubr.bf16.mxu1 %v9079_v21  ;;  %9299 = vmatprep.mubr.msk.bf16.mxu0 %vm5683_vm9, %v9083_v11  ;;  %v9098_v11 = vcombine.low %v3396_v44, %v3401_v7 }
 0xa21   : > { %v9113_v10 = vcombine.high %v3408_v42, %v3413_v20  ;;  %v9112_v32 = vcombine.low %v3408_v42, %v3413_v20 }
 0xa22   : > { %v12990_v3 = vpop.f32.mrb[32].mxu1 }
 0xa23   : > { %v6173_v43 = vpop.f32.mrb[33].mxu1 }
 0xa24   : > { %v12992_v57 = vpop.f32.mrb[34].mxu1  ;;  %v3416_v43 = vunpack.c.l.s8.bf16 %v13880_v26 }
 0xa25   : > { %v6176_v54 = vpop.f32.mrb[35].mxu1 }
 0xa26   : > { %v3423_v54 = vunpack.c.h.s8.bf16 %v3132_v49 }
 0xa27   : > { %6547 = vmatmul.mubr.bf16.gmra.mrb[76].mxu1 %v9078_v15  ;;  %7125 = vmatmul.mubr.bf16.gmra.mrb[76].mxu0 %v9082_v36  ;;  %v13881_v15 = vld [vmem:[#allocation30_spill] sm:$0xff] }
 0xa28   : > { %6554 = vmatprep.mubr.bf16.mxu1 %v9089_v53  ;;  %9300 = vmatprep.mubr.msk.bf16.mxu0 %vm5683_vm9, %v9093_v45  ;;  %v3421_v36 = vunpack.c.l.s8.bf16 %v13881_v15  ;;  %v3418_v53 = vunpack.c.l.s8.bf16 %v3132_v49 }
 0xa2a   : > { %v12998_v13 = vpop.f32.mrb[36].mxu1  ;;  %v9119_v7 = vcombine.high %v3416_v43, %v3421_v36  ;;  %v9123_v51 = vcombine.high %v3418_v53, %v3423_v54  ;;  %v9118_v24 = vcombine.low %v3416_v43, %v3421_v36  ;;  %v9122_v42 = vcombine.low %v3418_v53, %v3423_v54 }
 0xa2b   : > { %v6181_v31 = vpop.f32.mrb[37].mxu1 }
 0xa2c   : > { %v13000_v17 = vpop.f32.mrb[38].mxu1  ;;  %v3138_v31 = vld [vmem:[%s11767_s25 + $0x3d0] ss:$20 sps:$4 sm:$0xff]  }
 0xa2d   : > { %v6184_v62 = vpop.f32.mrb[39].mxu1  ;;  %v3433_v6 = vunpack.c.h.s8.bf16 %v3138_v31 }
 0xa2f   : > { %6555 = vmatmul.mubr.bf16.gmra.mrb[80].mxu1 %v9088_v63  ;;  %7133 = vmatmul.mubr.bf16.gmra.mrb[80].mxu0 %v9092_v34  ;;  %v13882_v63 = vld [vmem:[#allocation31_spill] sm:$0xff] }
 0xa30   : > { %6562 = vmatprep.mubr.bf16.mxu1 %v9099_v30  ;;  %9301 = vmatprep.mubr.msk.bf16.mxu0 %vm5683_vm9, %v9103_v5  ;;  %v3426_v34 = vunpack.c.l.s8.bf16 %v13882_v63  ;;  %v13883_v30 = vld [vmem:[#allocation32_spill] sm:$0xff]  ;;  %v3428_v5 = vunpack.c.l.s8.bf16 %v3138_v31  ;;  %v3451_v31 = vunpack.c.l.s8.bf16 %v12825_v16  ;;  %v3461_v16 = vunpack.c.l.s8.bf16 %v12835_v39 }
 0xa31   : > { %v3431_v62 = vunpack.c.l.s8.bf16 %v13883_v30  ;;  %v3466_v39 = vunpack.c.l.s8.bf16 %v12842_v41 }
 0xa32   : > { %v13006_v21 = vpop.f32.mrb[40].mxu1 }
 0xa33   : > { %v6189_v1 = vpop.f32.mrb[41].mxu1  ;;  %v9129_v20 = vcombine.high %v3426_v34, %v3431_v62  ;;  %v9128_v53 = vcombine.low %v3426_v34, %v3431_v62 }
 0xa34   : > { %v13008_v4 = vpop.f32.mrb[42].mxu1 }
 0xa35   : > { %v6192_v50 = vpop.f32.mrb[43].mxu1 }
 0xa37   : > { %6563 = vmatmul.mubr.bf16.gmra.mrb[84].mxu1 %v9098_v11  ;;  %7141 = vmatmul.mubr.bf16.gmra.mrb[84].mxu0 %v9102_v47  ;;  %v9133_v11 = vcombine.high %v3428_v5, %v3433_v6  ;;  %v3144_v47 = vld [vmem:[%s11767_s25 + $0x3f8] ss:$20 sps:$4 sm:$0xff]  }
 0xa38   : > { %6570 = vmatprep.mubr.bf16.mxu1 %v9109_v48  ;;  %9302 = vmatprep.mubr.msk.bf16.mxu0 %vm5683_vm9, %v9113_v10  ;;  %v13884_v48 = vld [vmem:[#allocation33_spill] sm:$0xff]  ;;  %v13885_v10 = vld [vmem:[#allocation34_spill] sm:$0xff]  ;;  %v3438_v26 = vunpack.c.l.s8.bf16 %v3144_v47  ;;  %v3443_v15 = vunpack.c.h.s8.bf16 %v3144_v47 }
 0xa39   : > { %v3436_v50 = vunpack.c.l.s8.bf16 %v13884_v48  ;;  %v3441_v49 = vunpack.c.l.s8.bf16 %v13885_v10 }
 0xa3a   : > { %v13014_v45 = vpop.f32.mrb[44].mxu1 }
 0xa3b   : > { %v6197_v61 = vpop.f32.mrb[45].mxu1 }
 0xa3c   : > { %v13016_v44 = vpop.f32.mrb[46].mxu1  ;;  %v9132_v61 = vcombine.low %v3428_v5, %v3433_v6  ;;  %v9138_v5 = vcombine.low %v3436_v50, %v3441_v49 }
 0xa3d   : > { %v6200_v56 = vpop.f32.mrb[47].mxu1 }
 0xa3e   : > { %v3150_v56 = vld [vmem:[%s11767_s25 + $0x420] ss:$20 sps:$4 sm:$0xff]  }
 0xa3f   : > { %6571 = vmatmul.mubr.bf16.gmra.mrb[88].mxu1 %v9108_v38  ;;  %7149 = vmatmul.mubr.bf16.gmra.mrb[88].mxu0 %v9112_v32  ;;  %v9139_v38 = vcombine.high %v3436_v50, %v3441_v49  ;;  %v3448_v63 = vunpack.c.l.s8.bf16 %v3150_v56  ;;  %v3453_v30 = vunpack.c.h.s8.bf16 %v3150_v56 }
 0xa40   : > { %6578 = vmatprep.mubr.bf16.mxu1 %v9119_v7  ;;  %9303 = vmatprep.mubr.msk.bf16.mxu0 %vm5683_vm9, %v9123_v51  ;;  %v9143_v7 = vcombine.high %v3438_v26, %v3443_v15  ;;  %v3446_v51 = vunpack.c.l.s8.bf16 %v12822_v52  ;;  %v3456_v52 = vunpack.c.l.s8.bf16 %v12832_v58  ;;  %v13054_v58 = vld [vmem:[%s13886_s9] ss:$0 sm:$0xff] }
 0xa41   : > { %v10429_v56 = vadd.f32 %v13054_v58, %v12926_v0  ;;  %v3476_v0 = vunpack.c.l.s8.bf16 %v12852_v37 }
 0xa42   : > { %v13022_v23 = vpop.f32.mrb[48].mxu1  ;;  %v9148_v10 = vcombine.low %v3446_v51, %v3451_v31 }
 0xa43   : > { %v6205_v28 = vpop.f32.mrb[49].mxu1 }
 0xa44   : > { %v13024_v19 = vpop.f32.mrb[50].mxu1  ;;  %v9142_v28 = vcombine.low %v3438_v26, %v3443_v15  ;;  %v9152_v26 = vcombine.low %v3448_v63, %v3453_v30  ;;  %v9159_v15 = vcombine.high %v3456_v52, %v3461_v16 }
 0xa45   : > { %v6208_v1 = vpop.f32.mrb[51].mxu1 }
 0xa46   : > { %v3156_v1 = vld [vmem:[%s11767_s25 + $0x448] ss:$20 sps:$4 sm:$0xff]  }
 0xa47   : > { %6579 = vmatmul.mubr.bf16.gmra.mrb[92].mxu1 %v9118_v24  ;;  %7157 = vmatmul.mubr.bf16.gmra.mrb[92].mxu0 %v9122_v42  ;;  %v9149_v24 = vcombine.high %v3446_v51, %v3451_v31  ;;  %v3463_v47 = vunpack.c.h.s8.bf16 %v3156_v1  ;;  %v9158_v31 = vcombine.low %v3456_v52, %v3461_v16 }
 0xa48   : > { %6586 = vmatprep.mubr.bf16.mxu1 %v9129_v20  ;;  %9304 = vmatprep.mubr.msk.bf16.mxu0 %vm5683_vm9, %v9133_v11  ;;  %v9153_v20 = vcombine.high %v3448_v63, %v3453_v30  ;;  %v3458_v11 = vunpack.c.l.s8.bf16 %v3156_v1  ;;  %v10431_v63 = vadd.f32 %v13054_v58, %v12928_v22  ;;  %v13887_v1 = vld [vmem:[#allocation35_spill] sm:$0xff] }
 0xa49   : > { %v3481_v52 = vunpack.c.l.s8.bf16 %v13887_v1 }
 0xa4a   : > { %v13030_v43 = vpop.f32.mrb[52].mxu1 }
 0xa4b   : > { %v6213_v36 = vpop.f32.mrb[53].mxu1 }
 0xa4c   : > { %v13032_v54 = vpop.f32.mrb[54].mxu1 }
 0xa4d   : > { %v6216_v32 = vpop.f32.mrb[55].mxu1 }
 0xa4f   : > { %6587 = vmatmul.mubr.bf16.gmra.mrb[96].mxu1 %v9128_v53  ;;  %7165 = vmatmul.mubr.bf16.gmra.mrb[96].mxu0 %v9132_v61  ;;  %v9163_v53 = vcombine.high %v3458_v11, %v3463_v47  ;;  %v3162_v61 = vld [vmem:[%s11767_s25 + $0x470] ss:$20 sps:$4 sm:$0xff]  }
 0xa50   : > { %6594 = vmatprep.mubr.bf16.mxu1 %v9139_v38  ;;  %9305 = vmatprep.mubr.msk.bf16.mxu0 %vm5683_vm9, %v9143_v7  ;;  %v3471_v38 = vunpack.c.l.s8.bf16 %v12845_v9  ;;  %v3468_v32 = vunpack.c.l.s8.bf16 %v3162_v61  ;;  %v3473_v7 = vunpack.c.h.s8.bf16 %v3162_v61 }
 0xa52   : > { %v13038_v34 = vpop.f32.mrb[56].mxu1 }
 0xa53   : > { %v6221_v62 = vpop.f32.mrb[57].mxu1 }
 0xa54   : > { %v13040_v6 = vpop.f32.mrb[58].mxu1 }
 0xa55   : > { %v6224_v42 = vpop.f32.mrb[59].mxu1 }
 0xa57   : > { %6595 = vmatmul.mubr.bf16.gmra.mrb[100].mxu1 %v9138_v5  ;;  %7173 = vmatmul.mubr.bf16.gmra.mrb[100].mxu0 %v9142_v28  ;;  %v9162_v5 = vcombine.low %v3458_v11, %v3463_v47  ;;  %v9169_v28 = vcombine.high %v3466_v39, %v3471_v38  ;;  %v10433_v11 = vadd.f32 %v13054_v58, %v12934_v12  ;;  %v3486_v12 = vunpack.c.l.s8.bf16 %v12862_v29 }
 0xa58   : > { %6602 = vmatprep.mubr.bf16.mxu1 %v9149_v24  ;;  %9306 = vmatprep.mubr.msk.bf16.mxu0 %vm5683_vm9, %v9153_v20  ;;  %v9173_v24 = vcombine.high %v3468_v32, %v3473_v7  ;;  %v3168_v20 = vld [vmem:[%s11767_s25 + $0x498] ss:$20 sps:$4 sm:$0xff]   ;;  %v10439_v29 = vadd.f32 %v13054_v58, %v12944_v59 }
 0xa59   : > { %v3478_v22 = vunpack.c.l.s8.bf16 %v3168_v20  ;;  %v3483_v16 = vunpack.c.h.s8.bf16 %v3168_v20 }
 0xa5a   : > { %v13046_v48 = vpop.f32.mrb[60].mxu1 }
 0xa5b   : > { %v6229_v50 = vpop.f32.mrb[61].mxu1  ;;  %v9183_v61 = vcombine.high %v3478_v22, %v3483_v16  ;;  %v9182_v1 = vcombine.low %v3478_v22, %v3483_v16  ;;  %v11432_v22 = vld [vmem:[%s11767_s25 + $0x4e0] sm:$0xff] }
 0xa5c   : > { %v13048_v49 = vpop.f32.mrb[62].mxu1  ;;  %v9168_v50 = vcombine.low %v3466_v39, %v3471_v38  ;;  %v3496_v16 = vunpack.c.l.s8.bf16 %v11432_v22 }
 0xa5d   : > { %v6232_v36 = vpop.f32.mrb[63].mxu1 }
 0xa5e   : > { %v9172_v36 = vcombine.low %v3468_v32, %v3473_v7 }
 0xa5f   : > { %6603 = vmatmul.mubr.bf16.gmra.mrb[104].mxu1 %v9148_v10  ;;  %7181 = vmatmul.mubr.bf16.gmra.mrb[104].mxu0 %v9152_v26  ;;  %v10435_v10 = vadd.f32 %v13054_v58, %v12936_v55  ;;  %v13888_v55 = vld [vmem:[#allocation36_spill] sm:$0xff] }
 0xa60   : > { %6610 = vmatprep.mubr.bf16.mxu1 %v9159_v15  ;;  %9307 = vmatprep.mubr.msk.bf16.mxu0 %vm5683_vm9, %v9163_v53  ;;  %v9179_v53 = vcombine.high %v3476_v0, %v3481_v52  ;;  %v3491_v39 = vunpack.c.l.s8.bf16 %v13888_v55  ;;  %v10443_v55 = vadd.f32 %v13054_v58, %v12952_v14 }
 0xa62   : > { %v6974_v51 = vpop.f32.mrb[0].mxu0 }
 0xa63   : > { %v10430_v30 = vadd.f32 %v10429_v56, %v6974_v51  ;;  %v6976_v62 = vpop.f32.mrb[1].mxu0 }
 0xa64   : > { %v6977_v41 = vpop.f32.mrb[2].mxu0 }
 0xa65   : > { %11268 = vtanh.f32 %v10430_v30  ;;  %v10432_v9 = vadd.f32 %v10431_v63, %v6977_v41  ;;  %v6979_v42 = vpop.f32.mrb[3].mxu0  ;;  %v7293_v30 = vld [vmem:[#allocation4] sm:$0x1] }
 0xa67   : > { %6611 = vmatmul.mubr.bf16.gmra.mrb[108].mxu1 %v9158_v31  ;;  %11270 = vtanh.f32 %v10432_v9  ;;  %7189 = vmatmul.mubr.bf16.gmra.mrb[108].mxu0 %v9162_v5  ;;  %v3174_v31 = vld [vmem:[%s11767_s25 + $0x4c0] ss:$20 sps:$4 sm:$0xff]   ;;  %v10437_v5 = vadd.f32 %v13054_v58, %v12942_v40  ;;  %v9178_v9 = vcombine.low %v3476_v0, %v3481_v52 }
 0xa68   : > { %6618 = vmatprep.mubr.bf16.mxu1 %v9169_v28  ;;  %9308 = vmatprep.mubr.msk.bf16.mxu0 %vm5683_vm9, %v9173_v24  ;;  %v3488_v32 = vunpack.c.l.s8.bf16 %v3174_v31  ;;  %v3493_v7 = vunpack.c.h.s8.bf16 %v3174_v31 }
 0xa6a   : > { %v6982_v47 = vpop.f32.mrb[4].mxu0 }
 0xa6b   : > { %v10434_v26 = vadd.f32 %v10433_v11, %v6982_v47  ;;  %v6984_v15 = vpop.f32.mrb[5].mxu0  ;;  %v9189_v11 = vcombine.high %v3486_v12, %v3491_v39 }
 0xa6c   : > { %v6985_v37 = vpop.f32.mrb[6].mxu0 }
 0xa6d   : > { %11272 = vtanh.f32 %v10434_v26  ;;  %v10436_v56 = vadd.f32 %v10435_v10, %v6985_v37  ;;  %v6987_v51 = vpop.f32.mrb[7].mxu0  ;;  %v3180_v10 = vld [vmem:[%s11767_s25 + $0x4e8] ss:$20 sps:$4 sm:$0xff]   ;;  %v11433_v26 = vld [vmem:[%s11767_s25 + $0x4f4] sm:$0xff] }
 0xa6e   : > { %v3501_v15 = vunpack.c.l.s8.bf16 %v11433_v26  ;;  %v3503_v37 = vunpack.c.h.s8.bf16 %v3180_v10 }
 0xa6f   : > { %6619 = vmatmul.mubr.bf16.gmra.mrb[112].mxu1 %v9168_v50  ;;  %v11269_v63 = vpop.eup %11268  ;;  %11274 = vtanh.f32 %v10436_v56  ;;  %7197 = vmatmul.mubr.bf16.gmra.mrb[112].mxu0 %v9172_v36  ;;  %v9193_v50 = vcombine.high %v3488_v32, %v3493_v7  ;;  %v10441_v56 = vadd.f32 %v13054_v58, %v12950_v18 }
 0xa70   : > { %6626 = vmatprep.mubr.bf16.mxu1 %v9179_v53  ;;  %v7359_v38 = vrot.slane %v11269_v63, 7  ;;  %9309 = vmatprep.mubr.msk.bf16.mxu0 %vm5683_vm9, %v9183_v61  ;;  %v3498_v53 = vunpack.c.l.s8.bf16 %v3180_v10 }
 0xa71   : > { %v11271_v62 = vpop.eup %11270 }
 0xa72   : > { %v7550_v28 = vsel %vm7358_vm10, %v7293_v30, %v7359_v38  ;;  %v7360_v41 = vrot.slane %v11271_v62, 7  ;;  %v6990_v24 = vpop.f32.mrb[8].mxu0  ;;  %v9188_v30 = vcombine.low %v3486_v12, %v3491_v39 }
 0xa73   : > { %7551 = vst [vmem:[%s11769_s30] sm:$0xff] %v7550_v28  ;;  %7615 = vst [vmem:[%s11771_s22] sm:$0xff] %v7550_v28  ;;  %v10438_v42 = vadd.f32 %v10437_v5, %v6990_v24  ;;  %v6992_v20 = vpop.f32.mrb[9].mxu0  ;;  %v9192_v5 = vcombine.low %v3488_v32, %v3493_v7  ;;  %v9199_v28 = vcombine.high %v3496_v16, %v3501_v15 }
 0xa74   : > { %v7361_v47 = vsel %vm7358_vm10, %v7359_v38, %v7360_v41  ;;  %v6993_v40 = vpop.f32.mrb[10].mxu0  ;;  %v10445_v32 = vadd.f32 %v13054_v58, %v12958_v2 }
 0xa75   : > { %7552 = vst [vmem:[%s11769_s30 + $0x8] sm:$0xff] %v7361_v47  ;;  %7616 = vst [vmem:[%s11771_s22 + $0x8] sm:$0xff] %v7361_v47  ;;  %11276 = vtanh.f32 %v10438_v42  ;;  %v10440_v0 = vadd.f32 %v10439_v29, %v6993_v40  ;;  %v6995_v52 = vpop.f32.mrb[11].mxu0  ;;  %v9203_v29 = vcombine.high %v3498_v53, %v3503_v37 }
 0xa77   : > { %6627 = vmatmul.mubr.bf16.gmra.mrb[116].mxu1 %v9178_v9  ;;  %v11273_v59 = vpop.eup %11272  ;;  %11278 = vtanh.f32 %v10440_v0  ;;  %7205 = vmatmul.mubr.bf16.gmra.mrb[116].mxu0 %v9182_v1  ;;  %v9198_v1 = vcombine.low %v3496_v16, %v3501_v15  ;;  %v10449_v16 = vadd.f32 %v13054_v58, %v12966_v27 }
 0xa78   : > { %6634 = vmatprep.mubr.bf16.mxu1 %v9189_v11  ;;  %v7362_v36 = vrot.slane %v11273_v59, 7  ;;  %9310 = vmatprep.mubr.msk.bf16.mxu0 %vm5683_vm9, %v9193_v50  ;;  %v10447_v11 = vadd.f32 %v13054_v58, %v12960_v46  ;;  %v9202_v50 = vcombine.low %v3498_v53, %v3503_v37  ;;  %v10451_v53 = vadd.f32 %v13054_v58, %v12968_v25 }
 0xa79   : > { %v11275_v61 = vpop.eup %11274 }
 0xa7a   : > { %v7363_v51 = vsel %vm7358_vm10, %v7360_v41, %v7362_v36  ;;  %v7364_v31 = vrot.slane %v11275_v61, 7  ;;  %v6998_v63 = vpop.f32.mrb[12].mxu0 }
 0xa7b   : > { %7553 = vst [vmem:[%s11769_s30 + $0x10] sm:$0xff] %v7363_v51  ;;  %7617 = vst [vmem:[%s11771_s22 + $0x10] sm:$0xff] %v7363_v51  ;;  %v10442_v38 = vadd.f32 %v10441_v56, %v6998_v63  ;;  %v7000_v62 = vpop.f32.mrb[13].mxu0 }
 0xa7c   : > { %v7365_v24 = vsel %vm7358_vm10, %v7362_v36, %v7364_v31  ;;  %v7001_v9 = vpop.f32.mrb[14].mxu0 }
 0xa7d   : > { %7554 = vst [vmem:[%s11769_s30 + $0x18] sm:$0xff] %v7365_v24  ;;  %7618 = vst [vmem:[%s11771_s22 + $0x18] sm:$0xff] %v7365_v24  ;;  %11280 = vtanh.f32 %v10442_v38  ;;  %v10444_v18 = vadd.f32 %v10443_v55, %v7001_v9  ;;  %v7003_v41 = vpop.f32.mrb[15].mxu0  ;;  %v10453_v55 = vadd.f32 %v13054_v58, %v12974_v60 }
 0xa7f   : > { %6635 = vmatmul.mubr.bf16.gmra.mrb[120].mxu1 %v9188_v30  ;;  %v11277_v12 = vpop.eup %11276  ;;  %11282 = vtanh.f32 %v10444_v18  ;;  %7213 = vmatmul.mubr.bf16.gmra.mrb[120].mxu0 %v9192_v5 }
 0xa80   : > { %6642 = vmatprep.mubr.bf16.mxu1 %v9199_v28  ;;  %v7366_v14 = vrot.slane %v11277_v12, 7  ;;  %9311 = vmatprep.mubr.msk.bf16.mxu0 %vm5683_vm9, %v9203_v29  ;;  %v10455_v28 = vadd.f32 %v13054_v58, %v12976_v33 }
 0xa81   : > { %v11279_v39 = vpop.eup %11278 }
 0xa82   : > { %v7367_v7 = vsel %vm7358_vm10, %v7364_v31, %v7366_v14  ;;  %v7368_v42 = vrot.slane %v11279_v39, 7  ;;  %v7006_v20 = vpop.f32.mrb[16].mxu0  ;;  %v10457_v39 = vadd.f32 %v13054_v58, %v12982_v8 }
 0xa83   : > { %7555 = vst [vmem:[%s11769_s30 + $0x20] sm:$0xff] %v7367_v7  ;;  %7619 = vst [vmem:[%s11771_s22 + $0x20] sm:$0xff] %v7367_v7  ;;  %v10446_v47 = vadd.f32 %v10445_v32, %v7006_v20  ;;  %v7008_v40 = vpop.f32.mrb[17].mxu0  ;;  %v10459_v20 = vadd.f32 %v13054_v58, %v12984_v35 }
 0xa84   : > { %v7369_v0 = vsel %vm7358_vm10, %v7366_v14, %v7368_v42  ;;  %v7009_v52 = vpop.f32.mrb[18].mxu0 }
 0xa85   : > { %7556 = vst [vmem:[%s11769_s30 + $0x28] sm:$0xff] %v7369_v0  ;;  %7620 = vst [vmem:[%s11771_s22 + $0x28] sm:$0xff] %v7369_v0  ;;  %11284 = vtanh.f32 %v10446_v47  ;;  %v10448_v2 = vadd.f32 %v10447_v11, %v7009_v52  ;;  %v7011_v10 = vpop.f32.mrb[19].mxu0 }
 0xa87   : > { %6643 = vmatmul.mubr.bf16.gmra.mrb[124].mxu1 %v9198_v1  ;;  %v11281_v59 = vpop.eup %11280  ;;  %11286 = vtanh.f32 %v10448_v2  ;;  %7221 = vmatmul.mubr.bf16.gmra.mrb[124].mxu0 %v9202_v50  ;;  %v10461_v2 = vadd.f32 %v13054_v58, %v12990_v3 }
 0xa88   : > { %v7370_v46 = vrot.slane %v11281_v59, 7 }
 0xa89   : > { %v11283_v22 = vpop.eup %11282 }
 0xa8a   : > { %v7371_v26 = vsel %vm7358_vm10, %v7368_v42, %v7370_v46  ;;  %v7372_v15 = vrot.slane %v11283_v22, 7  ;;  %v7014_v36 = vpop.f32.mrb[20].mxu0  ;;  %v10463_v22 = vadd.f32 %v13054_v58, %v12992_v57 }
 0xa8b   : > { %7557 = vst [vmem:[%s11769_s30 + $0x30] sm:$0xff] %v7371_v26  ;;  %7621 = vst [vmem:[%s11771_s22 + $0x30] sm:$0xff] %v7371_v26  ;;  %v10450_v37 = vadd.f32 %v10449_v16, %v7014_v36  ;;  %v7016_v61 = vpop.f32.mrb[21].mxu0 }
 0xa8c   : > { %v7373_v56 = vsel %vm7358_vm10, %v7370_v46, %v7372_v15  ;;  %v7017_v51 = vpop.f32.mrb[22].mxu0 }
 0xa8d   : > { %7558 = vst [vmem:[%s11769_s30 + $0x38] sm:$0xff] %v7373_v56  ;;  %7622 = vst [vmem:[%s11771_s22 + $0x38] sm:$0xff] %v7373_v56  ;;  %11288 = vtanh.f32 %v10450_v37  ;;  %v10452_v27 = vadd.f32 %v10451_v53, %v7017_v51  ;;  %v7019_v31 = vpop.f32.mrb[23].mxu0  ;;  %v10465_v56 = vadd.f32 %v13054_v58, %v12998_v13 }
 0xa8f   : > { %v11285_v63 = vpop.eup %11284  ;;  %11290 = vtanh.f32 %v10452_v27 }
 0xa90   : > { %v7374_v30 = vrot.slane %v11285_v63, 7  ;;  %v10467_v63 = vadd.f32 %v13054_v58, %v13000_v17 }
 0xa91   : > { %v11287_v25 = vpop.eup %11286 }
 0xa92   : > { %v7375_v38 = vsel %vm7358_vm10, %v7372_v15, %v7374_v30  ;;  %v7376_v62 = vrot.slane %v11287_v25, 7  ;;  %v7022_v5 = vpop.f32.mrb[24].mxu0 }
 0xa93   : > { %7559 = vst [vmem:[%s11769_s30 + $0x40] sm:$0xff] %v7375_v38  ;;  %7623 = vst [vmem:[%s11771_s22 + $0x40] sm:$0xff] %v7375_v38  ;;  %v10454_v24 = vadd.f32 %v10453_v55, %v7022_v5  ;;  %v7024_v9 = vpop.f32.mrb[25].mxu0 }
 0xa94   : > { %v7377_v29 = vsel %vm7358_vm10, %v7374_v30, %v7376_v62  ;;  %v7025_v18 = vpop.f32.mrb[26].mxu0 }
 0xa95   : > { %7560 = vst [vmem:[%s11769_s30 + $0x48] sm:$0xff] %v7377_v29  ;;  %7624 = vst [vmem:[%s11771_s22 + $0x48] sm:$0xff] %v7377_v29  ;;  %11292 = vtanh.f32 %v10454_v24  ;;  %v10456_v60 = vadd.f32 %v10455_v28, %v7025_v18  ;;  %v7027_v41 = vpop.f32.mrb[27].mxu0  ;;  %v10469_v24 = vadd.f32 %v13054_v58, %v13006_v21 }
 0xa97   : > { %v11289_v12 = vpop.eup %11288  ;;  %11294 = vtanh.f32 %v10456_v60  ;;  %v10471_v60 = vadd.f32 %v13054_v58, %v13008_v4 }
 0xa98   : > { %v7378_v14 = vrot.slane %v11289_v12, 7 }
 0xa99   : > { %v11291_v33 = vpop.eup %11290 }
 0xa9a   : > { %v7379_v32 = vsel %vm7358_vm10, %v7376_v62, %v7378_v14  ;;  %v7380_v7 = vrot.slane %v11291_v33, 7  ;;  %v7030_v42 = vpop.f32.mrb[28].mxu0 }
 0xa9b   : > { %7561 = vst [vmem:[%s11769_s30 + $0x50] sm:$0xff] %v7379_v32  ;;  %7625 = vst [vmem:[%s11771_s22 + $0x50] sm:$0xff] %v7379_v32  ;;  %v10458_v1 = vadd.f32 %v10457_v39, %v7030_v42  ;;  %v7032_v11 = vpop.f32.mrb[29].mxu0  ;;  %v10473_v42 = vadd.f32 %v13054_v58, %v13014_v45 }
 0xa9c   : > { %v7381_v47 = vsel %vm7358_vm10, %v7378_v14, %v7380_v7  ;;  %v7033_v40 = vpop.f32.mrb[30].mxu0 }
 0xa9d   : > { %7562 = vst [vmem:[%s11769_s30 + $0x58] sm:$0xff] %v7381_v47  ;;  %7626 = vst [vmem:[%s11771_s22 + $0x58] sm:$0xff] %v7381_v47  ;;  %11296 = vtanh.f32 %v10458_v1  ;;  %v10460_v8 = vadd.f32 %v10459_v20, %v7033_v40  ;;  %v7035_v50 = vpop.f32.mrb[31].mxu0  ;;  %v10475_v47 = vadd.f32 %v13054_v58, %v13016_v44 }
 0xa9f   : > { %v11293_v0 = vpop.eup %11292  ;;  %11298 = vtanh.f32 %v10460_v8 }
 0xaa0   : > { %v7382_v52 = vrot.slane %v11293_v0, 7 }
 0xaa1   : > { %v11295_v35 = vpop.eup %11294 }
 0xaa2   : > { %v7383_v10 = vsel %vm7358_vm10, %v7380_v7, %v7382_v52  ;;  %v7384_v59 = vrot.slane %v11295_v35, 7  ;;  %v7038_v46 = vpop.f32.mrb[32].mxu0 }
 0xaa3   : > { %7563 = vst [vmem:[%s11769_s30 + $0x60] sm:$0xff] %v7383_v10  ;;  %7627 = vst [vmem:[%s11771_s22 + $0x60] sm:$0xff] %v7383_v10  ;;  %v10462_v16 = vadd.f32 %v10461_v2, %v7038_v46  ;;  %v7040_v26 = vpop.f32.mrb[33].mxu0  ;;  %v10477_v10 = vadd.f32 %v13054_v58, %v13022_v23 }
 0xaa4   : > { %v7385_v15 = vsel %vm7358_vm10, %v7382_v52, %v7384_v59  ;;  %v7041_v36 = vpop.f32.mrb[34].mxu0 }
 0xaa5   : > { %7564 = vst [vmem:[%s11769_s30 + $0x68] sm:$0xff] %v7385_v15  ;;  %7628 = vst [vmem:[%s11771_s22 + $0x68] sm:$0xff] %v7385_v15  ;;  %11300 = vtanh.f32 %v10462_v16  ;;  %v10464_v3 = vadd.f32 %v10463_v22, %v7041_v36  ;;  %v7043_v53 = vpop.f32.mrb[35].mxu0  ;;  %v10479_v16 = vadd.f32 %v13054_v58, %v13024_v19 }
 0xaa7   : > { %v11297_v37 = vpop.eup %11296  ;;  %11302 = vtanh.f32 %v10464_v3 }
 0xaa8   : > { %v7386_v61 = vrot.slane %v11297_v37, 7 }
 0xaa9   : > { %v11299_v57 = vpop.eup %11298 }
 0xaaa   : > { %v7387_v51 = vsel %vm7358_vm10, %v7384_v59, %v7386_v61  ;;  %v7388_v27 = vrot.slane %v11299_v57, 7  ;;  %v7046_v31 = vpop.f32.mrb[36].mxu0  ;;  %v10481_v57 = vadd.f32 %v13054_v58, %v13030_v43 }
 0xaab   : > { %7565 = vst [vmem:[%s11769_s30 + $0x70] sm:$0xff] %v7387_v51  ;;  %7629 = vst [vmem:[%s11771_s22 + $0x70] sm:$0xff] %v7387_v51  ;;  %v10466_v30 = vadd.f32 %v10465_v56, %v7046_v31  ;;  %v7048_v25 = vpop.f32.mrb[37].mxu0  ;;  %v10483_v31 = vadd.f32 %v13054_v58, %v13032_v54 }
 0xaac   : > { %v7389_v55 = vsel %vm7358_vm10, %v7386_v61, %v7388_v27  ;;  %v7049_v38 = vpop.f32.mrb[38].mxu0 }
 0xaad   : > { %7566 = vst [vmem:[%s11769_s30 + $0x78] sm:$0xff] %v7389_v55  ;;  %7630 = vst [vmem:[%s11771_s22 + $0x78] sm:$0xff] %v7389_v55  ;;  %11304 = vtanh.f32 %v10466_v30  ;;  %v10468_v13 = vadd.f32 %v10467_v63, %v7049_v38  ;;  %v7051_v62 = vpop.f32.mrb[39].mxu0 }
 0xaaf   : > { %v11301_v5 = vpop.eup %11300  ;;  %11306 = vtanh.f32 %v10468_v13 }
 0xab0   : > { %v7390_v28 = vrot.slane %v11301_v5, 7  ;;  %v10485_v5 = vadd.f32 %v13054_v58, %v13038_v34 }
 0xab1   : > { %v11303_v17 = vpop.eup %11302 }
 0xab2   : > { %v7391_v9 = vsel %vm7358_vm10, %v7388_v27, %v7390_v28  ;;  %v7392_v29 = vrot.slane %v11303_v17, 7  ;;  %v7054_v18 = vpop.f32.mrb[40].mxu0 }
 0xab3   : > { %7567 = vst [vmem:[%s11769_s30 + $0x80] sm:$0xff] %v7391_v9  ;;  %7631 = vst [vmem:[%s11771_s22 + $0x80] sm:$0xff] %v7391_v9  ;;  %v10470_v41 = vadd.f32 %v10469_v24, %v7054_v18  ;;  %v7056_v12 = vpop.f32.mrb[41].mxu0  ;;  %v10487_v9 = vadd.f32 %v13054_v58, %v13040_v6 }
 0xab4   : > { %v7393_v14 = vsel %vm7358_vm10, %v7390_v28, %v7392_v29  ;;  %v7057_v33 = vpop.f32.mrb[42].mxu0 }
 0xab5   : > { %7568 = vst [vmem:[%s11769_s30 + $0x88] sm:$0xff] %v7393_v14  ;;  %7632 = vst [vmem:[%s11771_s22 + $0x88] sm:$0xff] %v7393_v14  ;;  %11308 = vtanh.f32 %v10470_v41  ;;  %v10472_v21 = vadd.f32 %v10471_v60, %v7057_v33  ;;  %v7059_v39 = vpop.f32.mrb[43].mxu0 }
 0xab7   : > { %v11305_v32 = vpop.eup %11304  ;;  %11310 = vtanh.f32 %v10472_v21  ;;  %v10489_v21 = vadd.f32 %v13054_v58, %v13046_v48 }
 0xab8   : > { %v7394_v7 = vrot.slane %v11305_v32, 7 }
 0xab9   : > { %v11307_v4 = vpop.eup %11306 }
 0xaba   : > { %v7395_v20 = vsel %vm7358_vm10, %v7392_v29, %v7394_v7  ;;  %v7396_v1 = vrot.slane %v11307_v4, 7  ;;  %v7062_v11 = vpop.f32.mrb[44].mxu0  ;;  %v10491_v4 = vadd.f32 %v13054_v58, %v13048_v49 }
 0xabb   : > { %7569 = vst [vmem:[%s11769_s30 + $0x90] sm:$0xff] %v7395_v20  ;;  %7633 = vst [vmem:[%s11771_s22 + $0x90] sm:$0xff] %v7395_v20  ;;  %v10474_v40 = vadd.f32 %v10473_v42, %v7062_v11  ;;  %v7064_v8 = vpop.f32.mrb[45].mxu0 }
 0xabc   : > { %v7397_v50 = vsel %vm7358_vm10, %v7394_v7, %v7396_v1  ;;  %v7065_v0 = vpop.f32.mrb[46].mxu0 }
 0xabd   : > { %7570 = vst [vmem:[%s11769_s30 + $0x98] sm:$0xff] %v7397_v50  ;;  %7634 = vst [vmem:[%s11771_s22 + $0x98] sm:$0xff] %v7397_v50  ;;  %11312 = vtanh.f32 %v10474_v40  ;;  %v10476_v45 = vadd.f32 %v10475_v47, %v7065_v0  ;;  %v7067_v52 = vpop.f32.mrb[47].mxu0 }
 0xabf   : > { %v11309_v35 = vpop.eup %11308  ;;  %11314 = vtanh.f32 %v10476_v45 }
 0xac0   : > { %v7398_v2 = vrot.slane %v11309_v35, 7 }
 0xac1   : > { %v11311_v44 = vpop.eup %11310 }
 0xac2   : > { %v7399_v59 = vsel %vm7358_vm10, %v7396_v1, %v7398_v2  ;;  %v7400_v46 = vrot.slane %v11311_v44, 7  ;;  %v7070_v22 = vpop.f32.mrb[48].mxu0 }
 0xac3   : > { %7571 = vst [vmem:[%s11769_s30 + $0xa0] sm:$0xff] %v7399_v59  ;;  %7635 = vst [vmem:[%s11771_s22 + $0xa0] sm:$0xff] %v7399_v59  ;;  %v10478_v26 = vadd.f32 %v10477_v10, %v7070_v22  ;;  %v7072_v15 = vpop.f32.mrb[49].mxu0 }
 0xac4   : > { %v7401_v36 = vsel %vm7358_vm10, %v7398_v2, %v7400_v46  ;;  %v7073_v3 = vpop.f32.mrb[50].mxu0 }
 0xac5   : > { %7572 = vst [vmem:[%s11769_s30 + $0xa8] sm:$0xff] %v7401_v36  ;;  %7636 = vst [vmem:[%s11771_s22 + $0xa8] sm:$0xff] %v7401_v36  ;;  %11316 = vtanh.f32 %v10478_v26  ;;  %v10480_v23 = vadd.f32 %v10479_v16, %v7073_v3  ;;  %v7075_v53 = vpop.f32.mrb[51].mxu0 }
 0xac7   : > { %v11313_v37 = vpop.eup %11312  ;;  %11318 = vtanh.f32 %v10480_v23 }
 0xac8   : > { %v7402_v61 = vrot.slane %v11313_v37, 7 }
 0xac9   : > { %v11315_v19 = vpop.eup %11314 }
 0xaca   : > { %v7403_v56 = vsel %vm7358_vm10, %v7400_v46, %v7402_v61  ;;  %v7404_v51 = vrot.slane %v11315_v19, 7  ;;  %v7078_v27 = vpop.f32.mrb[52].mxu0 }
 0xacb   : > { %7573 = vst [vmem:[%s11769_s30 + $0xb0] sm:$0xff] %v7403_v56  ;;  %7637 = vst [vmem:[%s11771_s22 + $0xb0] sm:$0xff] %v7403_v56  ;;  %v10482_v63 = vadd.f32 %v10481_v57, %v7078_v27  ;;  %v7080_v30 = vpop.f32.mrb[53].mxu0 }
 0xacc   : > { %v7405_v25 = vsel %vm7358_vm10, %v7402_v61, %v7404_v51  ;;  %v7081_v55 = vpop.f32.mrb[54].mxu0 }
 0xacd   : > { %7574 = vst [vmem:[%s11769_s30 + $0xb8] sm:$0xff] %v7405_v25  ;;  %7638 = vst [vmem:[%s11771_s22 + $0xb8] sm:$0xff] %v7405_v25  ;;  %11320 = vtanh.f32 %v10482_v63  ;;  %v10484_v43 = vadd.f32 %v10483_v31, %v7081_v55  ;;  %v7083_v38 = vpop.f32.mrb[55].mxu0 }
 0xacf   : > { %v11317_v13 = vpop.eup %11316  ;;  %11322 = vtanh.f32 %v10484_v43 }
 0xad0   : > { %v7406_v62 = vrot.slane %v11317_v13, 7 }
 0xad1   : > { %v11319_v54 = vpop.eup %11318 }
 0xad2   : > { %v7407_v28 = vsel %vm7358_vm10, %v7404_v51, %v7406_v62  ;;  %v7408_v17 = vrot.slane %v11319_v54, 7  ;;  %v7086_v24 = vpop.f32.mrb[56].mxu0 }
 0xad3   : > { %7575 = vst [vmem:[%s11769_s30 + $0xc0] sm:$0xff] %v7407_v28  ;;  %7639 = vst [vmem:[%s11771_s22 + $0xc0] sm:$0xff] %v7407_v28  ;;  %v10486_v29 = vadd.f32 %v10485_v5, %v7086_v24  ;;  %v7088_v18 = vpop.f32.mrb[57].mxu0 }
 0xad4   : > { %v7409_v60 = vsel %vm7358_vm10, %v7406_v62, %v7408_v17  ;;  %v7089_v41 = vpop.f32.mrb[58].mxu0 }
 0xad5   : > { %7576 = vst [vmem:[%s11769_s30 + $0xc8] sm:$0xff] %v7409_v60  ;;  %7640 = vst [vmem:[%s11771_s22 + $0xc8] sm:$0xff] %v7409_v60  ;;  %11324 = vtanh.f32 %v10486_v29  ;;  %v10488_v34 = vadd.f32 %v10487_v9, %v7089_v41  ;;  %v7091_v12 = vpop.f32.mrb[59].mxu0 }
 0xad7   : > { %v11321_v14 = vpop.eup %11320  ;;  %11326 = vtanh.f32 %v10488_v34 }
 0xad8   : > { %v7410_v33 = vrot.slane %v11321_v14, 7 }
 0xad9   : > { %v11323_v6 = vpop.eup %11322 }
 0xada   : > { %v7411_v39 = vsel %vm7358_vm10, %v7408_v17, %v7410_v33  ;;  %v7412_v32 = vrot.slane %v11323_v6, 7  ;;  %v7094_v7 = vpop.f32.mrb[60].mxu0 }
 0xadb   : > { %7577 = vst [vmem:[%s11769_s30 + $0xd0] sm:$0xff] %v7411_v39  ;;  %7641 = vst [vmem:[%s11771_s22 + $0xd0] sm:$0xff] %v7411_v39  ;;  %v10490_v42 = vadd.f32 %v10489_v21, %v7094_v7  ;;  %v7096_v20 = vpop.f32.mrb[61].mxu0 }
 0xadc   : > { %v7413_v1 = vsel %vm7358_vm10, %v7410_v33, %v7412_v32  ;;  %v7097_v11 = vpop.f32.mrb[62].mxu0 }
 0xadd   : > { %7578 = vst [vmem:[%s11769_s30 + $0xd8] sm:$0xff] %v7413_v1  ;;  %7642 = vst [vmem:[%s11771_s22 + $0xd8] sm:$0xff] %v7413_v1  ;;  %11328 = vtanh.f32 %v10490_v42  ;;  %v10492_v48 = vadd.f32 %v10491_v4, %v7097_v11  ;;  %v7099_v47 = vpop.f32.mrb[63].mxu0 }
 0xadf   : > { %v11325_v40 = vpop.eup %11324  ;;  %11330 = vtanh.f32 %v10492_v48 }
 0xae0   : > { %v7414_v8 = vrot.slane %v11325_v40, 7 }
 0xae1   : > { %v11327_v50 = vpop.eup %11326 }
 0xae2   : > { %v6524_v49 = vpop.f32.mrb[64].mxu1  ;;  %v7415_v0 = vsel %vm7358_vm10, %v7412_v32, %v7414_v8  ;;  %v7416_v45 = vrot.slane %v11327_v50, 7  ;;  %v7102_v35 = vpop.f32.mrb[64].mxu0 }
 0xae3   : > { %v10493_v52 = vadd.f32 %v13054_v58, %v6524_v49  ;;  %v6526_v2 = vpop.f32.mrb[65].mxu1  ;;  %7579 = vst [vmem:[%s11769_s30 + $0xe0] sm:$0xff] %v7415_v0  ;;  %7643 = vst [vmem:[%s11771_s22 + $0xe0] sm:$0xff] %v7415_v0  ;;  %v7104_v44 = vpop.f32.mrb[65].mxu0 }
 0xae4   : > { %v6527_v10 = vpop.f32.mrb[66].mxu1  ;;  %v7417_v59 = vsel %vm7358_vm10, %v7414_v8, %v7416_v45  ;;  %v7105_v16 = vpop.f32.mrb[66].mxu0 }
 0xae5   : > { %v10494_v46 = vadd.f32 %v10493_v52, %v7102_v35  ;;  %v10495_v22 = vadd.f32 %v13054_v58, %v6527_v10  ;;  %v6529_v26 = vpop.f32.mrb[67].mxu1  ;;  %7580 = vst [vmem:[%s11769_s30 + $0xe8] sm:$0xff] %v7417_v59  ;;  %7644 = vst [vmem:[%s11771_s22 + $0xe8] sm:$0xff] %v7417_v59  ;;  %v7107_v15 = vpop.f32.mrb[67].mxu0 }
 0xae7   : > { %11332 = vtanh.f32 %v10494_v46  ;;  %v10496_v36 = vadd.f32 %v10495_v22, %v7105_v16  ;;  %v11329_v3 = vpop.eup %11328 }
 0xae8   : > { %v7418_v23 = vrot.slane %v11329_v3, 7 }
 0xae9   : > { %11334 = vtanh.f32 %v10496_v36  ;;  %v11331_v53 = vpop.eup %11330 }
 0xaea   : > { %v6532_v37 = vpop.f32.mrb[68].mxu1  ;;  %v7419_v61 = vsel %vm7358_vm10, %v7416_v45, %v7418_v23  ;;  %v7420_v19 = vrot.slane %v11331_v53, 7  ;;  %v7110_v56 = vpop.f32.mrb[68].mxu0 }
 0xaeb   : > { %v10497_v57 = vadd.f32 %v13054_v58, %v6532_v37  ;;  %v6534_v51 = vpop.f32.mrb[69].mxu1  ;;  %7581 = vst [vmem:[%s11769_s30 + $0xf0] sm:$0xff] %v7419_v61  ;;  %7645 = vst [vmem:[%s11771_s22 + $0xf0] sm:$0xff] %v7419_v61  ;;  %v7112_v27 = vpop.f32.mrb[69].mxu0 }
 0xaec   : > { %v6535_v31 = vpop.f32.mrb[70].mxu1  ;;  %v7421_v63 = vsel %vm7358_vm10, %v7418_v23, %v7420_v19  ;;  %v7113_v55 = vpop.f32.mrb[70].mxu0 }
 0xaed   : > { %v10498_v30 = vadd.f32 %v10497_v57, %v7110_v56  ;;  %v10499_v25 = vadd.f32 %v13054_v58, %v6535_v31  ;;  %v6537_v43 = vpop.f32.mrb[71].mxu1  ;;  %7582 = vst [vmem:[%s11769_s30 + $0xf8] sm:$0xff] %v7421_v63  ;;  %7646 = vst [vmem:[%s11771_s22 + $0xf8] sm:$0xff] %v7421_v63  ;;  %v7115_v38 = vpop.f32.mrb[71].mxu0 }
 0xaef   : > { %11336 = vtanh.f32 %v10498_v30  ;;  %v10500_v13 = vadd.f32 %v10499_v25, %v7113_v55 }
 0xaf1   : > { %v11333_v62 = vpop.eup %11332  ;;  %11338 = vtanh.f32 %v10500_v13 }
 0xaf2   : > { %v7422_v54 = vrot.slane %v11333_v62, 7  ;;  %v6540_v5 = vpop.f32.mrb[72].mxu1  ;;  %v7118_v24 = vpop.f32.mrb[72].mxu0 }
 0xaf3   : > { %v11335_v28 = vpop.eup %11334  ;;  %v10501_v17 = vadd.f32 %v13054_v58, %v6540_v5  ;;  %v6542_v9 = vpop.f32.mrb[73].mxu1 }
 0xaf4   : > { %v7423_v29 = vsel %vm7358_vm10, %v7420_v19, %v7422_v54  ;;  %v7424_v18 = vrot.slane %v11335_v28, 7  ;;  %v7120_v60 = vpop.f32.mrb[73].mxu0  ;;  %v6543_v41 = vpop.f32.mrb[74].mxu1 }
 0xaf5   : > { %7583 = vst [vmem:[%s11769_s30 + $0x100] sm:$0xff] %v7423_v29  ;;  %7647 = vst [vmem:[%s11771_s22 + $0x100] sm:$0xff] %v7423_v29  ;;  %v10502_v34 = vadd.f32 %v10501_v17, %v7118_v24  ;;  %v10503_v12 = vadd.f32 %v13054_v58, %v6543_v41  ;;  %v7121_v14 = vpop.f32.mrb[74].mxu0  ;;  %v6545_v33 = vpop.f32.mrb[75].mxu1 }
 0xaf6   : > { %v7425_v6 = vsel %vm7358_vm10, %v7422_v54, %v7424_v18  ;;  %v7123_v21 = vpop.f32.mrb[75].mxu0 }
 0xaf7   : > { %7584 = vst [vmem:[%s11769_s30 + $0x108] sm:$0xff] %v7425_v6  ;;  %7648 = vst [vmem:[%s11771_s22 + $0x108] sm:$0xff] %v7425_v6  ;;  %11340 = vtanh.f32 %v10502_v34  ;;  %v10504_v39 = vadd.f32 %v10503_v12, %v7121_v14 }
 0xaf9   : > { %v11337_v32 = vpop.eup %11336  ;;  %11342 = vtanh.f32 %v10504_v39 }
 0xafa   : > { %v7426_v7 = vrot.slane %v11337_v32, 7  ;;  %v6548_v4 = vpop.f32.mrb[76].mxu1  ;;  %v7126_v1 = vpop.f32.mrb[76].mxu0 }
 0xafb   : > { %v11339_v42 = vpop.eup %11338  ;;  %v10505_v20 = vadd.f32 %v13054_v58, %v6548_v4  ;;  %v6550_v11 = vpop.f32.mrb[77].mxu1 }
 0xafc   : > { %v7427_v48 = vsel %vm7358_vm10, %v7424_v18, %v7426_v7  ;;  %v7428_v47 = vrot.slane %v11339_v42, 7  ;;  %v7128_v40 = vpop.f32.mrb[77].mxu0  ;;  %v6551_v8 = vpop.f32.mrb[78].mxu1  ;;  %v13275_v42 = vld [vmem:[%s13886_s9] ss:$0 sm:$0xff] }
 0xafd   : > { %7585 = vst [vmem:[%s11769_s30 + $0x110] sm:$0xff] %v7427_v48  ;;  %7649 = vst [vmem:[%s11771_s22 + $0x110] sm:$0xff] %v7427_v48  ;;  %v10506_v50 = vadd.f32 %v10505_v20, %v7126_v1  ;;  %v10507_v49 = vadd.f32 %v13054_v58, %v6551_v8  ;;  %v7129_v0 = vpop.f32.mrb[78].mxu0  ;;  %v6553_v45 = vpop.f32.mrb[79].mxu1 }
 0xafe   : > { %v7429_v52 = vsel %vm7358_vm10, %v7426_v7, %v7428_v47  ;;  %v7131_v35 = vpop.f32.mrb[79].mxu0 }
 0xaff   : > { %7586 = vst [vmem:[%s11769_s30 + $0x118] sm:$0xff] %v7429_v52  ;;  %7650 = vst [vmem:[%s11771_s22 + $0x118] sm:$0xff] %v7429_v52  ;;  %11344 = vtanh.f32 %v10506_v50  ;;  %v10508_v2 = vadd.f32 %v10507_v49, %v7129_v0 }
 0xb01   : > { %v11341_v44 = vpop.eup %11340  ;;  %11346 = vtanh.f32 %v10508_v2 }
 0xb02   : > { %v7430_v10 = vrot.slane %v11341_v44, 7  ;;  %v6556_v59 = vpop.f32.mrb[80].mxu1  ;;  %v7134_v16 = vpop.f32.mrb[80].mxu0 }
 0xb03   : > { %v11343_v46 = vpop.eup %11342  ;;  %v10509_v22 = vadd.f32 %v13054_v58, %v6556_v59  ;;  %v6558_v26 = vpop.f32.mrb[81].mxu1 }
 0xb04   : > { %v7431_v15 = vsel %vm7358_vm10, %v7428_v47, %v7430_v10  ;;  %v7432_v36 = vrot.slane %v11343_v46, 7  ;;  %v7136_v3 = vpop.f32.mrb[81].mxu0  ;;  %v6559_v23 = vpop.f32.mrb[82].mxu1 }
 0xb05   : > { %7587 = vst [vmem:[%s11769_s30 + $0x120] sm:$0xff] %v7431_v15  ;;  %7651 = vst [vmem:[%s11771_s22 + $0x120] sm:$0xff] %v7431_v15  ;;  %v10510_v53 = vadd.f32 %v10509_v22, %v7134_v16  ;;  %v10511_v37 = vadd.f32 %v13054_v58, %v6559_v23  ;;  %v7137_v61 = vpop.f32.mrb[82].mxu0  ;;  %v6561_v19 = vpop.f32.mrb[83].mxu1 }
 0xb06   : > { %v7433_v57 = vsel %vm7358_vm10, %v7430_v10, %v7432_v36  ;;  %v7139_v56 = vpop.f32.mrb[83].mxu0 }
 0xb07   : > { %7588 = vst [vmem:[%s11769_s30 + $0x128] sm:$0xff] %v7433_v57  ;;  %7652 = vst [vmem:[%s11771_s22 + $0x128] sm:$0xff] %v7433_v57  ;;  %11348 = vtanh.f32 %v10510_v53  ;;  %v10512_v51 = vadd.f32 %v10511_v37, %v7137_v61 }
 0xb09   : > { %v11345_v27 = vpop.eup %11344  ;;  %11350 = vtanh.f32 %v10512_v51 }
 0xb0a   : > { %v7434_v31 = vrot.slane %v11345_v27, 7  ;;  %v6564_v63 = vpop.f32.mrb[84].mxu1  ;;  %v7142_v55 = vpop.f32.mrb[84].mxu0 }
 0xb0b   : > { %v11347_v30 = vpop.eup %11346  ;;  %v10513_v25 = vadd.f32 %v13054_v58, %v6564_v63  ;;  %v6566_v43 = vpop.f32.mrb[85].mxu1 }
 0xb0c   : > { %v7435_v38 = vsel %vm7358_vm10, %v7432_v36, %v7434_v31  ;;  %v7436_v13 = vrot.slane %v11347_v30, 7  ;;  %v7144_v62 = vpop.f32.mrb[85].mxu0  ;;  %v6567_v54 = vpop.f32.mrb[86].mxu1 }
 0xb0d   : > { %7589 = vst [vmem:[%s11769_s30 + $0x130] sm:$0xff] %v7435_v38  ;;  %7653 = vst [vmem:[%s11771_s22 + $0x130] sm:$0xff] %v7435_v38  ;;  %v10514_v5 = vadd.f32 %v10513_v25, %v7142_v55  ;;  %v10515_v28 = vadd.f32 %v13054_v58, %v6567_v54  ;;  %v7145_v17 = vpop.f32.mrb[86].mxu0  ;;  %v6569_v24 = vpop.f32.mrb[87].mxu1 }
 0xb0e   : > { %v7437_v9 = vsel %vm7358_vm10, %v7434_v31, %v7436_v13  ;;  %v7147_v29 = vpop.f32.mrb[87].mxu0 }
 0xb0f   : > { %7590 = vst [vmem:[%s11769_s30 + $0x138] sm:$0xff] %v7437_v9  ;;  %7654 = vst [vmem:[%s11771_s22 + $0x138] sm:$0xff] %v7437_v9  ;;  %11352 = vtanh.f32 %v10514_v5  ;;  %v10516_v18 = vadd.f32 %v10515_v28, %v7145_v17 }
 0xb11   : > { %v11349_v60 = vpop.eup %11348  ;;  %11354 = vtanh.f32 %v10516_v18 }
 0xb12   : > { %v7438_v41 = vrot.slane %v11349_v60, 7  ;;  %v6572_v34 = vpop.f32.mrb[88].mxu1  ;;  %v7150_v33 = vpop.f32.mrb[88].mxu0 }
 0xb13   : > { %v11351_v12 = vpop.eup %11350  ;;  %v10517_v14 = vadd.f32 %v13054_v58, %v6572_v34  ;;  %v6574_v6 = vpop.f32.mrb[89].mxu1 }
 0xb14   : > { %v7439_v21 = vsel %vm7358_vm10, %v7436_v13, %v7438_v41  ;;  %v7440_v39 = vrot.slane %v11351_v12, 7  ;;  %v7152_v32 = vpop.f32.mrb[89].mxu0  ;;  %v6575_v7 = vpop.f32.mrb[90].mxu1 }
 0xb15   : > { %7591 = vst [vmem:[%s11769_s30 + $0x140] sm:$0xff] %v7439_v21  ;;  %7655 = vst [vmem:[%s11771_s22 + $0x140] sm:$0xff] %v7439_v21  ;;  %v10518_v4 = vadd.f32 %v10517_v14, %v7150_v33  ;;  %v10519_v20 = vadd.f32 %v13275_v42, %v6575_v7  ;;  %v7153_v58 = vpop.f32.mrb[90].mxu0  ;;  %v6577_v1 = vpop.f32.mrb[91].mxu1 }
 0xb16   : > { %v7441_v11 = vsel %vm7358_vm10, %v7438_v41, %v7440_v39  ;;  %v7155_v48 = vpop.f32.mrb[91].mxu0 }
 0xb17   : > { %7592 = vst [vmem:[%s11769_s30 + $0x148] sm:$0xff] %v7441_v11  ;;  %7656 = vst [vmem:[%s11771_s22 + $0x148] sm:$0xff] %v7441_v11  ;;  %11356 = vtanh.f32 %v10518_v4  ;;  %v10520_v47 = vadd.f32 %v10519_v20, %v7153_v58 }
 0xb19   : > { %v11353_v40 = vpop.eup %11352  ;;  %11358 = vtanh.f32 %v10520_v47 }
 0xb1a   : > { %v7442_v8 = vrot.slane %v11353_v40, 7  ;;  %v6580_v50 = vpop.f32.mrb[92].mxu1  ;;  %v7158_v45 = vpop.f32.mrb[92].mxu0 }
 0xb1b   : > { %v11355_v49 = vpop.eup %11354  ;;  %v10521_v0 = vadd.f32 %v13275_v42, %v6580_v50  ;;  %v6582_v52 = vpop.f32.mrb[93].mxu1 }
 0xb1c   : > { %v7443_v35 = vsel %vm7358_vm10, %v7440_v39, %v7442_v8  ;;  %v7444_v2 = vrot.slane %v11355_v49, 7  ;;  %v7160_v44 = vpop.f32.mrb[93].mxu0  ;;  %v6583_v10 = vpop.f32.mrb[94].mxu1 }
 0xb1d   : > { %7593 = vst [vmem:[%s11769_s30 + $0x150] sm:$0xff] %v7443_v35  ;;  %7657 = vst [vmem:[%s11771_s22 + $0x150] sm:$0xff] %v7443_v35  ;;  %v10522_v59 = vadd.f32 %v10521_v0, %v7158_v45  ;;  %v10523_v46 = vadd.f32 %v13275_v42, %v6583_v10  ;;  %v7161_v22 = vpop.f32.mrb[94].mxu0  ;;  %v6585_v16 = vpop.f32.mrb[95].mxu1 }
 0xb1e   : > { %v7445_v26 = vsel %vm7358_vm10, %v7442_v8, %v7444_v2  ;;  %v7163_v15 = vpop.f32.mrb[95].mxu0 }
 0xb1f   : > { %7594 = vst [vmem:[%s11769_s30 + $0x158] sm:$0xff] %v7445_v26  ;;  %7658 = vst [vmem:[%s11771_s22 + $0x158] sm:$0xff] %v7445_v26  ;;  %11360 = vtanh.f32 %v10522_v59  ;;  %v10524_v36 = vadd.f32 %v10523_v46, %v7161_v22 }
 0xb21   : > { %v11357_v3 = vpop.eup %11356  ;;  %11362 = vtanh.f32 %v10524_v36 }
 0xb22   : > { %v7446_v23 = vrot.slane %v11357_v3, 7  ;;  %v6588_v53 = vpop.f32.mrb[96].mxu1  ;;  %v7166_v19 = vpop.f32.mrb[96].mxu0 }
 0xb23   : > { %v11359_v37 = vpop.eup %11358  ;;  %v10525_v61 = vadd.f32 %v13275_v42, %v6588_v53  ;;  %v6590_v57 = vpop.f32.mrb[97].mxu1 }
 0xb24   : > { %v7447_v56 = vsel %vm7358_vm10, %v7444_v2, %v7446_v23  ;;  %v7448_v51 = vrot.slane %v11359_v37, 7  ;;  %v7168_v27 = vpop.f32.mrb[97].mxu0  ;;  %v6591_v31 = vpop.f32.mrb[98].mxu1 }
 0xb25   : > { %7595 = vst [vmem:[%s11769_s30 + $0x160] sm:$0xff] %v7447_v56  ;;  %7659 = vst [vmem:[%s11771_s22 + $0x160] sm:$0xff] %v7447_v56  ;;  %v10526_v63 = vadd.f32 %v10525_v61, %v7166_v19  ;;  %v10527_v30 = vadd.f32 %v13275_v42, %v6591_v31  ;;  %v7169_v25 = vpop.f32.mrb[98].mxu0  ;;  %v6593_v55 = vpop.f32.mrb[99].mxu1 }
 0xb26   : > { %v7449_v43 = vsel %vm7358_vm10, %v7446_v23, %v7448_v51  ;;  %v7171_v38 = vpop.f32.mrb[99].mxu0 }
 0xb27   : > { %7596 = vst [vmem:[%s11769_s30 + $0x168] sm:$0xff] %v7449_v43  ;;  %7660 = vst [vmem:[%s11771_s22 + $0x168] sm:$0xff] %v7449_v43  ;;  %11364 = vtanh.f32 %v10526_v63  ;;  %v10528_v13 = vadd.f32 %v10527_v30, %v7169_v25 }
 0xb29   : > { %v11361_v62 = vpop.eup %11360  ;;  %11366 = vtanh.f32 %v10528_v13 }
 0xb2a   : > { %v7450_v54 = vrot.slane %v11361_v62, 7  ;;  %v6596_v5 = vpop.f32.mrb[100].mxu1  ;;  %v7174_v24 = vpop.f32.mrb[100].mxu0 }
 0xb2b   : > { %v11363_v28 = vpop.eup %11362  ;;  %v10529_v17 = vadd.f32 %v13275_v42, %v6596_v5  ;;  %v6598_v9 = vpop.f32.mrb[101].mxu1 }
 0xb2c   : > { %v7451_v29 = vsel %vm7358_vm10, %v7448_v51, %v7450_v54  ;;  %v7452_v18 = vrot.slane %v11363_v28, 7  ;;  %v7176_v60 = vpop.f32.mrb[101].mxu0  ;;  %v6599_v41 = vpop.f32.mrb[102].mxu1 }
 0xb2d   : > { %7597 = vst [vmem:[%s11769_s30 + $0x170] sm:$0xff] %v7451_v29  ;;  %7661 = vst [vmem:[%s11771_s22 + $0x170] sm:$0xff] %v7451_v29  ;;  %v10530_v34 = vadd.f32 %v10529_v17, %v7174_v24  ;;  %v10531_v12 = vadd.f32 %v13275_v42, %v6599_v41  ;;  %v7177_v14 = vpop.f32.mrb[102].mxu0  ;;  %v6601_v33 = vpop.f32.mrb[103].mxu1 }
 0xb2e   : > { %v7453_v6 = vsel %vm7358_vm10, %v7450_v54, %v7452_v18  ;;  %v7179_v21 = vpop.f32.mrb[103].mxu0 }
 0xb2f   : > { %7598 = vst [vmem:[%s11769_s30 + $0x178] sm:$0xff] %v7453_v6  ;;  %7662 = vst [vmem:[%s11771_s22 + $0x178] sm:$0xff] %v7453_v6  ;;  %11368 = vtanh.f32 %v10530_v34  ;;  %v10532_v39 = vadd.f32 %v10531_v12, %v7177_v14 }
 0xb31   : > { %v11365_v32 = vpop.eup %11364  ;;  %11370 = vtanh.f32 %v10532_v39 }
 0xb32   : > { %v7454_v7 = vrot.slane %v11365_v32, 7  ;;  %v6604_v4 = vpop.f32.mrb[104].mxu1  ;;  %v7182_v1 = vpop.f32.mrb[104].mxu0 }
 0xb33   : > { %v11367_v20 = vpop.eup %11366  ;;  %v10533_v58 = vadd.f32 %v13275_v42, %v6604_v4  ;;  %v6606_v11 = vpop.f32.mrb[105].mxu1 }
 0xb34   : > { %v7455_v48 = vsel %vm7358_vm10, %v7452_v18, %v7454_v7  ;;  %v7456_v47 = vrot.slane %v11367_v20, 7  ;;  %v7184_v40 = vpop.f32.mrb[105].mxu0  ;;  %v6607_v8 = vpop.f32.mrb[106].mxu1 }
 0xb35   : > { %7599 = vst [vmem:[%s11769_s30 + $0x180] sm:$0xff] %v7455_v48  ;;  %7663 = vst [vmem:[%s11771_s22 + $0x180] sm:$0xff] %v7455_v48  ;;  %v10534_v50 = vadd.f32 %v10533_v58, %v7182_v1  ;;  %v10535_v49 = vadd.f32 %v13275_v42, %v6607_v8  ;;  %v7185_v0 = vpop.f32.mrb[106].mxu0  ;;  %v6609_v45 = vpop.f32.mrb[107].mxu1 }
 0xb36   : > { %v7457_v52 = vsel %vm7358_vm10, %v7454_v7, %v7456_v47  ;;  %v7187_v35 = vpop.f32.mrb[107].mxu0 }
 0xb37   : > { %7600 = vst [vmem:[%s11769_s30 + $0x188] sm:$0xff] %v7457_v52  ;;  %7664 = vst [vmem:[%s11771_s22 + $0x188] sm:$0xff] %v7457_v52  ;;  %11372 = vtanh.f32 %v10534_v50  ;;  %v10536_v2 = vadd.f32 %v10535_v49, %v7185_v0 }
 0xb39   : > { %v11369_v44 = vpop.eup %11368  ;;  %11374 = vtanh.f32 %v10536_v2 }
 0xb3a   : > { %v7458_v10 = vrot.slane %v11369_v44, 7  ;;  %v6612_v59 = vpop.f32.mrb[108].mxu1  ;;  %v7190_v16 = vpop.f32.mrb[108].mxu0 }
 0xb3b   : > { %v11371_v46 = vpop.eup %11370  ;;  %v10537_v22 = vadd.f32 %v13275_v42, %v6612_v59  ;;  %v6614_v26 = vpop.f32.mrb[109].mxu1 }
 0xb3c   : > { %v7459_v15 = vsel %vm7358_vm10, %v7456_v47, %v7458_v10  ;;  %v7460_v36 = vrot.slane %v11371_v46, 7  ;;  %v7192_v3 = vpop.f32.mrb[109].mxu0  ;;  %v6615_v23 = vpop.f32.mrb[110].mxu1 }
 0xb3d   : > { %7601 = vst [vmem:[%s11769_s30 + $0x190] sm:$0xff] %v7459_v15  ;;  %7665 = vst [vmem:[%s11771_s22 + $0x190] sm:$0xff] %v7459_v15  ;;  %v10538_v53 = vadd.f32 %v10537_v22, %v7190_v16  ;;  %v10539_v37 = vadd.f32 %v13275_v42, %v6615_v23  ;;  %v7193_v61 = vpop.f32.mrb[110].mxu0  ;;  %v6617_v19 = vpop.f32.mrb[111].mxu1 }
 0xb3e   : > { %v7461_v57 = vsel %vm7358_vm10, %v7458_v10, %v7460_v36  ;;  %v7195_v56 = vpop.f32.mrb[111].mxu0 }
 0xb3f   : > { %7602 = vst [vmem:[%s11769_s30 + $0x198] sm:$0xff] %v7461_v57  ;;  %7666 = vst [vmem:[%s11771_s22 + $0x198] sm:$0xff] %v7461_v57  ;;  %11376 = vtanh.f32 %v10538_v53  ;;  %v10540_v51 = vadd.f32 %v10539_v37, %v7193_v61 }
 0xb41   : > { %v11373_v27 = vpop.eup %11372  ;;  %11378 = vtanh.f32 %v10540_v51 }
 0xb42   : > { %v7462_v31 = vrot.slane %v11373_v27, 7  ;;  %v6620_v63 = vpop.f32.mrb[112].mxu1  ;;  %v7198_v55 = vpop.f32.mrb[112].mxu0 }
 0xb43   : > { %v11375_v30 = vpop.eup %11374  ;;  %v10541_v25 = vadd.f32 %v13275_v42, %v6620_v63  ;;  %v6622_v43 = vpop.f32.mrb[113].mxu1 }
 0xb44   : > { %v7463_v38 = vsel %vm7358_vm10, %v7460_v36, %v7462_v31  ;;  %v7464_v13 = vrot.slane %v11375_v30, 7  ;;  %v7200_v62 = vpop.f32.mrb[113].mxu0  ;;  %v6623_v54 = vpop.f32.mrb[114].mxu1 }
 0xb45   : > { %7603 = vst [vmem:[%s11769_s30 + $0x1a0] sm:$0xff] %v7463_v38  ;;  %7667 = vst [vmem:[%s11771_s22 + $0x1a0] sm:$0xff] %v7463_v38  ;;  %v10542_v5 = vadd.f32 %v10541_v25, %v7198_v55  ;;  %v10543_v28 = vadd.f32 %v13275_v42, %v6623_v54  ;;  %v7201_v17 = vpop.f32.mrb[114].mxu0  ;;  %v6625_v24 = vpop.f32.mrb[115].mxu1 }
 0xb46   : > { %v7465_v9 = vsel %vm7358_vm10, %v7462_v31, %v7464_v13  ;;  %v7203_v29 = vpop.f32.mrb[115].mxu0 }
 0xb47   : > { %7604 = vst [vmem:[%s11769_s30 + $0x1a8] sm:$0xff] %v7465_v9  ;;  %7668 = vst [vmem:[%s11771_s22 + $0x1a8] sm:$0xff] %v7465_v9  ;;  %11380 = vtanh.f32 %v10542_v5  ;;  %v10544_v18 = vadd.f32 %v10543_v28, %v7201_v17 }
 0xb49   : > { %v11377_v60 = vpop.eup %11376  ;;  %11382 = vtanh.f32 %v10544_v18 }
 0xb4a   : > { %v7466_v41 = vrot.slane %v11377_v60, 7  ;;  %v6628_v34 = vpop.f32.mrb[116].mxu1  ;;  %v7206_v33 = vpop.f32.mrb[116].mxu0 }
 0xb4b   : > { %v11379_v12 = vpop.eup %11378  ;;  %v10545_v14 = vadd.f32 %v13275_v42, %v6628_v34  ;;  %v6630_v6 = vpop.f32.mrb[117].mxu1  ;;  %v7682_v34 = vld [vmem:[#allocation3] sm:$0x1] (!%p8678_p11) }
 0xb4c   : > { %v7467_v21 = vsel %vm7358_vm10, %v7464_v13, %v7466_v41  ;;  %v7468_v39 = vrot.slane %v11379_v12, 7  ;;  %v7208_v32 = vpop.f32.mrb[117].mxu0  ;;  %v6631_v7 = vpop.f32.mrb[118].mxu1  ;;  %v7685_v12 = vld [vmem:[#allocation3 + $0x1] sm:$0x1] (!%p8678_p11)  ;;  %7683 = vst [vmem:[%s11769_s30] sm:$0x1] (!%p8678_p11), %v7682_v34 }
 0xb4d   : > { %7605 = vst [vmem:[%s11769_s30 + $0x1b0] sm:$0xff] %v7467_v21  ;;  %7669 = vst [vmem:[%s11771_s22 + $0x1b0] sm:$0xff] %v7467_v21  ;;  %v10546_v4 = vadd.f32 %v10545_v14, %v7206_v33  ;;  %v10547_v20 = vadd.f32 %v13275_v42, %v6631_v7  ;;  %v7209_v58 = vpop.f32.mrb[118].mxu0  ;;  %v6633_v1 = vpop.f32.mrb[119].mxu1 }
 0xb4e   : > { %v7469_v11 = vsel %vm7358_vm10, %v7466_v41, %v7468_v39  ;;  %v7211_v48 = vpop.f32.mrb[119].mxu0  ;;  %7686 = vst [vmem:[%s11771_s22] sm:$0x1] (!%p8678_p11), %v7685_v12 }
 0xb4f   : > { %7606 = vst [vmem:[%s11769_s30 + $0x1b8] sm:$0xff] %v7469_v11  ;;  %7670 = vst [vmem:[%s11771_s22 + $0x1b8] sm:$0xff] %v7469_v11  ;;  %11384 = vtanh.f32 %v10546_v4  ;;  %v10548_v47 = vadd.f32 %v10547_v20, %v7209_v58 }
 0xb51   : > { %v11381_v40 = vpop.eup %11380  ;;  %11386 = vtanh.f32 %v10548_v47 }
 0xb52   : > { %v7470_v8 = vrot.slane %v11381_v40, 7  ;;  %v6636_v50 = vpop.f32.mrb[120].mxu1  ;;  %v7214_v45 = vpop.f32.mrb[120].mxu0 }
 0xb53   : > { %v11383_v49 = vpop.eup %11382  ;;  %v10549_v0 = vadd.f32 %v13275_v42, %v6636_v50  ;;  %v6638_v52 = vpop.f32.mrb[121].mxu1 }
 0xb54   : > { %v7471_v35 = vsel %vm7358_vm10, %v7468_v39, %v7470_v8  ;;  %v7472_v2 = vrot.slane %v11383_v49, 7  ;;  %v7216_v44 = vpop.f32.mrb[121].mxu0  ;;  %v6639_v10 = vpop.f32.mrb[122].mxu1 }
 0xb55   : > { %7607 = vst [vmem:[%s11769_s30 + $0x1c0] sm:$0xff] %v7471_v35  ;;  %7671 = vst [vmem:[%s11771_s22 + $0x1c0] sm:$0xff] %v7471_v35  ;;  %v10550_v59 = vadd.f32 %v10549_v0, %v7214_v45  ;;  %v10551_v46 = vadd.f32 %v13275_v42, %v6639_v10  ;;  %v7217_v22 = vpop.f32.mrb[122].mxu0  ;;  %v6641_v16 = vpop.f32.mrb[123].mxu1 }
 0xb56   : > { %v7473_v26 = vsel %vm7358_vm10, %v7470_v8, %v7472_v2  ;;  %v7219_v15 = vpop.f32.mrb[123].mxu0 }
 0xb57   : > { %7608 = vst [vmem:[%s11769_s30 + $0x1c8] sm:$0xff] %v7473_v26  ;;  %7672 = vst [vmem:[%s11771_s22 + $0x1c8] sm:$0xff] %v7473_v26  ;;  %11388 = vtanh.f32 %v10550_v59  ;;  %v10552_v36 = vadd.f32 %v10551_v46, %v7217_v22 }
 0xb59   : > { %v11385_v3 = vpop.eup %11384  ;;  %11390 = vtanh.f32 %v10552_v36 }
 0xb5a   : > { %v7474_v23 = vrot.slane %v11385_v3, 7  ;;  %v6644_v53 = vpop.f32.mrb[124].mxu1  ;;  %v7222_v19 = vpop.f32.mrb[124].mxu0 }
 0xb5b   : > { %v11387_v37 = vpop.eup %11386  ;;  %v10553_v61 = vadd.f32 %v13275_v42, %v6644_v53  ;;  %v6646_v57 = vpop.f32.mrb[125].mxu1 }
 0xb5c   : > { %v7475_v56 = vsel %vm7358_vm10, %v7472_v2, %v7474_v23  ;;  %v7476_v51 = vrot.slane %v11387_v37, 7  ;;  %v7224_v27 = vpop.f32.mrb[125].mxu0  ;;  %v6647_v31 = vpop.f32.mrb[126].mxu1 }
 0xb5d   : > { %7609 = vst [vmem:[%s11769_s30 + $0x1d0] sm:$0xff] %v7475_v56  ;;  %7673 = vst [vmem:[%s11771_s22 + $0x1d0] sm:$0xff] %v7475_v56  ;;  %v10554_v63 = vadd.f32 %v10553_v61, %v7222_v19  ;;  %v10555_v30 = vadd.f32 %v13275_v42, %v6647_v31  ;;  %v7225_v25 = vpop.f32.mrb[126].mxu0  ;;  %v6649_v55 = vpop.f32.mrb[127].mxu1 }
 0xb5e   : > { %v7477_v43 = vsel %vm7358_vm10, %v7474_v23, %v7476_v51  ;;  %v7227_v38 = vpop.f32.mrb[127].mxu0 }
 0xb5f   : > { %7610 = vst [vmem:[%s11769_s30 + $0x1d8] sm:$0xff] %v7477_v43  ;;  %7674 = vst [vmem:[%s11771_s22 + $0x1d8] sm:$0xff] %v7477_v43  ;;  %11392 = vtanh.f32 %v10554_v63  ;;  %v10556_v13 = vadd.f32 %v10555_v30, %v7225_v25 }
 0xb61   : > { %v11389_v62 = vpop.eup %11388  ;;  %11394 = vtanh.f32 %v10556_v13 }
 0xb62   : > { %v7478_v54 = vrot.slane %v11389_v62, 7 }
 0xb63   : > { %v11391_v5 = vpop.eup %11390 }
 0xb64   : > { %v7479_v42 = vsel %vm7358_vm10, %v7476_v51, %v7478_v54  ;;  %v7480_v28 = vrot.slane %v11391_v5, 7 }
 0xb65   : > { %7611 = vst [vmem:[%s11769_s30 + $0x1e0] sm:$0xff] %v7479_v42  ;;  %7675 = vst [vmem:[%s11771_s22 + $0x1e0] sm:$0xff] %v7479_v42 }
 0xb66   : > { %v7481_v17 = vsel %vm7358_vm10, %v7478_v54, %v7480_v28 }
 0xb67   : > { %7612 = vst [vmem:[%s11769_s30 + $0x1e8] sm:$0xff] %v7481_v17  ;;  %7676 = vst [vmem:[%s11771_s22 + $0x1e8] sm:$0xff] %v7481_v17 }
 0xb69   : > { %v11393_v24 = vpop.eup %11392  ;;  %7681 = sbr.rel (%p8678_p11) target bundleno = 2928 (0xb70), region = 68 }
 0xb6a   : > { %v7482_v9 = vrot.slane %v11393_v24, 7 }
 0xb6b   : > { %v11395_v29 = vpop.eup %11394 }
 0xb6c   : > { %v7483_v18 = vsel %vm7358_vm10, %v7480_v28, %v7482_v9  ;;  %v7484_v60 = vrot.slane %v11395_v29, 7 }
 0xb6d   : > { %7613 = vst [vmem:[%s11769_s30 + $0x1f0] sm:$0xff] %v7483_v18  ;;  %7677 = vst [vmem:[%s11771_s22 + $0x1f0] sm:$0xff] %v7483_v18 }
 0xb6e   : > { %v7485_v41 = vsel %vm7358_vm10, %v7482_v9, %v7484_v60 }
 0xb6f   : > { %7614 = vst [vmem:[%s11769_s30 + $0x1f8] sm:$0xff] %v7485_v41  ;;  %7678 = vst [vmem:[%s11771_s22 + $0x1f8] sm:$0xff] %v7485_v41 }
 0xb70 PF: > { %7687 = vst [vmem:[#allocation4 - $0x7] sm:$0x80] %v11395_v29  ;;  %7698 = sbr.rel (!%p11728_p5) target bundleno = 3007 (0xbbf), region = 72  ;;  %s13890_s13 = sld [smem:[#allocation8_spill]] (%p11728_p5) }
 0xb71   : > { %s7700_s15 = ssub.s32 (%p11728_p5), 151, %s11744_s16  ;;  %s13891_s12 = sld [smem:[#allocation38_spill]] (%p11728_p5) }
 0xb72   : > { %p7701_p12 = scmp.lt.s32.totalorder (%p11728_p5), %s7700_s15, 64 }
 0xb76   : > { %s10944_s26 = smul.u32 (%p11728_p5), 151, %s13890_s13 }
 0xb77   : > { %s13919_s15 = smov (!%p7701_p12, %s7700_s15), 64 }
 0xb78   : > { %s7706_s27 = sadd.s32 %s10944_s26, %s11744_s16  ;;  %s9316_s17 = sshll.u32 %s13919_s15, 7 }
 0xb79   : > { %s9318_s19 = sshll.u32 %s7706_s27, 3  ;;  %p9319_p13 = scmp.eq.s32.totalorder %s9316_s17, 0 }
 0xb7a   : > { %s13380_s18 = scalar_lea.vmem %s13891_s12, %s9318_s19   ;;  %s13383_s24 = sshrl.u32 (!%p9319_p13), %s13919_s15, 6 }
 0xb7b   : > { %7711 = sbr.rel (%p9319_p13) target bundleno = 3007 (0xbbf), region = 76  ;;  %p9320_p0 = scmp.le.s32.totalorder (!%p9319_p13), %s13383_s24, 0 }
 0xb82   : > { %8555 = sbr.rel (%p9320_p0) target bundleno = 2986 (0xbaa), region = 235  ;;  %s13892_s10 = smov (!%p9320_p0), %s13380_s18 }
 0xb83   : > { %s13893_s11 = smov (!%p9320_p0), %s11769_s30  ;;  %s13392_s23 = smov (!%p9320_p0), 0  }
 0xb84   : > { %s13394_s21 = smov (!%p9320_p0), 0  }
 0xb89 LB: >> { %v7899_v14 = vld [vmem:[%s11561_s11] sm:$0xff]  ;;  %v7901_v33 = vld [vmem:[%s11561_s11 + $0x8] sm:$0xff]  ;;  %v7903_v6 = vld [vmem:[%s11561_s11 + $0x10] sm:$0xff]  ;;  %s8027_s25 = sadd.s32 1, %s11565_s23  ;;  %s7893_s21 = sadd.s32 1, %s11569_s21   ;;  %s11569_s21 = sphi %s13394_s21, %s7893_s21   ;;  %s11565_s23 = sphi %s13392_s23, %s13896_s23   ;;  %s11561_s11 = sphi %s13893_s11, %s13895_s11   ;;  %s11557_s10 = sphi %s13892_s10, %s13894_s10  }
 0xb8a   : >> { %7900 = vst [vmem:[%s11557_s10] sm:$0xff] %v7899_v14  ;;  %7902 = vst [vmem:[%s11557_s10 + $0x8] sm:$0xff] %v7901_v33  ;;  %v7905_v21 = vld [vmem:[%s11561_s11 + $0x18] sm:$0xff]  ;;  %v7907_v39 = vld [vmem:[%s11561_s11 + $0x20] sm:$0xff]  ;;  %p8028_p1 = scmp.ge.s32.totalorder %s8027_s25, %s13383_s24  ;;  %p7892_p2 = scmp.ge.s32.totalorder %s7893_s21, %s13383_s24 }
 0xb8b   : >> { %7904 = vst [vmem:[%s11557_s10 + $0x10] sm:$0xff] %v7903_v6  ;;  %v7909_v32 = vld [vmem:[%s11561_s11 + $0x28] sm:$0xff]  ;;  %7906 = vst [vmem:[%s11557_s10 + $0x18] sm:$0xff] %v7905_v21  ;;  %v7911_v7 = vld [vmem:[%s11561_s11 + $0x30] sm:$0xff] }
 0xb8c   : >> { %7908 = vst [vmem:[%s11557_s10 + $0x20] sm:$0xff] %v7907_v39  ;;  %7910 = vst [vmem:[%s11557_s10 + $0x28] sm:$0xff] %v7909_v32  ;;  %v7913_v4 = vld [vmem:[%s11561_s11 + $0x38] sm:$0xff]  ;;  %v7915_v20 = vld [vmem:[%s11561_s11 + $0x40] sm:$0xff]  ;;  %s13921_s25 = smov (%p8028_p1, %s8027_s25), 0 }
 0xb8d   : >> { %7912 = vst [vmem:[%s11557_s10 + $0x30] sm:$0xff] %v7911_v7  ;;  %7914 = vst [vmem:[%s11557_s10 + $0x38] sm:$0xff] %v7913_v4  ;;  %v7917_v58 = vld [vmem:[%s11561_s11 + $0x48] sm:$0xff]  ;;  %v7919_v1 = vld [vmem:[%s11561_s11 + $0x50] sm:$0xff]  ;;  %s9321_s20 = sshll.u32 %s13921_s25, 9  ;;  %s13896_s23 = smov %s13921_s25 }
 0xb8e   : >> { %7916 = vst [vmem:[%s11557_s10 + $0x40] sm:$0xff] %v7915_v20  ;;  %v7921_v11 = vld [vmem:[%s11561_s11 + $0x58] sm:$0xff]  ;;  %7918 = vst [vmem:[%s11557_s10 + $0x48] sm:$0xff] %v7917_v58  ;;  %v7923_v48 = vld [vmem:[%s11561_s11 + $0x60] sm:$0xff]  ;;  %s13450_s28 = scalar_lea.vmem %s11769_s30, %s9321_s20 [#allocation5]   ;;  %s13453_s13 = scalar_lea.vmem %s13380_s18, %s9321_s20  }
 0xb8f   : >> { %7920 = vst [vmem:[%s11557_s10 + $0x50] sm:$0xff] %v7919_v1  ;;  %7922 = vst [vmem:[%s11557_s10 + $0x58] sm:$0xff] %v7921_v11  ;;  %v7925_v47 = vld [vmem:[%s11561_s11 + $0x68] sm:$0xff]  ;;  %v7927_v40 = vld [vmem:[%s11561_s11 + $0x70] sm:$0xff] }
 0xb90   : >> { %7924 = vst [vmem:[%s11557_s10 + $0x60] sm:$0xff] %v7923_v48  ;;  %7926 = vst [vmem:[%s11557_s10 + $0x68] sm:$0xff] %v7925_v47  ;;  %v7929_v8 = vld [vmem:[%s11561_s11 + $0x78] sm:$0xff]  ;;  %v7931_v50 = vld [vmem:[%s11561_s11 + $0x80] sm:$0xff] }
 0xb91   : >> { %7928 = vst [vmem:[%s11557_s10 + $0x70] sm:$0xff] %v7927_v40  ;;  %v7933_v49 = vld [vmem:[%s11561_s11 + $0x88] sm:$0xff]  ;;  %7930 = vst [vmem:[%s11557_s10 + $0x78] sm:$0xff] %v7929_v8  ;;  %v7935_v0 = vld [vmem:[%s11561_s11 + $0x90] sm:$0xff] }
 0xb92   : >> { %7932 = vst [vmem:[%s11557_s10 + $0x80] sm:$0xff] %v7931_v50  ;;  %7934 = vst [vmem:[%s11557_s10 + $0x88] sm:$0xff] %v7933_v49  ;;  %v7937_v45 = vld [vmem:[%s11561_s11 + $0x98] sm:$0xff]  ;;  %v7939_v52 = vld [vmem:[%s11561_s11 + $0xa0] sm:$0xff] }
 0xb93   : >> { %7936 = vst [vmem:[%s11557_s10 + $0x90] sm:$0xff] %v7935_v0  ;;  %7938 = vst [vmem:[%s11557_s10 + $0x98] sm:$0xff] %v7937_v45  ;;  %v7941_v35 = vld [vmem:[%s11561_s11 + $0xa8] sm:$0xff]  ;;  %v7943_v2 = vld [vmem:[%s11561_s11 + $0xb0] sm:$0xff] }
 0xb94   : >> { %7940 = vst [vmem:[%s11557_s10 + $0xa0] sm:$0xff] %v7939_v52  ;;  %v7945_v44 = vld [vmem:[%s11561_s11 + $0xb8] sm:$0xff]  ;;  %7942 = vst [vmem:[%s11557_s10 + $0xa8] sm:$0xff] %v7941_v35  ;;  %v7947_v10 = vld [vmem:[%s11561_s11 + $0xc0] sm:$0xff] }
 0xb95   : >> { %7944 = vst [vmem:[%s11557_s10 + $0xb0] sm:$0xff] %v7943_v2  ;;  %7946 = vst [vmem:[%s11557_s10 + $0xb8] sm:$0xff] %v7945_v44  ;;  %v7949_v59 = vld [vmem:[%s11561_s11 + $0xc8] sm:$0xff]  ;;  %v7951_v46 = vld [vmem:[%s11561_s11 + $0xd0] sm:$0xff] }
 0xb96   : >> { %7948 = vst [vmem:[%s11557_s10 + $0xc0] sm:$0xff] %v7947_v10  ;;  %7950 = vst [vmem:[%s11557_s10 + $0xc8] sm:$0xff] %v7949_v59  ;;  %v7953_v22 = vld [vmem:[%s11561_s11 + $0xd8] sm:$0xff]  ;;  %v7955_v16 = vld [vmem:[%s11561_s11 + $0xe0] sm:$0xff] }
 0xb97   : >> { %7952 = vst [vmem:[%s11557_s10 + $0xd0] sm:$0xff] %v7951_v46  ;;  %v7957_v26 = vld [vmem:[%s11561_s11 + $0xe8] sm:$0xff]  ;;  %7954 = vst [vmem:[%s11557_s10 + $0xd8] sm:$0xff] %v7953_v22  ;;  %v7959_v15 = vld [vmem:[%s11561_s11 + $0xf0] sm:$0xff] }
 0xb98   : >> { %7956 = vst [vmem:[%s11557_s10 + $0xe0] sm:$0xff] %v7955_v16  ;;  %7958 = vst [vmem:[%s11557_s10 + $0xe8] sm:$0xff] %v7957_v26  ;;  %v7961_v36 = vld [vmem:[%s11561_s11 + $0xf8] sm:$0xff]  ;;  %v7963_v3 = vld [vmem:[%s11561_s11 + $0x100] sm:$0xff] }
 0xb99   : >> { %7960 = vst [vmem:[%s11557_s10 + $0xf0] sm:$0xff] %v7959_v15  ;;  %7962 = vst [vmem:[%s11557_s10 + $0xf8] sm:$0xff] %v7961_v36  ;;  %v7965_v23 = vld [vmem:[%s11561_s11 + $0x108] sm:$0xff]  ;;  %v7967_v53 = vld [vmem:[%s11561_s11 + $0x110] sm:$0xff] }
 0xb9a   : >> { %7964 = vst [vmem:[%s11557_s10 + $0x100] sm:$0xff] %v7963_v3  ;;  %v7969_v37 = vld [vmem:[%s11561_s11 + $0x118] sm:$0xff]  ;;  %7966 = vst [vmem:[%s11557_s10 + $0x108] sm:$0xff] %v7965_v23  ;;  %v7971_v61 = vld [vmem:[%s11561_s11 + $0x120] sm:$0xff] }
 0xb9b   : >> { %7968 = vst [vmem:[%s11557_s10 + $0x110] sm:$0xff] %v7967_v53  ;;  %7970 = vst [vmem:[%s11557_s10 + $0x118] sm:$0xff] %v7969_v37  ;;  %v7973_v19 = vld [vmem:[%s11561_s11 + $0x128] sm:$0xff]  ;;  %v7975_v57 = vld [vmem:[%s11561_s11 + $0x130] sm:$0xff] }
 0xb9c   : >> { %7972 = vst [vmem:[%s11557_s10 + $0x120] sm:$0xff] %v7971_v61  ;;  %7974 = vst [vmem:[%s11557_s10 + $0x128] sm:$0xff] %v7973_v19  ;;  %v7977_v56 = vld [vmem:[%s11561_s11 + $0x138] sm:$0xff]  ;;  %v7979_v51 = vld [vmem:[%s11561_s11 + $0x140] sm:$0xff] }
 0xb9d   : >> { %7976 = vst [vmem:[%s11557_s10 + $0x130] sm:$0xff] %v7975_v57  ;;  %v7981_v27 = vld [vmem:[%s11561_s11 + $0x148] sm:$0xff]  ;;  %7978 = vst [vmem:[%s11557_s10 + $0x138] sm:$0xff] %v7977_v56  ;;  %v7983_v31 = vld [vmem:[%s11561_s11 + $0x150] sm:$0xff] }
 0xb9e   : >> { %7980 = vst [vmem:[%s11557_s10 + $0x140] sm:$0xff] %v7979_v51  ;;  %7982 = vst [vmem:[%s11557_s10 + $0x148] sm:$0xff] %v7981_v27  ;;  %v7985_v63 = vld [vmem:[%s11561_s11 + $0x158] sm:$0xff]  ;;  %v7987_v30 = vld [vmem:[%s11561_s11 + $0x160] sm:$0xff] }
 0xb9f   : >> { %7984 = vst [vmem:[%s11557_s10 + $0x150] sm:$0xff] %v7983_v31  ;;  %7986 = vst [vmem:[%s11557_s10 + $0x158] sm:$0xff] %v7985_v63  ;;  %v7989_v25 = vld [vmem:[%s11561_s11 + $0x168] sm:$0xff]  ;;  %v7991_v55 = vld [vmem:[%s11561_s11 + $0x170] sm:$0xff] }
 0xba0   : >> { %7988 = vst [vmem:[%s11557_s10 + $0x160] sm:$0xff] %v7987_v30  ;;  %v7993_v43 = vld [vmem:[%s11561_s11 + $0x178] sm:$0xff]  ;;  %7990 = vst [vmem:[%s11557_s10 + $0x168] sm:$0xff] %v7989_v25  ;;  %v7995_v38 = vld [vmem:[%s11561_s11 + $0x180] sm:$0xff] }
 0xba1   : >> { %7992 = vst [vmem:[%s11557_s10 + $0x170] sm:$0xff] %v7991_v55  ;;  %7994 = vst [vmem:[%s11557_s10 + $0x178] sm:$0xff] %v7993_v43  ;;  %v7997_v13 = vld [vmem:[%s11561_s11 + $0x188] sm:$0xff]  ;;  %v7999_v62 = vld [vmem:[%s11561_s11 + $0x190] sm:$0xff] }
 0xba2   : >> { %7996 = vst [vmem:[%s11557_s10 + $0x180] sm:$0xff] %v7995_v38  ;;  %7998 = vst [vmem:[%s11557_s10 + $0x188] sm:$0xff] %v7997_v13  ;;  %v8001_v54 = vld [vmem:[%s11561_s11 + $0x198] sm:$0xff]  ;;  %v8003_v5 = vld [vmem:[%s11561_s11 + $0x1a0] sm:$0xff] }
 0xba3   : >> { %8000 = vst [vmem:[%s11557_s10 + $0x190] sm:$0xff] %v7999_v62  ;;  %v8005_v42 = vld [vmem:[%s11561_s11 + $0x1a8] sm:$0xff]  ;;  %8002 = vst [vmem:[%s11557_s10 + $0x198] sm:$0xff] %v8001_v54  ;;  %v8007_v28 = vld [vmem:[%s11561_s11 + $0x1b0] sm:$0xff]  ;;  %7895 = sbr.rel (!%p7892_p2) target bundleno = 2953 (0xb89), region = 241 }
 0xba4   : >> { %8004 = vst [vmem:[%s11557_s10 + $0x1a0] sm:$0xff] %v8003_v5  ;;  %8006 = vst [vmem:[%s11557_s10 + $0x1a8] sm:$0xff] %v8005_v42  ;;  %v8009_v17 = vld [vmem:[%s11561_s11 + $0x1b8] sm:$0xff]  ;;  %v8011_v24 = vld [vmem:[%s11561_s11 + $0x1c0] sm:$0xff] }
 0xba5   : >> { %8008 = vst [vmem:[%s11557_s10 + $0x1b0] sm:$0xff] %v8007_v28  ;;  %8010 = vst [vmem:[%s11557_s10 + $0x1b8] sm:$0xff] %v8009_v17  ;;  %v8013_v9 = vld [vmem:[%s11561_s11 + $0x1c8] sm:$0xff]  ;;  %v8015_v29 = vld [vmem:[%s11561_s11 + $0x1d0] sm:$0xff] }
 0xba6   : >> { %8012 = vst [vmem:[%s11557_s10 + $0x1c0] sm:$0xff] %v8011_v24  ;;  %v8017_v18 = vld [vmem:[%s11561_s11 + $0x1d8] sm:$0xff]  ;;  %8014 = vst [vmem:[%s11557_s10 + $0x1c8] sm:$0xff] %v8013_v9  ;;  %v8019_v60 = vld [vmem:[%s11561_s11 + $0x1e0] sm:$0xff] }
 0xba7   : >> { %8016 = vst [vmem:[%s11557_s10 + $0x1d0] sm:$0xff] %v8015_v29  ;;  %8018 = vst [vmem:[%s11557_s10 + $0x1d8] sm:$0xff] %v8017_v18  ;;  %v8021_v41 = vld [vmem:[%s11561_s11 + $0x1e8] sm:$0xff]  ;;  %v8023_v34 = vld [vmem:[%s11561_s11 + $0x1f0] sm:$0xff] }
 0xba8   : >> { %8020 = vst [vmem:[%s11557_s10 + $0x1e0] sm:$0xff] %v8019_v60  ;;  %8022 = vst [vmem:[%s11557_s10 + $0x1e8] sm:$0xff] %v8021_v41  ;;  %v8025_v12 = vld [vmem:[%s11561_s11 + $0x1f8] sm:$0xff]  ;;  %s13895_s11 = smov %s13450_s28 }
 0xba9   : >> { %8024 = vst [vmem:[%s11557_s10 + $0x1f0] sm:$0xff] %v8023_v34  ;;  %8026 = vst [vmem:[%s11557_s10 + $0x1f8] sm:$0xff] %v8025_v12  ;;  %s13894_s10 = smov %s13453_s13 }
 0xbaa PF: > { %s13558_s26 = sand.u32 63, %s13919_s15   ;;  %s9497_s27 = sshll.u32 %s13383_s24, 9 }
 0xbab   : > { %s8038_s19 = scalar_lea.vmem %s11769_s30, %s9497_s27 [#allocation5]   ;;  %s8040_s17 = scalar_lea.vmem %s13380_s18, %s9497_s27  }
 0xbac   : > { %p9326_p3 = scmp.le.s32.totalorder %s13558_s26, 0 }
 0xbad   : > { %s11571_s14 = smov (!%p9326_p3), %s8040_s17   ;;  %s11575_s29 = smov (!%p9326_p3), %s8038_s19  }
 0xbae   : > { %8569 = sbr.rel (%p9326_p3) target bundleno = 3007 (0xbbf), region = 246  ;;  %s11579_s12 = smov (!%p9326_p3), 0  }
 0xbaf   : > { %s11583_s25 = smov (!%p9326_p3), 0  }
 0xbb5 LB: >> { %v8050_v14 = vld [vmem:[%s11577_s29] sm:$0xff]  ;;  %s8052_s15 = sadd.s32 1, %s11581_s12  ;;  %s8044_s25 = sadd.s32 1, %s11585_s25   ;;  %s11585_s25 = sphi %s11583_s25, %s8044_s25   ;;  %s11581_s12 = sphi %s11579_s12, %s11580_s12   ;;  %s11577_s29 = sphi %s11575_s29, %s8057_s29   ;;  %s11573_s14 = sphi %s11571_s14, %s8058_s14  }
 0xbb6   : >> { %8051 = vst [vmem:[%s11573_s14] sm:$0xff] %v8050_v14  ;;  %p8053_p4 = scmp.ge.s32.totalorder %s8052_s15, %s13558_s26  ;;  %p8043_p6 = scmp.ge.s32.totalorder %s8044_s25, %s13558_s26 }
 0xbb8   : >> { %s13923_s15 = smov (%p8053_p4, %s8052_s15), 0  ;;  %8046 = sbr.rel (!%p8043_p6) target bundleno = 2997 (0xbb5), region = 252 }
 0xbb9   : >> { %s9327_s30 = sshll.u32 %s13923_s15, 3  ;;  %s11580_s12 = smov %s13923_s15  }
 0xbba   : >> { %s8057_s29 = scalar_lea.vmem %s8038_s19, %s9327_s30 [#allocation5]   ;;  %s8058_s14 = scalar_lea.vmem %s8040_s17, %s9327_s30  }
 0xbbf PF: > { %8064 = sbr.rel (!%p11728_p5) target bundleno = 3086 (0xc0e), region = 124  ;;  %s13898_s24 = sld [smem:[#allocation8_spill]] (%p11728_p5) }
 0xbc0   : > { %s8066_s10 = ssub.s32 (%p11728_p5), 151, %s11744_s16  ;;  %s13899_s26 = sld [smem:[#allocation39_spill]] (%p11728_p5) }
 0xbc1   : > { %p8067_p7 = scmp.lt.s32.totalorder (%p11728_p5), %s8066_s10, 64 }
 0xbc5   : > { %s10945_s11 = smul.u32 (%p11728_p5), 151, %s13898_s24 }
 0xbc6   : > { %s13925_s10 = smov (!%p8067_p7, %s8066_s10), 64 }
 0xbc7   : > { %s8072_s23 = sadd.s32 %s10945_s11, %s11744_s16  ;;  %s9330_s20 = sshll.u32 %s13925_s10, 7 }
 0xbc8   : > { %s9332_s21 = sshll.u32 %s8072_s23, 3  ;;  %p9333_p8 = scmp.eq.s32.totalorder %s9330_s20, 0 }
 0xbc9   : > { %s13577_s27 = scalar_lea.vmem %s13899_s26, %s9332_s21   ;;  %s13580_s19 = sshrl.u32 (!%p9333_p8), %s13925_s10, 6 }
 0xbca   : > { %8077 = sbr.rel (%p9333_p8) target bundleno = 3086 (0xc0e), region = 128  ;;  %p9334_p5 = scmp.le.s32.totalorder (!%p9333_p8), %s13580_s19, 0 }
 0xbd1   : > { %8583 = sbr.rel (%p9334_p5) target bundleno = 3065 (0xbf9), region = 257  ;;  %s13900_s16 = smov (!%p9334_p5), %s13577_s27 }
 0xbd2   : > { %s13901_s17 = smov (!%p9334_p5), %s11771_s22  ;;  %s13589_s14 = smov (!%p9334_p5), 0  }
 0xbd3   : > { %s13591_s29 = smov (!%p9334_p5), 0  }
 0xbd8 LB: >> { %v8265_v33 = vld [vmem:[%s11593_s17] sm:$0xff]  ;;  %v8267_v6 = vld [vmem:[%s11593_s17 + $0x8] sm:$0xff]  ;;  %v8269_v21 = vld [vmem:[%s11593_s17 + $0x10] sm:$0xff]  ;;  %s8393_s12 = sadd.s32 1, %s11597_s14  ;;  %s8259_s29 = sadd.s32 1, %s11601_s29   ;;  %s11601_s29 = sphi %s13591_s29, %s8259_s29   ;;  %s11597_s14 = sphi %s13589_s14, %s13904_s14   ;;  %s11593_s17 = sphi %s13901_s17, %s13903_s17   ;;  %s11589_s16 = sphi %s13900_s16, %s13902_s16  }
 0xbd9   : >> { %8266 = vst [vmem:[%s11589_s16] sm:$0xff] %v8265_v33  ;;  %8268 = vst [vmem:[%s11589_s16 + $0x8] sm:$0xff] %v8267_v6  ;;  %v8271_v39 = vld [vmem:[%s11593_s17 + $0x18] sm:$0xff]  ;;  %v8273_v32 = vld [vmem:[%s11593_s17 + $0x20] sm:$0xff]  ;;  %p8394_p9 = scmp.ge.s32.totalorder %s8393_s12, %s13580_s19  ;;  %p8258_p10 = scmp.ge.s32.totalorder %s8259_s29, %s13580_s19 }
 0xbda   : >> { %8270 = vst [vmem:[%s11589_s16 + $0x10] sm:$0xff] %v8269_v21  ;;  %v8275_v7 = vld [vmem:[%s11593_s17 + $0x28] sm:$0xff]  ;;  %8272 = vst [vmem:[%s11589_s16 + $0x18] sm:$0xff] %v8271_v39  ;;  %v8277_v4 = vld [vmem:[%s11593_s17 + $0x30] sm:$0xff] }
 0xbdb   : >> { %8274 = vst [vmem:[%s11589_s16 + $0x20] sm:$0xff] %v8273_v32  ;;  %8276 = vst [vmem:[%s11589_s16 + $0x28] sm:$0xff] %v8275_v7  ;;  %v8279_v20 = vld [vmem:[%s11593_s17 + $0x38] sm:$0xff]  ;;  %v8281_v58 = vld [vmem:[%s11593_s17 + $0x40] sm:$0xff]  ;;  %s13927_s12 = smov (%p8394_p9, %s8393_s12), 0 }
 0xbdc   : >> { %8278 = vst [vmem:[%s11589_s16 + $0x30] sm:$0xff] %v8277_v4  ;;  %8280 = vst [vmem:[%s11589_s16 + $0x38] sm:$0xff] %v8279_v20  ;;  %v8283_v1 = vld [vmem:[%s11593_s17 + $0x48] sm:$0xff]  ;;  %v8285_v11 = vld [vmem:[%s11593_s17 + $0x50] sm:$0xff]  ;;  %s9335_s25 = sshll.u32 %s13927_s12, 9  ;;  %s13904_s14 = smov %s13927_s12 }
 0xbdd   : >> { %8282 = vst [vmem:[%s11589_s16 + $0x40] sm:$0xff] %v8281_v58  ;;  %v8287_v48 = vld [vmem:[%s11593_s17 + $0x58] sm:$0xff]  ;;  %8284 = vst [vmem:[%s11589_s16 + $0x48] sm:$0xff] %v8283_v1  ;;  %v8289_v47 = vld [vmem:[%s11593_s17 + $0x60] sm:$0xff]  ;;  %s13647_s15 = scalar_lea.vmem %s11771_s22, %s9335_s25 [#allocation6]   ;;  %s13650_s30 = scalar_lea.vmem %s13577_s27, %s9335_s25  }
 0xbde   : >> { %8286 = vst [vmem:[%s11589_s16 + $0x50] sm:$0xff] %v8285_v11  ;;  %8288 = vst [vmem:[%s11589_s16 + $0x58] sm:$0xff] %v8287_v48  ;;  %v8291_v40 = vld [vmem:[%s11593_s17 + $0x68] sm:$0xff]  ;;  %v8293_v8 = vld [vmem:[%s11593_s17 + $0x70] sm:$0xff] }
 0xbdf   : >> { %8290 = vst [vmem:[%s11589_s16 + $0x60] sm:$0xff] %v8289_v47  ;;  %8292 = vst [vmem:[%s11589_s16 + $0x68] sm:$0xff] %v8291_v40  ;;  %v8295_v50 = vld [vmem:[%s11593_s17 + $0x78] sm:$0xff]  ;;  %v8297_v49 = vld [vmem:[%s11593_s17 + $0x80] sm:$0xff] }
 0xbe0   : >> { %8294 = vst [vmem:[%s11589_s16 + $0x70] sm:$0xff] %v8293_v8  ;;  %v8299_v0 = vld [vmem:[%s11593_s17 + $0x88] sm:$0xff]  ;;  %8296 = vst [vmem:[%s11589_s16 + $0x78] sm:$0xff] %v8295_v50  ;;  %v8301_v45 = vld [vmem:[%s11593_s17 + $0x90] sm:$0xff] }
 0xbe1   : >> { %8298 = vst [vmem:[%s11589_s16 + $0x80] sm:$0xff] %v8297_v49  ;;  %8300 = vst [vmem:[%s11589_s16 + $0x88] sm:$0xff] %v8299_v0  ;;  %v8303_v52 = vld [vmem:[%s11593_s17 + $0x98] sm:$0xff]  ;;  %v8305_v35 = vld [vmem:[%s11593_s17 + $0xa0] sm:$0xff] }
 0xbe2   : >> { %8302 = vst [vmem:[%s11589_s16 + $0x90] sm:$0xff] %v8301_v45  ;;  %8304 = vst [vmem:[%s11589_s16 + $0x98] sm:$0xff] %v8303_v52  ;;  %v8307_v2 = vld [vmem:[%s11593_s17 + $0xa8] sm:$0xff]  ;;  %v8309_v44 = vld [vmem:[%s11593_s17 + $0xb0] sm:$0xff] }
 0xbe3   : >> { %8306 = vst [vmem:[%s11589_s16 + $0xa0] sm:$0xff] %v8305_v35  ;;  %v8311_v10 = vld [vmem:[%s11593_s17 + $0xb8] sm:$0xff]  ;;  %8308 = vst [vmem:[%s11589_s16 + $0xa8] sm:$0xff] %v8307_v2  ;;  %v8313_v59 = vld [vmem:[%s11593_s17 + $0xc0] sm:$0xff] }
 0xbe4   : >> { %8310 = vst [vmem:[%s11589_s16 + $0xb0] sm:$0xff] %v8309_v44  ;;  %8312 = vst [vmem:[%s11589_s16 + $0xb8] sm:$0xff] %v8311_v10  ;;  %v8315_v46 = vld [vmem:[%s11593_s17 + $0xc8] sm:$0xff]  ;;  %v8317_v22 = vld [vmem:[%s11593_s17 + $0xd0] sm:$0xff] }
 0xbe5   : >> { %8314 = vst [vmem:[%s11589_s16 + $0xc0] sm:$0xff] %v8313_v59  ;;  %8316 = vst [vmem:[%s11589_s16 + $0xc8] sm:$0xff] %v8315_v46  ;;  %v8319_v16 = vld [vmem:[%s11593_s17 + $0xd8] sm:$0xff]  ;;  %v8321_v26 = vld [vmem:[%s11593_s17 + $0xe0] sm:$0xff] }
 0xbe6   : >> { %8318 = vst [vmem:[%s11589_s16 + $0xd0] sm:$0xff] %v8317_v22  ;;  %v8323_v15 = vld [vmem:[%s11593_s17 + $0xe8] sm:$0xff]  ;;  %8320 = vst [vmem:[%s11589_s16 + $0xd8] sm:$0xff] %v8319_v16  ;;  %v8325_v36 = vld [vmem:[%s11593_s17 + $0xf0] sm:$0xff] }
 0xbe7   : >> { %8322 = vst [vmem:[%s11589_s16 + $0xe0] sm:$0xff] %v8321_v26  ;;  %8324 = vst [vmem:[%s11589_s16 + $0xe8] sm:$0xff] %v8323_v15  ;;  %v8327_v3 = vld [vmem:[%s11593_s17 + $0xf8] sm:$0xff]  ;;  %v8329_v23 = vld [vmem:[%s11593_s17 + $0x100] sm:$0xff] }
 0xbe8   : >> { %8326 = vst [vmem:[%s11589_s16 + $0xf0] sm:$0xff] %v8325_v36  ;;  %8328 = vst [vmem:[%s11589_s16 + $0xf8] sm:$0xff] %v8327_v3  ;;  %v8331_v53 = vld [vmem:[%s11593_s17 + $0x108] sm:$0xff]  ;;  %v8333_v37 = vld [vmem:[%s11593_s17 + $0x110] sm:$0xff] }
 0xbe9   : >> { %8330 = vst [vmem:[%s11589_s16 + $0x100] sm:$0xff] %v8329_v23  ;;  %v8335_v61 = vld [vmem:[%s11593_s17 + $0x118] sm:$0xff]  ;;  %8332 = vst [vmem:[%s11589_s16 + $0x108] sm:$0xff] %v8331_v53  ;;  %v8337_v19 = vld [vmem:[%s11593_s17 + $0x120] sm:$0xff] }
 0xbea   : >> { %8334 = vst [vmem:[%s11589_s16 + $0x110] sm:$0xff] %v8333_v37  ;;  %8336 = vst [vmem:[%s11589_s16 + $0x118] sm:$0xff] %v8335_v61  ;;  %v8339_v57 = vld [vmem:[%s11593_s17 + $0x128] sm:$0xff]  ;;  %v8341_v56 = vld [vmem:[%s11593_s17 + $0x130] sm:$0xff] }
 0xbeb   : >> { %8338 = vst [vmem:[%s11589_s16 + $0x120] sm:$0xff] %v8337_v19  ;;  %8340 = vst [vmem:[%s11589_s16 + $0x128] sm:$0xff] %v8339_v57  ;;  %v8343_v51 = vld [vmem:[%s11593_s17 + $0x138] sm:$0xff]  ;;  %v8345_v27 = vld [vmem:[%s11593_s17 + $0x140] sm:$0xff] }
 0xbec   : >> { %8342 = vst [vmem:[%s11589_s16 + $0x130] sm:$0xff] %v8341_v56  ;;  %v8347_v31 = vld [vmem:[%s11593_s17 + $0x148] sm:$0xff]  ;;  %8344 = vst [vmem:[%s11589_s16 + $0x138] sm:$0xff] %v8343_v51  ;;  %v8349_v63 = vld [vmem:[%s11593_s17 + $0x150] sm:$0xff] }
 0xbed   : >> { %8346 = vst [vmem:[%s11589_s16 + $0x140] sm:$0xff] %v8345_v27  ;;  %8348 = vst [vmem:[%s11589_s16 + $0x148] sm:$0xff] %v8347_v31  ;;  %v8351_v30 = vld [vmem:[%s11593_s17 + $0x158] sm:$0xff]  ;;  %v8353_v25 = vld [vmem:[%s11593_s17 + $0x160] sm:$0xff] }
 0xbee   : >> { %8350 = vst [vmem:[%s11589_s16 + $0x150] sm:$0xff] %v8349_v63  ;;  %8352 = vst [vmem:[%s11589_s16 + $0x158] sm:$0xff] %v8351_v30  ;;  %v8355_v55 = vld [vmem:[%s11593_s17 + $0x168] sm:$0xff]  ;;  %v8357_v43 = vld [vmem:[%s11593_s17 + $0x170] sm:$0xff] }
 0xbef   : >> { %8354 = vst [vmem:[%s11589_s16 + $0x160] sm:$0xff] %v8353_v25  ;;  %v8359_v38 = vld [vmem:[%s11593_s17 + $0x178] sm:$0xff]  ;;  %8356 = vst [vmem:[%s11589_s16 + $0x168] sm:$0xff] %v8355_v55  ;;  %v8361_v13 = vld [vmem:[%s11593_s17 + $0x180] sm:$0xff] }
 0xbf0   : >> { %8358 = vst [vmem:[%s11589_s16 + $0x170] sm:$0xff] %v8357_v43  ;;  %8360 = vst [vmem:[%s11589_s16 + $0x178] sm:$0xff] %v8359_v38  ;;  %v8363_v62 = vld [vmem:[%s11593_s17 + $0x188] sm:$0xff]  ;;  %v8365_v54 = vld [vmem:[%s11593_s17 + $0x190] sm:$0xff] }
 0xbf1   : >> { %8362 = vst [vmem:[%s11589_s16 + $0x180] sm:$0xff] %v8361_v13  ;;  %8364 = vst [vmem:[%s11589_s16 + $0x188] sm:$0xff] %v8363_v62  ;;  %v8367_v5 = vld [vmem:[%s11593_s17 + $0x198] sm:$0xff]  ;;  %v8369_v42 = vld [vmem:[%s11593_s17 + $0x1a0] sm:$0xff] }
 0xbf2   : >> { %8366 = vst [vmem:[%s11589_s16 + $0x190] sm:$0xff] %v8365_v54  ;;  %v8371_v28 = vld [vmem:[%s11593_s17 + $0x1a8] sm:$0xff]  ;;  %8368 = vst [vmem:[%s11589_s16 + $0x198] sm:$0xff] %v8367_v5  ;;  %v8373_v17 = vld [vmem:[%s11593_s17 + $0x1b0] sm:$0xff]  ;;  %8261 = sbr.rel (!%p8258_p10) target bundleno = 3032 (0xbd8), region = 263 }
 0xbf3   : >> { %8370 = vst [vmem:[%s11589_s16 + $0x1a0] sm:$0xff] %v8369_v42  ;;  %8372 = vst [vmem:[%s11589_s16 + $0x1a8] sm:$0xff] %v8371_v28  ;;  %v8375_v24 = vld [vmem:[%s11593_s17 + $0x1b8] sm:$0xff]  ;;  %v8377_v9 = vld [vmem:[%s11593_s17 + $0x1c0] sm:$0xff] }
 0xbf4   : >> { %8374 = vst [vmem:[%s11589_s16 + $0x1b0] sm:$0xff] %v8373_v17  ;;  %8376 = vst [vmem:[%s11589_s16 + $0x1b8] sm:$0xff] %v8375_v24  ;;  %v8379_v29 = vld [vmem:[%s11593_s17 + $0x1c8] sm:$0xff]  ;;  %v8381_v18 = vld [vmem:[%s11593_s17 + $0x1d0] sm:$0xff] }
 0xbf5   : >> { %8378 = vst [vmem:[%s11589_s16 + $0x1c0] sm:$0xff] %v8377_v9  ;;  %v8383_v60 = vld [vmem:[%s11593_s17 + $0x1d8] sm:$0xff]  ;;  %8380 = vst [vmem:[%s11589_s16 + $0x1c8] sm:$0xff] %v8379_v29  ;;  %v8385_v41 = vld [vmem:[%s11593_s17 + $0x1e0] sm:$0xff] }
 0xbf6   : >> { %8382 = vst [vmem:[%s11589_s16 + $0x1d0] sm:$0xff] %v8381_v18  ;;  %8384 = vst [vmem:[%s11589_s16 + $0x1d8] sm:$0xff] %v8383_v60  ;;  %v8387_v34 = vld [vmem:[%s11593_s17 + $0x1e8] sm:$0xff]  ;;  %v8389_v12 = vld [vmem:[%s11593_s17 + $0x1f0] sm:$0xff] }
 0xbf7   : >> { %8386 = vst [vmem:[%s11589_s16 + $0x1e0] sm:$0xff] %v8385_v41  ;;  %8388 = vst [vmem:[%s11589_s16 + $0x1e8] sm:$0xff] %v8387_v34  ;;  %v8391_v14 = vld [vmem:[%s11593_s17 + $0x1f8] sm:$0xff]  ;;  %s13903_s17 = smov %s13647_s15 }
 0xbf8   : >> { %8390 = vst [vmem:[%s11589_s16 + $0x1f0] sm:$0xff] %v8389_v12  ;;  %8392 = vst [vmem:[%s11589_s16 + $0x1f8] sm:$0xff] %v8391_v14  ;;  %s13902_s16 = smov %s13650_s30 }
 0xbf9 PF: > { %s13755_s18 = sand.u32 63, %s13925_s10   ;;  %s9499_s24 = sshll.u32 %s13580_s19, 9 }
 0xbfa   : > { %s8404_s11 = scalar_lea.vmem %s11771_s22, %s9499_s24 [#allocation6]   ;;  %s8406_s23 = scalar_lea.vmem %s13577_s27, %s9499_s24  }
 0xbfb   : > { %p9340_p11 = scmp.le.s32.totalorder %s13755_s18, 0 }
 0xbfc   : > { %s11603_s21 = smov (!%p9340_p11), %s8406_s23   ;;  %s11607_s20 = smov (!%p9340_p11), %s8404_s11  }
 0xbfd   : > { %8597 = sbr.rel (%p9340_p11) target bundleno = 3086 (0xc0e), region = 268  ;;  %s11611_s28 = smov (!%p9340_p11), 0  }
 0xbfe   : > { %s11615_s13 = smov (!%p9340_p11), 0  }
 0xc04 LB: >> { %v8416_v33 = vld [vmem:[%s11609_s20] sm:$0xff]  ;;  %s8418_s10 = sadd.s32 1, %s11613_s28  ;;  %s8410_s13 = sadd.s32 1, %s11617_s13   ;;  %s11617_s13 = sphi %s11615_s13, %s8410_s13   ;;  %s11613_s28 = sphi %s11611_s28, %s11612_s28   ;;  %s11609_s20 = sphi %s11607_s20, %s8423_s20   ;;  %s11605_s21 = sphi %s11603_s21, %s8424_s21  }
 0xc05   : >> { %8417 = vst [vmem:[%s11605_s21] sm:$0xff] %v8416_v33  ;;  %p8419_p12 = scmp.ge.s32.totalorder %s8418_s10, %s13755_s18  ;;  %p8409_p13 = scmp.ge.s32.totalorder %s8410_s13, %s13755_s18 }
 0xc07   : >> { %s13929_s10 = smov (%p8419_p12, %s8418_s10), 0  ;;  %8412 = sbr.rel (!%p8409_p13) target bundleno = 3076 (0xc04), region = 274 }
 0xc08   : >> { %s9341_s22 = sshll.u32 %s13929_s10, 3  ;;  %s11612_s28 = smov %s13929_s10  }
 0xc09   : >> { %s8423_s20 = scalar_lea.vmem %s8404_s11, %s9341_s22 [#allocation6]   ;;  %s8424_s21 = scalar_lea.vmem %s8406_s23, %s9341_s22  }
 0xc0e PF: > { %s13905_s26 = sld [smem:[#allocation11_spill]]  ;;  %s13906_s17 = sld [smem:[#allocation7_spill]] }
 0xc0f   : > { %s13907_s18 = sld [smem:[#allocation15_spill]]  ;;  %s13908_s19 = sld [smem:[#allocation9_spill]] }
 0xc10   : > { %s13909_s20 = sld [smem:[#allocation10_spill]]  ;;  %s13910_s21 = sld [smem:[#allocation12_spill]] }
 0xc11   : > { %s13911_s22 = sld [smem:[#allocation14_spill]] }
 0xc14   : > { %s22_s23 = sadd.s32 1, %s13905_s26  }
 0xc15   : > { %p19_p0 = scmp.ge.s32.totalorder %s22_s23, 8  }
 0xc17   :  { %21 = sbr.rel (!%p19_p0) target bundleno = 8 (0x8), region = 285 }

</bundles_post_ra>
